<compile_context>
chip_gen: v7x
topology: tpu7x:2x2x1
jax: 0.10.0
libtpu: 0.0.40
codegen_flags: <defaults>
</compile_context>

<pallas_src>
import jax
import jax.numpy as jnp
from jax.experimental import pallas as pl
from jax.experimental.pallas import tpu as pltpu

BN_EPS = 1e-5
_VMEM_LIMIT = 48 * 1024 * 1024   # headroom on v7x (64 MiB phys), fine on v5e/v6e


def _round_up(x, mult=128):
    return ((x + mult - 1) // mult) * mult


def _choose_tm(m, k=1, cap=512, row_cap=4096):
    """Largest m-tile <= cap with tm*k <= row_cap that divides m
    (multiple of 8 keeps output blocks tile-aligned)."""
    lim = min(cap, max(8, row_cap // max(k, 1)))
    if m <= lim:
        return m
    for tm in range(lim - lim % 8, 0, -8):
        if m % tm == 0:
            return tm
    return m


# ------------------------- Pallas kernels (hot path) -------------------------

def _lba_max_kernel(gp_ref, gx_ref, wp_ref, wx_ref, shift_ref, out_ref):
    """PointSetAbstraction mlp: 1x1 Conv (split pos/feat matmuls, BN scale
    pre-folded into weights) + shift + ReLU, then max over the k neighbours.

    gp_ref: (1, TM*k, 3)    bf16   relative coords / radius
    gx_ref: (1, TM*k, cin)  bf16   neighbour features
    out:    (1, TM, cout)          per-point max-pooled features
    Rows are point-major / neighbour-minor, so one tall MXU matmul, then
    reshape (TM, k, cout) + max(axis=1).
    """
    tm = out_ref.shape[1]
    cout = out_ref.shape[2]
    k = gx_ref.shape[1] // tm
    y = jnp.dot(gx_ref[0], wx_ref[...], preferred_element_type=jnp.float32)
    y = y + jnp.dot(gp_ref[0], wp_ref[...], preferred_element_type=jnp.float32)
    y = jnp.maximum(y + shift_ref[...], 0.0)                    # f32 epilogue
    out_ref[0] = jnp.max(y.reshape(tm, k, cout), axis=1).astype(out_ref.dtype)


def lba_max(gp, gx, wp, wx, shift, k, out_dtype=jnp.float32):
    """gp: (b, m*k, 3) bf16, gx: (b, m*k, cin) bf16 -> (b, m, cout)."""
    b, mk, cin = gx.shape
    m = mk // k
    cout = wx.shape[1]
    tm = _choose_tm(m, k)
    return pl.pallas_call(
        _lba_max_kernel,
        out_shape=jax.ShapeDtypeStruct((b, m, cout), out_dtype),
        grid=(b, m // tm),
        in_specs=[
            pl.BlockSpec((1, tm * k, 3), lambda i, j: (i, j, 0)),
            pl.BlockSpec((1, tm * k, cin), lambda i, j: (i, j, 0)),
            pl.BlockSpec((3, cout), lambda i, j: (0, 0)),
            pl.BlockSpec((cin, cout), lambda i, j: (0, 0)),
            pl.BlockSpec((1, cout), lambda i, j: (0, 0)),
        ],
        out_specs=pl.BlockSpec((1, tm, cout), lambda i, j: (i, j, 0)),
        compiler_params=pltpu.CompilerParams(
            dimension_semantics=("parallel", "parallel"),
            vmem_limit_bytes=_VMEM_LIMIT),
    )(gp, gx, wp, wx, shift)


def _invres_kernel(gp_ref, gx_ref, x_ref, wp_ref, wx_ref, b1_ref,
                   w2_ref, b2_ref, w3_ref, b3_ref, out_ref):
    """Fully fused InvResMLP body for one (batch, m-tile) block:
      lba1:  (TM*k, 3)@(3,c) + (TM*k, c)@(c,c) + shift, ReLU, max over k
      lba2:  (TM, c)@(c,4c) + shift, ReLU, (TM, 4c)@(4c,c) + shift
      out  = ReLU(x + lba2)
    BN scale folded into weights; matmul operands bf16, epilogues f32."""
    tm = out_ref.shape[1]
    c = out_ref.shape[2]
    k = gx_ref.shape[1] // tm

    # lba1 + max over neighbours
    y = jnp.dot(gx_ref[0], wx_ref[...], preferred_element_type=jnp.float32)
    y = y + jnp.dot(gp_ref[0], wp_ref[...], preferred_element_type=jnp.float32)
    y = jnp.maximum(y + b1_ref[...], 0.0)
    h = jnp.max(y.reshape(tm, k, c), axis=1)                    # (TM, c) f32

    # lba2 expand -> contract, residual, final ReLU
    z = jnp.dot(h.astype(jnp.bfloat16), w2_ref[...],
                preferred_element_type=jnp.float32)
    z = jnp.maximum(z + b2_ref[...], 0.0)
    z = jnp.dot(z.astype(jnp.bfloat16), w3_ref[...],
                preferred_element_type=jnp.float32)
    z = z + b3_ref[...]
    out_ref[0] = jnp.maximum(x_ref[0] + z, 0.0)


def invres_block(gp, gx, x, blk, k):
    """gp: (b, m*k, 3) bf16, gx: (b, m*k, c) bf16, x: (b, m, c) f32
    -> (b, m, c) f32 (next x)."""
    b, m, c = x.shape
    ch = blk["w2"].shape[1]
    tm = _choose_tm(m, k)
    return pl.pallas_call(
        _invres_kernel,
        out_shape=jax.ShapeDtypeStruct((b, m, c), jnp.float32),
        grid=(b, m // tm),
        in_specs=[
            pl.BlockSpec((1, tm * k, 3), lambda i, j: (i, j, 0)),
            pl.BlockSpec((1, tm * k, c), lambda i, j: (i, j, 0)),
            pl.BlockSpec((1, tm, c), lambda i, j: (i, j, 0)),
            pl.BlockSpec((3, c), lambda i, j: (0, 0)),
            pl.BlockSpec((c, c), lambda i, j: (0, 0)),
            pl.BlockSpec((1, c), lambda i, j: (0, 0)),
            pl.BlockSpec((c, ch), lambda i, j: (0, 0)),
            pl.BlockSpec((1, ch), lambda i, j: (0, 0)),
            pl.BlockSpec((ch, c), lambda i, j: (0, 0)),
            pl.BlockSpec((1, c), lambda i, j: (0, 0)),
        ],
        out_specs=pl.BlockSpec((1, tm, c), lambda i, j: (i, j, 0)),
        compiler_params=pltpu.CompilerParams(
            dimension_semantics=("parallel", "parallel"),
            vmem_limit_bytes=_VMEM_LIMIT),
    )(gp, gx, x, blk["wp1"], blk["wx1"], blk["b1"],
      blk["w2"], blk["b2"], blk["w3"], blk["b3"])


# --------------------------- JAX glue (sampling/grouping) ---------------------------
# TODO(synk): fps_cuda.fps / ball_query_cuda2 are data-dependent sampling+gather CUDA
# ops; reproduced as plain JAX glue (iterative argmax FPS / radius ball query padded
# with the first in-range neighbour).  The neighbour gather could be fused into the
# Pallas kernels via PrefetchScalarGridSpec + manual DMA; left as glue for now.

def fps(points, nsamples):
    """points: (b, n, 3) -> indices (b, nsamples).  Matches reference init:
    distances start at 1e10 and the first selected index is 0."""
    b, n, _ = points.shape

    def per_batch(pts):
        def body(i, carry):
            dis, idx = carry
            last = pts[idx[i - 1]]
            d = jnp.sum((pts - last) ** 2, axis=-1)
            dis = jnp.minimum(dis, d)
            idx = idx.at[i].set(jnp.argmax(dis).astype(jnp.int32))
            return dis, idx

        dis0 = jnp.full((n,), 1e10, dtype=jnp.float32)
        idx0 = jnp.zeros((nsamples,), dtype=jnp.int32)
        _, idx = jax.lax.fori_loop(1, nsamples, body, (dis0, idx0))
        return idx

    return jax.vmap(per_batch)(points)


def group(radius, k, centroids, points, features):
    """Ball-query grouping.
    centroids (b,m,3), points (b,n,3), features (b,n,c)
    -> gp (b, m*k, 3) bf16 (relative coords / radius), gx (b, m*k, c) bf16.
    Rows are point-major / neighbour-minor so kernels can matmul them flat."""
    b, m, _ = centroids.shape
    n = points.shape[1]
    c = features.shape[2]
    d2 = jnp.sum((centroids[:, :, None, :] - points[:, None, :, :]) ** 2, axis=-1)
    mask = d2 < radius * radius
    order = jnp.where(mask, jnp.arange(n, dtype=jnp.int32)[None, None, :], n)
    idx = jnp.sort(order, axis=-1)[:, :, :k]              # first k in-range (point order)
    first = idx[:, :, :1]
    idx = jnp.where(idx >= n, first, idx)                 # pad with first valid neighbour
    # NOTE: if a centroid had zero in-range neighbours this clamps to point n-1;
    # cannot trigger here because centroids are drawn from the point set (d2=0).
    idx = jnp.minimum(idx, n - 1).astype(jnp.int32)       # (b, m, k)

    gather = jax.vmap(lambda arr, ind: arr[ind])
    gp = gather(points, idx)                              # (b, m, k, 3)
    gx = gather(features.astype(jnp.bfloat16), idx)       # (b, m, k, c) bf16
    gp = ((gp - centroids[:, :, None, :]) / radius).astype(jnp.bfloat16)
    return gp.reshape(b, m * k, 3), gx.reshape(b, m * k, c)


# --------------------------- parameters (BN folded, padded, bf16) ---------------------------

def _conv_w(key, cin, cout):
    std = (2.0 / cin) ** 0.5
    return std * jax.random.normal(key, (cin, cout), jnp.float32)


def _bn_raw(key, c):
    k1, k2, k3, k4 = jax.random.split(key, 4)
    gamma = 1.0 + 0.1 * jax.random.normal(k1, (c,), jnp.float32)
    beta = 0.1 * jax.random.normal(k2, (c,), jnp.float32)
    mean = 0.1 * jax.random.normal(k3, (c,), jnp.float32)
    var = 1.0 + 0.1 * jax.random.uniform(k4, (c,), jnp.float32)
    return gamma, beta, mean, var


def _fold_bn_into(w, key_bn, cout):
    """Fold eval-mode BN scale into the conv weight; return (w_scaled, shift)."""
    gamma, beta, mean, var = _bn_raw(key_bn, cout)
    scale = gamma / jnp.sqrt(var + BN_EPS)
    return w * scale[None, :], beta - mean * scale


def _pad_w(w, rows, cols):
    return jnp.pad(w, ((0, rows - w.shape[0]), (0, cols - w.shape[1])))


def _pad_shift(s, cols):
    return jnp.pad(s, (0, cols - s.shape[0]))[None, :].astype(jnp.float32)


def init_params(key, in_channels, out_channels, invres_num):
    c = out_channels
    cp = _round_up(c, 128)        # lane-dense padded channel count
    chp = _round_up(4 * c, 128)   # lane-dense padded hidden (expansion) count
    keys = jax.random.split(key, 1 + invres_num)

    # PointSetAbstractionLayer mlp: Conv2d(in+3 -> c) + BN + ReLU
    k_w, k_bn = jax.random.split(keys[0])
    w, shift = _fold_bn_into(_conv_w(k_w, in_channels + 3, c), k_bn, c)
    sa = dict(
        wp=_pad_w(w[:3], 3, cp).astype(jnp.bfloat16),
        wx=_pad_w(w[3:], in_channels, cp).astype(jnp.bfloat16),
        shift=_pad_shift(shift, cp),
    )

    blocks = []
    for i in range(invres_num):
        bk = jax.random.split(keys[1 + i], 6)
        # lba1: Conv2d(c+3 -> c) + BN + ReLU   (input features are cp-padded)
        w1, s1 = _fold_bn_into(_conv_w(bk[0], c + 3, c), bk[1], c)
        # lba2: Conv1d(c -> 4c)+BN+ReLU -> Conv1d(4c -> c)+BN
        w2, s2 = _fold_bn_into(_conv_w(bk[2], c, 4 * c), bk[3], 4 * c)
        w3, s3 = _fold_bn_into(_conv_w(bk[4], 4 * c, c), bk[5], c)
        blocks.append(dict(
            wp1=_pad_w(w1[:3], 3, cp).astype(jnp.bfloat16),
            wx1=_pad_w(w1[3:], cp, cp).astype(jnp.bfloat16),
            b1=_pad_shift(s1, cp),
            w2=_pad_w(w2, cp, chp).astype(jnp.bfloat16),
            b2=_pad_shift(s2, chp),
            w3=_pad_w(w3, chp, cp).astype(jnp.bfloat16),
            b3=_pad_shift(s3, cp),
        ))
    return dict(sa=sa, blocks=blocks, c=c, cp=cp)


# --------------------------- StageBlocks forward ---------------------------

def make_stage_blocks(params, stride, radius, k):
    c = params["c"]

    def forward(pos, x, y):
        b, n, _ = pos.shape
        m = n // stride
        take = jax.vmap(lambda arr, ind: arr[ind])

        # PointSetAbstractionLayer
        fps_idx = fps(pos, m)
        centroids = take(pos, fps_idx)                         # (b, m, 3)
        y_out = take(y, fps_idx)                               # (b, m)
        gp, gx = group(radius, k, centroids, pos, x)
        feat = lba_max(gp, gx, params["sa"]["wp"], params["sa"]["wx"],
                       params["sa"]["shift"], k, out_dtype=jnp.float32)  # (b, m, cp) f32

        pos_cur, x_cur = centroids, feat
        # InvResMLP blocks (radius doubled, as in the reference constructor)
        for blk in params["blocks"]:
            gp_i, gx_i = group(radius * 2.0, k, pos_cur, pos_cur, x_cur)
            x_cur = invres_block(gp_i, gx_i, x_cur, blk, k)    # fused lba1+max+lba2+res+ReLU
        # padded channels are exactly zero throughout; strip them once here
        return pos_cur, x_cur[:, :, :c], y_out

    return jax.jit(forward)


# --------------------------- demo ---------------------------

if __name__ == "__main__":
    key = jax.random.PRNGKey(0)
    b, n, in_channels = 2, 64, 4
    stride, radius, k = 2, 0.3, 8
    out_channels, invres_num = 32, 2

    kp, kx, kparam = jax.random.split(key, 3)
    pos = jax.random.uniform(kp, (b, n, 3), dtype=jnp.float32)
    x = jax.random.normal(kx, (b, n, in_channels), dtype=jnp.float32)
    y = jax.random.randint(jax.random.PRNGKey(1), (b, n), 0, 13, dtype=jnp.int32)

    params = init_params(kparam, in_channels, out_channels, invres_num)
    stage_blocks = make_stage_blocks(params, stride, radius, k)

    pos_out, x_out, y_out = stage_blocks(pos, x, y)
    jax.block_until_ready((pos_out, x_out, y_out))

    m = n // stride
    assert pos_out.shape == (b, m, 3)
    assert x_out.shape == (b, m, out_channels)
    assert y_out.shape == (b, m)
    assert bool(jnp.all(jnp.isfinite(x_out)))
    print("KERNEL_OK")
</pallas_src>

<mosaic_0001>
module attributes {stable_mosaic.version = 11 : i64} {
  func.func @_lba_max_kernel(%arg0: i32, %arg1: i32, %arg2: memref<1x256x3xbf16, #tpu.memory_space<vmem>>, %arg3: memref<1x256x4xbf16, #tpu.memory_space<vmem>>, %arg4: memref<3x128xbf16, #tpu.memory_space<vmem>>, %arg5: memref<4x128xbf16, #tpu.memory_space<vmem>>, %arg6: memref<1x128xf32, #tpu.memory_space<vmem>>, %arg7: memref<1x32x128xf32, #tpu.memory_space<vmem>>) attributes {dimension_semantics = [#tpu.dimension_semantics<parallel>, #tpu.dimension_semantics<parallel>], iteration_bounds = array<i64: 2, 1>, scalar_prefetch = 0 : i64, scratch_operands = 0 : i64, tpu.core_type = #tpu.core_type<tc>, window_params = [{transform_indices = @transform_0, window_bounds = array<i64: 1, 256, 3>}, {transform_indices = @transform_1, window_bounds = array<i64: 1, 256, 4>}, {pipeline_mode = #tpu.pipeline_mode<synchronous>, transform_indices = @transform_2, window_bounds = array<i64: 3, 128>}, {pipeline_mode = #tpu.pipeline_mode<synchronous>, transform_indices = @transform_3, window_bounds = array<i64: 4, 128>}, {pipeline_mode = #tpu.pipeline_mode<synchronous>, transform_indices = @transform_4, window_bounds = array<i64: 1, 128>}, {transform_indices = @transform_5, window_bounds = array<i64: 1, 32, 128>}]} {
    %c0 = arith.constant 0 : index
    %c0_0 = arith.constant 0 : index
    %c0_1 = arith.constant 0 : index
    %0 = vector.load %arg3[%c0, %c0_0, %c0_1] : memref<1x256x4xbf16, #tpu.memory_space<vmem>>, vector<1x256x4xbf16>
    %1 = vector.shape_cast %0 : vector<1x256x4xbf16> to vector<256x4xbf16>
    %c0_2 = arith.constant 0 : index
    %c0_3 = arith.constant 0 : index
    %2 = vector.load %arg5[%c0_2, %c0_3] : memref<4x128xbf16, #tpu.memory_space<vmem>>, vector<4x128xbf16>
    %cst = arith.constant dense<0.000000e+00> : vector<256x128xf32>
    %3 = tpu.matmul %1, %2, %cst {dimension_numbers = #tpu.dot_dimension_numbers<[1], [0], [0], [1], [0, 0, 1, 1], [], []>} : vector<256x4xbf16>, vector<4x128xbf16>, vector<256x128xf32> -> vector<256x128xf32>
    %c0_4 = arith.constant 0 : index
    %c0_5 = arith.constant 0 : index
    %c0_6 = arith.constant 0 : index
    %4 = vector.load %arg2[%c0_4, %c0_5, %c0_6] : memref<1x256x3xbf16, #tpu.memory_space<vmem>>, vector<1x256x3xbf16>
    %5 = vector.shape_cast %4 : vector<1x256x3xbf16> to vector<256x3xbf16>
    %c0_7 = arith.constant 0 : index
    %c0_8 = arith.constant 0 : index
    %6 = vector.load %arg4[%c0_7, %c0_8] : memref<3x128xbf16, #tpu.memory_space<vmem>>, vector<3x128xbf16>
    %cst_9 = arith.constant dense<0.000000e+00> : vector<256x128xf32>
    %7 = tpu.matmul %5, %6, %cst_9 {dimension_numbers = #tpu.dot_dimension_numbers<[1], [0], [0], [1], [0, 0, 1, 1], [], []>} : vector<256x3xbf16>, vector<3x128xbf16>, vector<256x128xf32> -> vector<256x128xf32>
    %8 = arith.addf %3, %7 : vector<256x128xf32>
    %c0_10 = arith.constant 0 : index
    %c0_11 = arith.constant 0 : index
    %9 = vector.load %arg6[%c0_10, %c0_11] : memref<1x128xf32, #tpu.memory_space<vmem>>, vector<1x128xf32>
    %10 = vector.broadcast %9 : vector<1x128xf32> to vector<256x128xf32>
    %11 = arith.addf %8, %10 : vector<256x128xf32>
    %cst_12 = arith.constant 0.000000e+00 : f32
    %12 = vector.broadcast %cst_12 : f32 to vector<256x128xf32>
    %13 = arith.maximumf %11, %12 : vector<256x128xf32>
    %14 = vector.shape_cast %13 : vector<256x128xf32> to vector<32x8x128xf32>
    %cst_13 = arith.constant dense<0xFF800000> : vector<32x128xf32>
    %15 = vector.multi_reduction <maximumf>, %14, %cst_13 [1] : vector<32x8x128xf32> to vector<32x128xf32>
    %c0_14 = arith.constant 0 : index
    %c0_15 = arith.constant 0 : index
    %c0_16 = arith.constant 0 : index
    %16 = vector.load %arg7[%c0_14, %c0_15, %c0_16] : memref<1x32x128xf32, #tpu.memory_space<vmem>>, vector<1x32x128xf32>
    %17 = vector.shape_cast %16 : vector<1x32x128xf32> to vector<32x128xf32>
    %18 = vector.shape_cast %15 : vector<32x128xf32> to vector<1x32x128xf32>
    tpu.vector_store %arg7[%c0_14, %c0_15, %c0_16], %18 {strides = array<i32>} : memref<1x32x128xf32, #tpu.memory_space<vmem>>, vector<1x32x128xf32>,
    return
  }
  func.func @transform_0(%arg0: i32, %arg1: i32) -> (i32, i32, i32) {
    %c0_i32 = arith.constant 0 : i32
    %c0_i32_0 = arith.constant 0 : i32
    return %arg0, %arg1, %c0_i32 : i32, i32, i32
  }
  func.func @transform_1(%arg0: i32, %arg1: i32) -> (i32, i32, i32) {
    %c0_i32 = arith.constant 0 : i32
    %c0_i32_0 = arith.constant 0 : i32
    return %arg0, %arg1, %c0_i32 : i32, i32, i32
  }
  func.func @transform_2(%arg0: i32, %arg1: i32) -> (i32, i32) {
    %c0_i32 = arith.constant 0 : i32
    %c0_i32_0 = arith.constant 0 : i32
    %c0_i32_1 = arith.constant 0 : i32
    return %c0_i32, %c0_i32_0 : i32, i32
  }
  func.func @transform_3(%arg0: i32, %arg1: i32) -> (i32, i32) {
    %c0_i32 = arith.constant 0 : i32
    %c0_i32_0 = arith.constant 0 : i32
    %c0_i32_1 = arith.constant 0 : i32
    return %c0_i32, %c0_i32_0 : i32, i32
  }
  func.func @transform_4(%arg0: i32, %arg1: i32) -> (i32, i32) {
    %c0_i32 = arith.constant 0 : i32
    %c0_i32_0 = arith.constant 0 : i32
    %c0_i32_1 = arith.constant 0 : i32
    return %c0_i32, %c0_i32_0 : i32, i32
  }
  func.func @transform_5(%arg0: i32, %arg1: i32) -> (i32, i32, i32) {
    %c0_i32 = arith.constant 0 : i32
    %c0_i32_0 = arith.constant 0 : i32
    return %arg0, %arg1, %c0_i32 : i32, i32, i32
  }
}

module attributes {stable_mosaic.version = 11 : i64} {
  func.func @_invres_kernel(%arg0: i32, %arg1: i32, %arg2: memref<1x256x3xbf16, #tpu.memory_space<vmem>>, %arg3: memref<1x256x128xbf16, #tpu.memory_space<vmem>>, %arg4: memref<1x32x128xf32, #tpu.memory_space<vmem>>, %arg5: memref<3x128xbf16, #tpu.memory_space<vmem>>, %arg6: memref<128x128xbf16, #tpu.memory_space<vmem>>, %arg7: memref<1x128xf32, #tpu.memory_space<vmem>>, %arg8: memref<128x128xbf16, #tpu.memory_space<vmem>>, %arg9: memref<1x128xf32, #tpu.memory_space<vmem>>, %arg10: memref<128x128xbf16, #tpu.memory_space<vmem>>, %arg11: memref<1x128xf32, #tpu.memory_space<vmem>>, %arg12: memref<1x32x128xf32, #tpu.memory_space<vmem>>) attributes {dimension_semantics = [#tpu.dimension_semantics<parallel>, #tpu.dimension_semantics<parallel>], iteration_bounds = array<i64: 2, 1>, scalar_prefetch = 0 : i64, scratch_operands = 0 : i64, tpu.core_type = #tpu.core_type<tc>, window_params = [{transform_indices = @transform_0, window_bounds = array<i64: 1, 256, 3>}, {transform_indices = @transform_1, window_bounds = array<i64: 1, 256, 128>}, {transform_indices = @transform_2, window_bounds = array<i64: 1, 32, 128>}, {pipeline_mode = #tpu.pipeline_mode<synchronous>, transform_indices = @transform_3, window_bounds = array<i64: 3, 128>}, {pipeline_mode = #tpu.pipeline_mode<synchronous>, transform_indices = @transform_4, window_bounds = array<i64: 128, 128>}, {pipeline_mode = #tpu.pipeline_mode<synchronous>, transform_indices = @transform_5, window_bounds = array<i64: 1, 128>}, {pipeline_mode = #tpu.pipeline_mode<synchronous>, transform_indices = @transform_6, window_bounds = array<i64: 128, 128>}, {pipeline_mode = #tpu.pipeline_mode<synchronous>, transform_indices = @transform_7, window_bounds = array<i64: 1, 128>}, {pipeline_mode = #tpu.pipeline_mode<synchronous>, transform_indices = @transform_8, window_bounds = array<i64: 128, 128>}, {pipeline_mode = #tpu.pipeline_mode<synchronous>, transform_indices = @transform_9, window_bounds = array<i64: 1, 128>}, {transform_indices = @transform_10, window_bounds = array<i64: 1, 32, 128>}]} {
    %c0 = arith.constant 0 : index
    %c0_0 = arith.constant 0 : index
    %c0_1 = arith.constant 0 : index
    %0 = vector.load %arg3[%c0, %c0_0, %c0_1] : memref<1x256x128xbf16, #tpu.memory_space<vmem>>, vector<1x256x128xbf16>
    %1 = vector.shape_cast %0 : vector<1x256x128xbf16> to vector<256x128xbf16>
    %c0_2 = arith.constant 0 : index
    %c0_3 = arith.constant 0 : index
    %2 = vector.load %arg6[%c0_2, %c0_3] : memref<128x128xbf16, #tpu.memory_space<vmem>>, vector<128x128xbf16>
    %cst = arith.constant dense<0.000000e+00> : vector<256x128xf32>
    %3 = tpu.matmul %1, %2, %cst {dimension_numbers = #tpu.dot_dimension_numbers<[1], [0], [0], [1], [0, 0, 1, 1], [], []>} : vector<256x128xbf16>, vector<128x128xbf16>, vector<256x128xf32> -> vector<256x128xf32>
    %c0_4 = arith.constant 0 : index
    %c0_5 = arith.constant 0 : index
    %c0_6 = arith.constant 0 : index
    %4 = vector.load %arg2[%c0_4, %c0_5, %c0_6] : memref<1x256x3xbf16, #tpu.memory_space<vmem>>, vector<1x256x3xbf16>
    %5 = vector.shape_cast %4 : vector<1x256x3xbf16> to vector<256x3xbf16>
    %c0_7 = arith.constant 0 : index
    %c0_8 = arith.constant 0 : index
    %6 = vector.load %arg5[%c0_7, %c0_8] : memref<3x128xbf16, #tpu.memory_space<vmem>>, vector<3x128xbf16>
    %cst_9 = arith.constant dense<0.000000e+00> : vector<256x128xf32>
    %7 = tpu.matmul %5, %6, %cst_9 {dimension_numbers = #tpu.dot_dimension_numbers<[1], [0], [0], [1], [0, 0, 1, 1], [], []>} : vector<256x3xbf16>, vector<3x128xbf16>, vector<256x128xf32> -> vector<256x128xf32>
    %8 = arith.addf %3, %7 : vector<256x128xf32>
    %c0_10 = arith.constant 0 : index
    %c0_11 = arith.constant 0 : index
    %9 = vector.load %arg7[%c0_10, %c0_11] : memref<1x128xf32, #tpu.memory_space<vmem>>, vector<1x128xf32>
    %10 = vector.broadcast %9 : vector<1x128xf32> to vector<256x128xf32>
    %11 = arith.addf %8, %10 : vector<256x128xf32>
    %cst_12 = arith.constant 0.000000e+00 : f32
    %12 = vector.broadcast %cst_12 : f32 to vector<256x128xf32>
    %13 = arith.maximumf %11, %12 : vector<256x128xf32>
    %14 = vector.shape_cast %13 : vector<256x128xf32> to vector<32x8x128xf32>
    %cst_13 = arith.constant dense<0xFF800000> : vector<32x128xf32>
    %15 = vector.multi_reduction <maximumf>, %14, %cst_13 [1] : vector<32x8x128xf32> to vector<32x128xf32>
    %16 = arith.truncf %15 : vector<32x128xf32> to vector<32x128xbf16>
    %c0_14 = arith.constant 0 : index
    %c0_15 = arith.constant 0 : index
    %17 = vector.load %arg8[%c0_14, %c0_15] : memref<128x128xbf16, #tpu.memory_space<vmem>>, vector<128x128xbf16>
    %cst_16 = arith.constant dense<0.000000e+00> : vector<32x128xf32>
    %18 = tpu.matmul %16, %17, %cst_16 {dimension_numbers = #tpu.dot_dimension_numbers<[1], [0], [0], [1], [0, 0, 1, 1], [], []>} : vector<32x128xbf16>, vector<128x128xbf16>, vector<32x128xf32> -> vector<32x128xf32>
    %c0_17 = arith.constant 0 : index
    %c0_18 = arith.constant 0 : index
    %19 = vector.load %arg9[%c0_17, %c0_18] : memref<1x128xf32, #tpu.memory_space<vmem>>, vector<1x128xf32>
    %20 = vector.broadcast %19 : vector<1x128xf32> to vector<32x128xf32>
    %21 = arith.addf %18, %20 : vector<32x128xf32>
    %cst_19 = arith.constant 0.000000e+00 : f32
    %22 = vector.broadcast %cst_19 : f32 to vector<32x128xf32>
    %23 = arith.maximumf %21, %22 : vector<32x128xf32>
    %24 = arith.truncf %23 : vector<32x128xf32> to vector<32x128xbf16>
    %c0_20 = arith.constant 0 : index
    %c0_21 = arith.constant 0 : index
    %25 = vector.load %arg10[%c0_20, %c0_21] : memref<128x128xbf16, #tpu.memory_space<vmem>>, vector<128x128xbf16>
    %cst_22 = arith.constant dense<0.000000e+00> : vector<32x128xf32>
    %26 = tpu.matmul %24, %25, %cst_22 {dimension_numbers = #tpu.dot_dimension_numbers<[1], [0], [0], [1], [0, 0, 1, 1], [], []>} : vector<32x128xbf16>, vector<128x128xbf16>, vector<32x128xf32> -> vector<32x128xf32>
    %c0_23 = arith.constant 0 : index
    %c0_24 = arith.constant 0 : index
    %27 = vector.load %arg11[%c0_23, %c0_24] : memref<1x128xf32, #tpu.memory_space<vmem>>, vector<1x128xf32>
    %28 = vector.broadcast %27 : vector<1x128xf32> to vector<32x128xf32>
    %29 = arith.addf %26, %28 : vector<32x128xf32>
    %c0_25 = arith.constant 0 : index
    %c0_26 = arith.constant 0 : index
    %c0_27 = arith.constant 0 : index
    %30 = vector.load %arg4[%c0_25, %c0_26, %c0_27] : memref<1x32x128xf32, #tpu.memory_space<vmem>>, vector<1x32x128xf32>
    %31 = vector.shape_cast %30 : vector<1x32x128xf32> to vector<32x128xf32>
    %32 = arith.addf %31, %29 : vector<32x128xf32>
    %cst_28 = arith.constant 0.000000e+00 : f32
    %33 = vector.broadcast %cst_28 : f32 to vector<32x128xf32>
    %34 = arith.maximumf %32, %33 : vector<32x128xf32>
    %c0_29 = arith.constant 0 : index
    %c0_30 = arith.constant 0 : index
    %c0_31 = arith.constant 0 : index
    %35 = vector.load %arg12[%c0_29, %c0_30, %c0_31] : memref<1x32x128xf32, #tpu.memory_space<vmem>>, vector<1x32x128xf32>
    %36 = vector.shape_cast %35 : vector<1x32x128xf32> to vector<32x128xf32>
    %37 = vector.shape_cast %34 : vector<32x128xf32> to vector<1x32x128xf32>
    tpu.vector_store %arg12[%c0_29, %c0_30, %c0_31], %37 {strides = array<i32>} : memref<1x32x128xf32, #tpu.memory_space<vmem>>, vector<1x32x128xf32>,
    return
  }
  func.func @transform_0(%arg0: i32, %arg1: i32) -> (i32, i32, i32) {
    %c0_i32 = arith.constant 0 : i32
    %c0_i32_0 = arith.constant 0 : i32
    return %arg0, %arg1, %c0_i32 : i32, i32, i32
  }
  func.func @transform_1(%arg0: i32, %arg1: i32) -> (i32, i32, i32) {
    %c0_i32 = arith.constant 0 : i32
    %c0_i32_0 = arith.constant 0 : i32
    return %arg0, %arg1, %c0_i32 : i32, i32, i32
  }
  func.func @transform_2(%arg0: i32, %arg1: i32) -> (i32, i32, i32) {
    %c0_i32 = arith.constant 0 : i32
    %c0_i32_0 = arith.constant 0 : i32
    return %arg0, %arg1, %c0_i32 : i32, i32, i32
  }
  func.func @transform_3(%arg0: i32, %arg1: i32) -> (i32, i32) {
    %c0_i32 = arith.constant 0 : i32
    %c0_i32_0 = arith.constant 0 : i32
    %c0_i32_1 = arith.constant 0 : i32
    return %c0_i32, %c0_i32_0 : i32, i32
  }
  func.func @transform_4(%arg0: i32, %arg1: i32) -> (i32, i32) {
    %c0_i32 = arith.constant 0 : i32
    %c0_i32_0 = arith.constant 0 : i32
    %c0_i32_1 = arith.constant 0 : i32
    return %c0_i32, %c0_i32_0 : i32, i32
  }
  func.func @transform_5(%arg0: i32, %arg1: i32) -> (i32, i32) {
    %c0_i32 = arith.constant 0 : i32
    %c0_i32_0 = arith.constant 0 : i32
    %c0_i32_1 = arith.constant 0 : i32
    return %c0_i32, %c0_i32_0 : i32, i32
  }
  func.func @transform_6(%arg0: i32, %arg1: i32) -> (i32, i32) {
    %c0_i32 = arith.constant 0 : i32
    %c0_i32_0 = arith.constant 0 : i32
    %c0_i32_1 = arith.constant 0 : i32
    return %c0_i32, %c0_i32_0 : i32, i32
  }
  func.func @transform_7(%arg0: i32, %arg1: i32) -> (i32, i32) {
    %c0_i32 = arith.constant 0 : i32
    %c0_i32_0 = arith.constant 0 : i32
    %c0_i32_1 = arith.constant 0 : i32
    return %c0_i32, %c0_i32_0 : i32, i32
  }
  func.func @transform_8(%arg0: i32, %arg1: i32) -> (i32, i32) {
    %c0_i32 = arith.constant 0 : i32
    %c0_i32_0 = arith.constant 0 : i32
    %c0_i32_1 = arith.constant 0 : i32
    return %c0_i32, %c0_i32_0 : i32, i32
  }
  func.func @transform_9(%arg0: i32, %arg1: i32) -> (i32, i32) {
    %c0_i32 = arith.constant 0 : i32
    %c0_i32_0 = arith.constant 0 : i32
    %c0_i32_1 = arith.constant 0 : i32
    return %c0_i32, %c0_i32_0 : i32, i32
  }
  func.func @transform_10(%arg0: i32, %arg1: i32) -> (i32, i32, i32) {
    %c0_i32 = arith.constant 0 : i32
    %c0_i32_0 = arith.constant 0 : i32
    return %arg0, %arg1, %c0_i32 : i32, i32, i32
  }
}

module attributes {stable_mosaic.version = 11 : i64} {
  func.func @_invres_kernel(%arg0: i32, %arg1: i32, %arg2: memref<1x256x3xbf16, #tpu.memory_space<vmem>>, %arg3: memref<1x256x128xbf16, #tpu.memory_space<vmem>>, %arg4: memref<1x32x128xf32, #tpu.memory_space<vmem>>, %arg5: memref<3x128xbf16, #tpu.memory_space<vmem>>, %arg6: memref<128x128xbf16, #tpu.memory_space<vmem>>, %arg7: memref<1x128xf32, #tpu.memory_space<vmem>>, %arg8: memref<128x128xbf16, #tpu.memory_space<vmem>>, %arg9: memref<1x128xf32, #tpu.memory_space<vmem>>, %arg10: memref<128x128xbf16, #tpu.memory_space<vmem>>, %arg11: memref<1x128xf32, #tpu.memory_space<vmem>>, %arg12: memref<1x32x128xf32, #tpu.memory_space<vmem>>) attributes {dimension_semantics = [#tpu.dimension_semantics<parallel>, #tpu.dimension_semantics<parallel>], iteration_bounds = array<i64: 2, 1>, scalar_prefetch = 0 : i64, scratch_operands = 0 : i64, tpu.core_type = #tpu.core_type<tc>, window_params = [{transform_indices = @transform_0, window_bounds = array<i64: 1, 256, 3>}, {transform_indices = @transform_1, window_bounds = array<i64: 1, 256, 128>}, {transform_indices = @transform_2, window_bounds = array<i64: 1, 32, 128>}, {pipeline_mode = #tpu.pipeline_mode<synchronous>, transform_indices = @transform_3, window_bounds = array<i64: 3, 128>}, {pipeline_mode = #tpu.pipeline_mode<synchronous>, transform_indices = @transform_4, window_bounds = array<i64: 128, 128>}, {pipeline_mode = #tpu.pipeline_mode<synchronous>, transform_indices = @transform_5, window_bounds = array<i64: 1, 128>}, {pipeline_mode = #tpu.pipeline_mode<synchronous>, transform_indices = @transform_6, window_bounds = array<i64: 128, 128>}, {pipeline_mode = #tpu.pipeline_mode<synchronous>, transform_indices = @transform_7, window_bounds = array<i64: 1, 128>}, {pipeline_mode = #tpu.pipeline_mode<synchronous>, transform_indices = @transform_8, window_bounds = array<i64: 128, 128>}, {pipeline_mode = #tpu.pipeline_mode<synchronous>, transform_indices = @transform_9, window_bounds = array<i64: 1, 128>}, {transform_indices = @transform_10, window_bounds = array<i64: 1, 32, 128>}]} {
    %c0 = arith.constant 0 : index
    %c0_0 = arith.constant 0 : index
    %c0_1 = arith.constant 0 : index
    %0 = vector.load %arg3[%c0, %c0_0, %c0_1] : memref<1x256x128xbf16, #tpu.memory_space<vmem>>, vector<1x256x128xbf16>
    %1 = vector.shape_cast %0 : vector<1x256x128xbf16> to vector<256x128xbf16>
    %c0_2 = arith.constant 0 : index
    %c0_3 = arith.constant 0 : index
    %2 = vector.load %arg6[%c0_2, %c0_3] : memref<128x128xbf16, #tpu.memory_space<vmem>>, vector<128x128xbf16>
    %cst = arith.constant dense<0.000000e+00> : vector<256x128xf32>
    %3 = tpu.matmul %1, %2, %cst {dimension_numbers = #tpu.dot_dimension_numbers<[1], [0], [0], [1], [0, 0, 1, 1], [], []>} : vector<256x128xbf16>, vector<128x128xbf16>, vector<256x128xf32> -> vector<256x128xf32>
    %c0_4 = arith.constant 0 : index
    %c0_5 = arith.constant 0 : index
    %c0_6 = arith.constant 0 : index
    %4 = vector.load %arg2[%c0_4, %c0_5, %c0_6] : memref<1x256x3xbf16, #tpu.memory_space<vmem>>, vector<1x256x3xbf16>
    %5 = vector.shape_cast %4 : vector<1x256x3xbf16> to vector<256x3xbf16>
    %c0_7 = arith.constant 0 : index
    %c0_8 = arith.constant 0 : index
    %6 = vector.load %arg5[%c0_7, %c0_8] : memref<3x128xbf16, #tpu.memory_space<vmem>>, vector<3x128xbf16>
    %cst_9 = arith.constant dense<0.000000e+00> : vector<256x128xf32>
    %7 = tpu.matmul %5, %6, %cst_9 {dimension_numbers = #tpu.dot_dimension_numbers<[1], [0], [0], [1], [0, 0, 1, 1], [], []>} : vector<256x3xbf16>, vector<3x128xbf16>, vector<256x128xf32> -> vector<256x128xf32>
    %8 = arith.addf %3, %7 : vector<256x128xf32>
    %c0_10 = arith.constant 0 : index
    %c0_11 = arith.constant 0 : index
    %9 = vector.load %arg7[%c0_10, %c0_11] : memref<1x128xf32, #tpu.memory_space<vmem>>, vector<1x128xf32>
    %10 = vector.broadcast %9 : vector<1x128xf32> to vector<256x128xf32>
    %11 = arith.addf %8, %10 : vector<256x128xf32>
    %cst_12 = arith.constant 0.000000e+00 : f32
    %12 = vector.broadcast %cst_12 : f32 to vector<256x128xf32>
    %13 = arith.maximumf %11, %12 : vector<256x128xf32>
    %14 = vector.shape_cast %13 : vector<256x128xf32> to vector<32x8x128xf32>
    %cst_13 = arith.constant dense<0xFF800000> : vector<32x128xf32>
    %15 = vector.multi_reduction <maximumf>, %14, %cst_13 [1] : vector<32x8x128xf32> to vector<32x128xf32>
    %16 = arith.truncf %15 : vector<32x128xf32> to vector<32x128xbf16>
    %c0_14 = arith.constant 0 : index
    %c0_15 = arith.constant 0 : index
    %17 = vector.load %arg8[%c0_14, %c0_15] : memref<128x128xbf16, #tpu.memory_space<vmem>>, vector<128x128xbf16>
    %cst_16 = arith.constant dense<0.000000e+00> : vector<32x128xf32>
    %18 = tpu.matmul %16, %17, %cst_16 {dimension_numbers = #tpu.dot_dimension_numbers<[1], [0], [0], [1], [0, 0, 1, 1], [], []>} : vector<32x128xbf16>, vector<128x128xbf16>, vector<32x128xf32> -> vector<32x128xf32>
    %c0_17 = arith.constant 0 : index
    %c0_18 = arith.constant 0 : index
    %19 = vector.load %arg9[%c0_17, %c0_18] : memref<1x128xf32, #tpu.memory_space<vmem>>, vector<1x128xf32>
    %20 = vector.broadcast %19 : vector<1x128xf32> to vector<32x128xf32>
    %21 = arith.addf %18, %20 : vector<32x128xf32>
    %cst_19 = arith.constant 0.000000e+00 : f32
    %22 = vector.broadcast %cst_19 : f32 to vector<32x128xf32>
    %23 = arith.maximumf %21, %22 : vector<32x128xf32>
    %24 = arith.truncf %23 : vector<32x128xf32> to vector<32x128xbf16>
    %c0_20 = arith.constant 0 : index
    %c0_21 = arith.constant 0 : index
    %25 = vector.load %arg10[%c0_20, %c0_21] : memref<128x128xbf16, #tpu.memory_space<vmem>>, vector<128x128xbf16>
    %cst_22 = arith.constant dense<0.000000e+00> : vector<32x128xf32>
    %26 = tpu.matmul %24, %25, %cst_22 {dimension_numbers = #tpu.dot_dimension_numbers<[1], [0], [0], [1], [0, 0, 1, 1], [], []>} : vector<32x128xbf16>, vector<128x128xbf16>, vector<32x128xf32> -> vector<32x128xf32>
    %c0_23 = arith.constant 0 : index
    %c0_24 = arith.constant 0 : index
    %27 = vector.load %arg11[%c0_23, %c0_24] : memref<1x128xf32, #tpu.memory_space<vmem>>, vector<1x128xf32>
    %28 = vector.broadcast %27 : vector<1x128xf32> to vector<32x128xf32>
    %29 = arith.addf %26, %28 : vector<32x128xf32>
    %c0_25 = arith.constant 0 : index
    %c0_26 = arith.constant 0 : index
    %c0_27 = arith.constant 0 : index
    %30 = vector.load %arg4[%c0_25, %c0_26, %c0_27] : memref<1x32x128xf32, #tpu.memory_space<vmem>>, vector<1x32x128xf32>
    %31 = vector.shape_cast %30 : vector<1x32x128xf32> to vector<32x128xf32>
    %32 = arith.addf %31, %29 : vector<32x128xf32>
    %cst_28 = arith.constant 0.000000e+00 : f32
    %33 = vector.broadcast %cst_28 : f32 to vector<32x128xf32>
    %34 = arith.maximumf %32, %33 : vector<32x128xf32>
    %c0_29 = arith.constant 0 : index
    %c0_30 = arith.constant 0 : index
    %c0_31 = arith.constant 0 : index
    %35 = vector.load %arg12[%c0_29, %c0_30, %c0_31] : memref<1x32x128xf32, #tpu.memory_space<vmem>>, vector<1x32x128xf32>
    %36 = vector.shape_cast %35 : vector<1x32x128xf32> to vector<32x128xf32>
    %37 = vector.shape_cast %34 : vector<32x128xf32> to vector<1x32x128xf32>
    tpu.vector_store %arg12[%c0_29, %c0_30, %c0_31], %37 {strides = array<i32>} : memref<1x32x128xf32, #tpu.memory_space<vmem>>, vector<1x32x128xf32>,
    return
  }
  func.func @transform_0(%arg0: i32, %arg1: i32) -> (i32, i32, i32) {
    %c0_i32 = arith.constant 0 : i32
    %c0_i32_0 = arith.constant 0 : i32
    return %arg0, %arg1, %c0_i32 : i32, i32, i32
  }
  func.func @transform_1(%arg0: i32, %arg1: i32) -> (i32, i32, i32) {
    %c0_i32 = arith.constant 0 : i32
    %c0_i32_0 = arith.constant 0 : i32
    return %arg0, %arg1, %c0_i32 : i32, i32, i32
  }
  func.func @transform_2(%arg0: i32, %arg1: i32) -> (i32, i32, i32) {
    %c0_i32 = arith.constant 0 : i32
    %c0_i32_0 = arith.constant 0 : i32
    return %arg0, %arg1, %c0_i32 : i32, i32, i32
  }
  func.func @transform_3(%arg0: i32, %arg1: i32) -> (i32, i32) {
    %c0_i32 = arith.constant 0 : i32
    %c0_i32_0 = arith.constant 0 : i32
    %c0_i32_1 = arith.constant 0 : i32
    return %c0_i32, %c0_i32_0 : i32, i32
  }
  func.func @transform_4(%arg0: i32, %arg1: i32) -> (i32, i32) {
    %c0_i32 = arith.constant 0 : i32
    %c0_i32_0 = arith.constant 0 : i32
    %c0_i32_1 = arith.constant 0 : i32
    return %c0_i32, %c0_i32_0 : i32, i32
  }
  func.func @transform_5(%arg0: i32, %arg1: i32) -> (i32, i32) {
    %c0_i32 = arith.constant 0 : i32
    %c0_i32_0 = arith.constant 0 : i32
    %c0_i32_1 = arith.constant 0 : i32
    return %c0_i32, %c0_i32_0 : i32, i32
  }
  func.func @transform_6(%arg0: i32, %arg1: i32) -> (i32, i32) {
    %c0_i32 = arith.constant 0 : i32
    %c0_i32_0 = arith.constant 0 : i32
    %c0_i32_1 = arith.constant 0 : i32
    return %c0_i32, %c0_i32_0 : i32, i32
  }
  func.func @transform_7(%arg0: i32, %arg1: i32) -> (i32, i32) {
    %c0_i32 = arith.constant 0 : i32
    %c0_i32_0 = arith.constant 0 : i32
    %c0_i32_1 = arith.constant 0 : i32
    return %c0_i32, %c0_i32_0 : i32, i32
  }
  func.func @transform_8(%arg0: i32, %arg1: i32) -> (i32, i32) {
    %c0_i32 = arith.constant 0 : i32
    %c0_i32_0 = arith.constant 0 : i32
    %c0_i32_1 = arith.constant 0 : i32
    return %c0_i32, %c0_i32_0 : i32, i32
  }
  func.func @transform_9(%arg0: i32, %arg1: i32) -> (i32, i32) {
    %c0_i32 = arith.constant 0 : i32
    %c0_i32_0 = arith.constant 0 : i32
    %c0_i32_1 = arith.constant 0 : i32
    return %c0_i32, %c0_i32_0 : i32, i32
  }
  func.func @transform_10(%arg0: i32, %arg1: i32) -> (i32, i32, i32) {
    %c0_i32 = arith.constant 0 : i32
    %c0_i32_0 = arith.constant 0 : i32
    return %arg0, %arg1, %c0_i32 : i32, i32, i32
  }
}

</mosaic_0001>

<bundles_post_ra>
// kernel: custom-call.16
= control target key start
LH: loop header
LB: loop body
LE: loop exit
PB: predicated region body
PF: predicated region fallthrough
CT: control target
= control target key end

     0   :  { %s6_s0 = inlined_call_operand.vmem [shape: f32[2,64], index: 0, kind: output, shape index: {}]  }

// kernel: forward.3
= control target key start
LH: loop header
LB: loop body
LE: loop exit
PB: predicated region body
PF: predicated region fallthrough
CT: control target
= control target key end

     0   :  { %s1728_s18 = smov 0   ;;  %s1730_s19 = smov 0   ;;  %s1923_s0 = inlined_call_operand.vmem [shape: bf16[2,256,3], index: 0, kind: input, shape index: {}]   ;;  %s1924_s1 = inlined_call_operand.vmem [shape: bf16[2,256,4], index: 1, kind: input, shape index: {}]   ;;  %s1925_s2 = inlined_call_operand.vmem [shape: bf16[3,128], index: 2, kind: input, shape index: {}]   ;;  %s1926_s3 = inlined_call_operand.vmem [shape: bf16[4,128], index: 3, kind: input, shape index: {}]   ;;  %s1927_s4 = inlined_call_operand.vmem [shape: f32[1,128], index: 4, kind: input, shape index: {}]   ;;  %s1928_s5 = inlined_call_operand.vmem [shape: f32[2,32,128], index: 5, kind: output, shape index: {}]  }
   0x1   :  { %s1732_s20 = smov 0  }
   0x2 LB: > { %s27_s21 = sadd.s32 1, %s1691_s19  ;;  %p1404_p0 = scmp.ge.s32.totalorder %s1695_s20, 1  ;;  %s1695_s20 = sphi %s1732_s20, %s15_s20   ;;  %s1691_s19 = sphi %s1730_s19, %s1930_s19   ;;  %s1687_s18 = sphi %s1728_s18, %s1929_s18  }
   0x3   : > { %p29_p1 = scmp.ge.s32.totalorder %s27_s21, 2  ;;  %p225_p2 = scmp.lt.s32.totalorder %s1695_s20, 3 }
   0x5   : > { %s1932_s21 = smov (%p29_p1, %s27_s21), 0  ;;  %p226_p3 = pnand %p1404_p0, %p225_p2 }
   0x6   : > { %v366_v0 = vld [vmem:[%s1925_s2] sm:$0x3] (!%p226_p3)  ;;  %vm496_vm0 = vcmask (!%p226_p3), 1040384   ;;  %vm497_vm1 = vcmask (!%p226_p3), 1041408   ;;  %p271_p4 = scmp.lt.s32.totalorder (!%p226_p3), %s1687_s18, 1  ;;  %v1697_v1 = vmov (!%p226_p3), 65535  }
   0x7   : > { %229 = sbr.rel (%p226_p3) target bundleno = 324 (0x144), region = 40  ;;  %v498_v2 = vsel (!%p226_p3), %vm496_vm0, 4294967295, %v1697_v1  ;;  %v333_v3 = vld [vmem:[%s1926_s3] sm:$0x3] (!%p226_p3)  ;;  %vm447_vm2 = vcmask (!%p226_p3), 23552   ;;  %vm744_vm3 = vcmask (!%p226_p3), 31744  }
   0x8   : > { %v499_v4 = vsel (!%p226_p3), %vm497_vm1, %v498_v2, 0  ;;  %1615 = vmatprep.subr.msk.bf16.mxu0 (!%p226_p3), %vm497_vm1, %v333_v3  ;;  %v794_v5 = vsel (!%p226_p3), %vm497_vm1, %v333_v3, 0  ;;  %v1832_v41 = vld [vmem:[%s1927_s4] ss:$0 sm:$0xff] (!%p226_p3)  ;;  %vm1252_vm4 = vcmask (!%p226_p3), 1041409   ;;  %vm1254_vm5 = vcmask (!%p226_p3), 1042434  }
   0x9   : > { %v501_v6 = vand.u32 (!%p226_p3), %v499_v4, %v366_v0  ;;  %1550 = vmatpush3.bf16.msra.mxu0 (!%p226_p3), %v794_v5  ;;  %vm1256_vm6 = vcmask (!%p226_p3), 1043459   ;;  %vm1258_vm7 = vcmask (!%p226_p3), 1044484   ;;  %vm1260_vm8 = vcmask (!%p226_p3), 1045509  }
   0xa   : > { %vm1262_vm9 = vcmask (!%p226_p3), 1046534   ;;  %vm1264_vm10 = vcmask (!%p226_p3), 1047559  }
   0xb   : > { %1515 = vmatprep.subr.bf16.mxu1 (!%p226_p3), %v501_v6 }
   0xc   : > { %1516 = vmatpush3.bf16.msra.mxu1 (!%p226_p3), %v501_v6 }
   0xe   : > { %s1934_s18 = smov (!%p271_p4, %s1687_s18), 1 }
   0xf   : > { %s1478_s26 = sshll.u32 %s1934_s18, 7  ;;  %s1480_s10 = sshll.u32 %s1934_s18, 5 }
  0x10   : > { %s1758_s29 = scalar_lea.vmem %s1923_s0, %s1478_s26  ;;  %s1763_s7 = scalar_lea.vmem %s1924_s1, %s1478_s26 }
  0x11   : > { %v1641_v7 = vld [vmem:[%s1758_s29] sm:$0xff]   ;;  %v1643_v9 = vld [vmem:[%s1758_s29 + $0x8] sm:$0xff]   ;;  %v1645_v11 = vld [vmem:[%s1758_s29 + $0x10] sm:$0xff]   ;;  %s1855_s13 = scalar_lea.vmem %s1928_s5, %s1480_s10 }
  0x12   : > { %v1642_v8 = vld [vmem:[%s1763_s7] sm:$0xff]   ;;  %1517 = vmatprep.mubr.msk.bf16.mxu1 %vm447_vm2, %v1641_v7  ;;  %v1644_v10 = vld [vmem:[%s1763_s7 + $0x8] sm:$0xff]   ;;  %v1646_v12 = vld [vmem:[%s1763_s7 + $0x10] sm:$0xff]  }
  0x13   : > { %1551 = vmatprep.mubr.msk.bf16.mxu0 %vm744_vm3, %v1642_v8  ;;  %1518 = vmatmul.mubr.msk.bf16.vlgmr.msra.gmra.mrb[0].mxu1 %vm447_vm2, %v1643_v9  ;;  %v1647_v13 = vld [vmem:[%s1758_s29 + $0x18] sm:$0xff]   ;;  %v1649_v15 = vld [vmem:[%s1758_s29 + $0x20] sm:$0xff]   ;;  %v1651_v17 = vld [vmem:[%s1758_s29 + $0x28] sm:$0xff]  }
  0x14   : > { %1552 = vmatmul.mubr.msk.bf16.vlgmr.msra.gmra.mrb[0].mxu0 %vm744_vm3, %v1644_v10  ;;  %1521 = vmatprep.mubr.msk.bf16.mxu1 %vm447_vm2, %v1645_v11  ;;  %v1648_v14 = vld [vmem:[%s1763_s7 + $0x18] sm:$0xff]   ;;  %v1650_v16 = vld [vmem:[%s1763_s7 + $0x20] sm:$0xff]   ;;  %v1652_v18 = vld [vmem:[%s1763_s7 + $0x28] sm:$0xff]  }
  0x15   : > { %1555 = vmatprep.mubr.msk.bf16.mxu0 %vm744_vm3, %v1646_v12  ;;  %v1653_v19 = vld [vmem:[%s1758_s29 + $0x30] sm:$0xff]   ;;  %v1655_v21 = vld [vmem:[%s1758_s29 + $0x38] sm:$0xff]   ;;  %v1657_v23 = vld [vmem:[%s1758_s29 + $0x40] sm:$0xff]  }
  0x16   : > { %v1654_v20 = vld [vmem:[%s1763_s7 + $0x30] sm:$0xff]   ;;  %v1656_v22 = vld [vmem:[%s1763_s7 + $0x38] sm:$0xff]   ;;  %v1658_v24 = vld [vmem:[%s1763_s7 + $0x40] sm:$0xff]  }
  0x17   : > { %v1659_v25 = vld [vmem:[%s1758_s29 + $0x48] sm:$0xff]   ;;  %v1661_v27 = vld [vmem:[%s1758_s29 + $0x50] sm:$0xff]   ;;  %v1663_v29 = vld [vmem:[%s1758_s29 + $0x58] sm:$0xff]  }
  0x18   : > { %v1660_v26 = vld [vmem:[%s1763_s7 + $0x48] sm:$0xff]   ;;  %v1662_v28 = vld [vmem:[%s1763_s7 + $0x50] sm:$0xff]   ;;  %v1664_v30 = vld [vmem:[%s1763_s7 + $0x58] sm:$0xff]  }
  0x19   : > { %v1665_v31 = vld [vmem:[%s1758_s29 + $0x60] sm:$0xff]   ;;  %v1667_v33 = vld [vmem:[%s1758_s29 + $0x68] sm:$0xff]   ;;  %v1669_v35 = vld [vmem:[%s1758_s29 + $0x70] sm:$0xff]  }
  0x1a   : > { %v1666_v32 = vld [vmem:[%s1763_s7 + $0x60] sm:$0xff]   ;;  %v1668_v34 = vld [vmem:[%s1763_s7 + $0x68] sm:$0xff]   ;;  %v1670_v36 = vld [vmem:[%s1763_s7 + $0x70] sm:$0xff]  }
  0x1b   : > { %1522 = vmatmul.mubr.msk.bf16.gmra.mrb[4].mxu1 %vm447_vm2, %v1647_v13  ;;  %v1671_v37 = vld [vmem:[%s1758_s29 + $0x78] sm:$0xff]  }
  0x1c   : > { %1556 = vmatmul.mubr.msk.bf16.gmra.mrb[4].mxu0 %vm744_vm3, %v1648_v14  ;;  %1525 = vmatprep.mubr.msk.bf16.mxu1 %vm447_vm2, %v1649_v15  ;;  %v1672_v38 = vld [vmem:[%s1763_s7 + $0x78] sm:$0xff]  }
  0x1d   : > { %1559 = vmatprep.mubr.msk.bf16.mxu0 %vm744_vm3, %v1650_v16 }
  0x23   : > { %1526 = vmatmul.mubr.msk.bf16.gmra.mrb[8].mxu1 %vm447_vm2, %v1651_v17 }
  0x24   : > { %1560 = vmatmul.mubr.msk.bf16.gmra.mrb[8].mxu0 %vm744_vm3, %v1652_v18  ;;  %1529 = vmatprep.mubr.msk.bf16.mxu1 %vm447_vm2, %v1653_v19 }
  0x25   : > { %1563 = vmatprep.mubr.msk.bf16.mxu0 %vm744_vm3, %v1654_v20 }
  0x2b   : > { %1530 = vmatmul.mubr.msk.bf16.gmra.mrb[12].mxu1 %vm447_vm2, %v1655_v21 }
  0x2c   : > { %1564 = vmatmul.mubr.msk.bf16.gmra.mrb[12].mxu0 %vm744_vm3, %v1656_v22  ;;  %1533 = vmatprep.mubr.msk.bf16.mxu1 %vm447_vm2, %v1657_v23 }
  0x2d   : > { %1567 = vmatprep.mubr.msk.bf16.mxu0 %vm744_vm3, %v1658_v24 }
  0x33   : > { %1534 = vmatmul.mubr.msk.bf16.gmra.mrb[16].mxu1 %vm447_vm2, %v1659_v25 }
  0x34   : > { %1568 = vmatmul.mubr.msk.bf16.gmra.mrb[16].mxu0 %vm744_vm3, %v1660_v26  ;;  %1537 = vmatprep.mubr.msk.bf16.mxu1 %vm447_vm2, %v1661_v27 }
  0x35   : > { %1571 = vmatprep.mubr.msk.bf16.mxu0 %vm744_vm3, %v1662_v28 }
  0x3b   : > { %1538 = vmatmul.mubr.msk.bf16.gmra.mrb[20].mxu1 %vm447_vm2, %v1663_v29 }
  0x3c   : > { %1572 = vmatmul.mubr.msk.bf16.gmra.mrb[20].mxu0 %vm744_vm3, %v1664_v30  ;;  %1541 = vmatprep.mubr.msk.bf16.mxu1 %vm447_vm2, %v1665_v31 }
  0x3d   : > { %1575 = vmatprep.mubr.msk.bf16.mxu0 %vm744_vm3, %v1666_v32 }
  0x43   : > { %1542 = vmatmul.mubr.msk.bf16.gmra.mrb[24].mxu1 %vm447_vm2, %v1667_v33 }
  0x44   : > { %1576 = vmatmul.mubr.msk.bf16.gmra.mrb[24].mxu0 %vm744_vm3, %v1668_v34  ;;  %1545 = vmatprep.mubr.msk.bf16.mxu1 %vm447_vm2, %v1669_v35 }
  0x45   : > { %1579 = vmatprep.mubr.msk.bf16.mxu0 %vm744_vm3, %v1670_v36 }
  0x4b   : > { %1546 = vmatmul.mubr.msk.bf16.gmra.mrb[28].mxu1 %vm447_vm2, %v1671_v37 }
  0x4c   : > { %1580 = vmatmul.mubr.msk.bf16.gmra.mrb[28].mxu0 %vm744_vm3, %v1672_v38 }
  0xe6   : > { %v1519_v39 = vpop.f32.mrb[0].mxu1 }
  0xe7   : > { %v1553_v40 = vpop.f32.mrb[0].mxu0  ;;  %v537_v42 = vpop.f32.mrb[1].mxu1 }
  0xe8   : > { %v839_v43 = vadd.f32 %v1553_v40, %v1519_v39  ;;  %v830_v44 = vpop.f32.mrb[1].mxu0  ;;  %v1520_v45 = vpop.f32.mrb[2].mxu1 }
  0xe9   : > { %v831_v46 = vadd.f32 %v830_v44, %v537_v42  ;;  %v1554_v47 = vpop.f32.mrb[2].mxu0  ;;  %v540_v48 = vpop.f32.mrb[3].mxu1 }
  0xea   : > { %v966_v49 = vadd.f32 %v1832_v41, %v839_v43  ;;  %v842_v50 = vadd.f32 %v1554_v47, %v1520_v45  ;;  %v833_v51 = vpop.f32.mrb[3].mxu0 }
  0xeb   : > { %v964_v52 = vadd.f32 %v1832_v41, %v831_v46  ;;  %v834_v53 = vadd.f32 %v833_v51, %v540_v48 }
  0xec   : > { %v998_v54 = vmax.f32 %v966_v49, 0.0  ;;  %v967_v55 = vadd.f32 %v1832_v41, %v842_v50 }
  0xed   : > { %v996_v56 = vmax.f32 %v964_v52, 0.0  ;;  %v965_v57 = vadd.f32 %v1832_v41, %v834_v53 }
  0xee   : > { %v1040_v58 = vrot.slane %v998_v54, 4  ;;  %v999_v59 = vmax.f32 %v967_v55, 0.0  ;;  %v1523_v60 = vpop.f32.mrb[4].mxu1 }
  0xef   : > { %v1028_v61 = vrot.slane %v996_v56, 4  ;;  %v997_v62 = vmax.f32 %v965_v57, 0.0  ;;  %v1557_v63 = vpop.f32.mrb[4].mxu0  ;;  %v553_v0 = vpop.f32.mrb[5].mxu1 }
  0xf0   : > { %v1041_v1 = vmax.f32 %v998_v54, %v1040_v58  ;;  %v1046_v2 = vrot.slane %v999_v59, 4  ;;  %v855_v3 = vadd.f32 %v1557_v63, %v1523_v60  ;;  %v846_v4 = vpop.f32.mrb[5].mxu0  ;;  %v1524_v5 = vpop.f32.mrb[6].mxu1 }
  0xf1   : > { %v1029_v6 = vmax.f32 %v996_v56, %v1028_v61  ;;  %v1034_v7 = vrot.slane %v997_v62, 4  ;;  %v847_v8 = vadd.f32 %v846_v4, %v553_v0  ;;  %v1558_v9 = vpop.f32.mrb[6].mxu0  ;;  %v556_v10 = vpop.f32.mrb[7].mxu1 }
  0xf2   : > { %v1042_v11 = vrot.slane %v1041_v1, 2  ;;  %v1047_v12 = vmax.f32 %v999_v59, %v1046_v2  ;;  %v970_v13 = vadd.f32 %v1832_v41, %v855_v3  ;;  %v858_v14 = vadd.f32 %v1558_v9, %v1524_v5  ;;  %v849_v15 = vpop.f32.mrb[7].mxu0 }
  0xf3   : > { %v1030_v16 = vrot.slane %v1029_v6, 2  ;;  %v1035_v17 = vmax.f32 %v997_v62, %v1034_v7  ;;  %v968_v18 = vadd.f32 %v1832_v41, %v847_v8  ;;  %v850_v19 = vadd.f32 %v849_v15, %v556_v10 }
  0xf4   : > { %v1043_v20 = vmax.f32 %v1041_v1, %v1042_v11  ;;  %v1048_v21 = vrot.slane %v1047_v12, 2  ;;  %v1002_v22 = vmax.f32 %v970_v13, 0.0  ;;  %v971_v23 = vadd.f32 %v1832_v41, %v858_v14 }
  0xf5   : > { %v1031_v24 = vmax.f32 %v1029_v6, %v1030_v16  ;;  %v1036_v25 = vrot.slane %v1035_v17, 2  ;;  %v1000_v26 = vmax.f32 %v968_v18, 0.0  ;;  %v969_v27 = vadd.f32 %v1832_v41, %v850_v19 }
  0xf6   : > { %v1044_v28 = vrot.slane %v1043_v20, 1  ;;  %v1049_v29 = vmax.f32 %v1047_v12, %v1048_v21  ;;  %v1064_v30 = vrot.slane %v1002_v22, 4  ;;  %v1003_v31 = vmax.f32 %v971_v23, 0.0  ;;  %v1527_v32 = vpop.f32.mrb[8].mxu1 }
  0xf7   : > { %v1032_v33 = vrot.slane %v1031_v24, 1  ;;  %v1037_v34 = vmax.f32 %v1035_v17, %v1036_v25  ;;  %v1052_v35 = vrot.slane %v1000_v26, 4  ;;  %v1001_v36 = vmax.f32 %v969_v27, 0.0  ;;  %v1561_v37 = vpop.f32.mrb[8].mxu0  ;;  %v569_v38 = vpop.f32.mrb[9].mxu1 }
  0xf8   : > { %v1045_v39 = vmax.f32 %v1043_v20, %v1044_v28  ;;  %v1050_v40 = vrot.slane %v1049_v29, 1  ;;  %v1065_v42 = vmax.f32 %v1002_v22, %v1064_v30  ;;  %v1070_v43 = vrot.slane %v1003_v31, 4  ;;  %v862_v44 = vpop.f32.mrb[9].mxu0  ;;  %v1528_v45 = vpop.f32.mrb[10].mxu1 }
  0xf9   : > { %v1033_v46 = vmax.f32 %v1031_v24, %v1032_v33  ;;  %v1038_v47 = vrot.slane %v1037_v34, 1  ;;  %v1053_v48 = vmax.f32 %v1000_v26, %v1052_v35  ;;  %v1058_v49 = vrot.slane %v1001_v36, 4  ;;  %v1562_v50 = vpop.f32.mrb[10].mxu0  ;;  %v572_v51 = vpop.f32.mrb[11].mxu1 }
  0xfa   : > { %v1051_v52 = vmax.f32 %v1049_v29, %v1050_v40  ;;  %v1066_v53 = vrot.slane %v1065_v42, 2  ;;  %v1071_v54 = vmax.f32 %v1003_v31, %v1070_v43  ;;  %v871_v55 = vadd.f32 %v1561_v37, %v1527_v32  ;;  %v865_v56 = vpop.f32.mrb[11].mxu0 }
  0xfb   : > { %v1039_v57 = vmax.f32 %v1037_v34, %v1038_v47  ;;  %v1054_v58 = vrot.slane %v1053_v48, 2  ;;  %v1059_v59 = vmax.f32 %v1001_v36, %v1058_v49  ;;  %v863_v60 = vadd.f32 %v862_v44, %v569_v38 }
  0xfc   : > { %v1067_v61 = vmax.f32 %v1065_v42, %v1066_v53  ;;  %v1072_v62 = vrot.slane %v1071_v54, 2  ;;  %v974_v63 = vadd.f32 %v1832_v41, %v871_v55  ;;  %v874_v0 = vadd.f32 %v1562_v50, %v1528_v45 }
  0xfd   : > { %v1253_v1 = vsel %vm1252_vm4, %v1039_v57, %v1033_v46  ;;  %v1055_v2 = vmax.f32 %v1053_v48, %v1054_v58  ;;  %v1060_v3 = vrot.slane %v1059_v59, 2  ;;  %v972_v4 = vadd.f32 %v1832_v41, %v863_v60 }
  0xfe   : > { %v1255_v5 = vsel %vm1254_vm5, %v1045_v39, %v1253_v1  ;;  %v1068_v6 = vrot.slane %v1067_v61, 1  ;;  %v1073_v7 = vmax.f32 %v1071_v54, %v1072_v62  ;;  %v1006_v8 = vmax.f32 %v974_v63, 0.0  ;;  %v1531_v9 = vpop.f32.mrb[12].mxu1 }
  0xff   : > { %v1056_v10 = vrot.slane %v1055_v2, 1  ;;  %v1257_v11 = vsel %vm1256_vm6, %v1051_v52, %v1255_v5  ;;  %v1061_v12 = vmax.f32 %v1059_v59, %v1060_v3  ;;  %v1004_v13 = vmax.f32 %v972_v4, 0.0  ;;  %v1565_v14 = vpop.f32.mrb[12].mxu0  ;;  %v585_v15 = vpop.f32.mrb[13].mxu1 }
 0x100   : > { %v1069_v16 = vmax.f32 %v1067_v61, %v1068_v6  ;;  %v1074_v17 = vrot.slane %v1073_v7, 1  ;;  %v1088_v18 = vrot.slane %v1006_v8, 4  ;;  %v975_v19 = vadd.f32 %v1832_v41, %v874_v0  ;;  %v878_v20 = vpop.f32.mrb[13].mxu0  ;;  %v1532_v21 = vpop.f32.mrb[14].mxu1 }
 0x101   : > { %v1057_v22 = vmax.f32 %v1055_v2, %v1056_v10  ;;  %v1062_v23 = vrot.slane %v1061_v12, 1  ;;  %v1076_v24 = vrot.slane %v1004_v13, 4  ;;  %v866_v25 = vadd.f32 %v865_v56, %v572_v51  ;;  %v1566_v26 = vpop.f32.mrb[14].mxu0  ;;  %v588_v27 = vpop.f32.mrb[15].mxu1 }
 0x102   : > { %v1075_v28 = vmax.f32 %v1073_v7, %v1074_v17  ;;  %v1089_v29 = vmax.f32 %v1006_v8, %v1088_v18  ;;  %v1007_v30 = vmax.f32 %v975_v19, 0.0  ;;  %v887_v31 = vadd.f32 %v1565_v14, %v1531_v9  ;;  %v881_v32 = vpop.f32.mrb[15].mxu0 }
 0x103   : > { %v1259_v33 = vsel %vm1258_vm7, %v1057_v22, %v1257_v11  ;;  %v1063_v34 = vmax.f32 %v1061_v12, %v1062_v23  ;;  %v1077_v35 = vmax.f32 %v1004_v13, %v1076_v24  ;;  %v973_v36 = vadd.f32 %v1832_v41, %v866_v25 }
 0x104   : > { %v1090_v37 = vrot.slane %v1089_v29, 2  ;;  %v1094_v38 = vrot.slane %v1007_v30, 4  ;;  %v978_v39 = vadd.f32 %v1832_v41, %v887_v31  ;;  %v879_v40 = vadd.f32 %v878_v20, %v585_v15 }
 0x105   : > { %v1261_v42 = vsel %vm1260_vm8, %v1063_v34, %v1259_v33  ;;  %v1078_v43 = vrot.slane %v1077_v35, 2  ;;  %v1005_v44 = vmax.f32 %v973_v36, 0.0  ;;  %v890_v45 = vadd.f32 %v1566_v26, %v1532_v21 }
 0x106   : > { %v1263_v46 = vsel %vm1262_vm9, %v1069_v16, %v1261_v42  ;;  %v1091_v47 = vmax.f32 %v1089_v29, %v1090_v37  ;;  %v1095_v48 = vmax.f32 %v1007_v30, %v1094_v38  ;;  %v1010_v49 = vmax.f32 %v978_v39, 0.0  ;;  %v1535_v50 = vpop.f32.mrb[16].mxu1 }
 0x107   : > { %v1265_v51 = vsel %vm1264_vm10, %v1075_v28, %v1263_v46  ;;  %v1079_v52 = vmax.f32 %v1077_v35, %v1078_v43  ;;  %v1082_v53 = vrot.slane %v1005_v44, 4  ;;  %v976_v54 = vadd.f32 %v1832_v41, %v879_v40  ;;  %v1569_v55 = vpop.f32.mrb[16].mxu0  ;;  %v601_v56 = vpop.f32.mrb[17].mxu1 }
 0x108   : > { %1291 = vst [vmem:[%s1855_s13] sm:$0xff] %v1265_v51  ;;  %v1092_v57 = vrot.slane %v1091_v47, 1  ;;  %v1096_v58 = vrot.slane %v1095_v48, 2  ;;  %v1112_v59 = vrot.slane %v1010_v49, 4  ;;  %v979_v60 = vadd.f32 %v1832_v41, %v890_v45  ;;  %v894_v61 = vpop.f32.mrb[17].mxu0  ;;  %v1536_v62 = vpop.f32.mrb[18].mxu1 }
 0x109   : > { %v1083_v63 = vmax.f32 %v1005_v44, %v1082_v53  ;;  %v1008_v0 = vmax.f32 %v976_v54, 0.0  ;;  %v882_v1 = vadd.f32 %v881_v32, %v588_v27  ;;  %v1570_v2 = vpop.f32.mrb[18].mxu0  ;;  %v604_v3 = vpop.f32.mrb[19].mxu1  ;;  %v1080_v4 = vrot.slane %v1079_v52, 1 }
 0x10a   : > { %v1097_v5 = vmax.f32 %v1095_v48, %v1096_v58  ;;  %v1113_v6 = vmax.f32 %v1010_v49, %v1112_v59  ;;  %v1011_v7 = vmax.f32 %v979_v60, 0.0  ;;  %v897_v8 = vpop.f32.mrb[19].mxu0  ;;  %v1093_v12 = vmax.f32 %v1091_v47, %v1092_v57 }
 0x10b   : > { %v1084_v9 = vrot.slane %v1083_v63, 2  ;;  %v1100_v10 = vrot.slane %v1008_v0, 4  ;;  %v977_v11 = vadd.f32 %v1832_v41, %v882_v1  ;;  %v903_v15 = vadd.f32 %v1569_v55, %v1535_v50 }
 0x10c   : > { %v1098_v13 = vrot.slane %v1097_v5, 1  ;;  %v1118_v14 = vrot.slane %v1011_v7, 4  ;;  %v895_v19 = vadd.f32 %v894_v61, %v601_v56  ;;  %v1081_v20 = vmax.f32 %v1079_v52, %v1080_v4 }
 0x10d   : > { %v1085_v16 = vmax.f32 %v1083_v63, %v1084_v9  ;;  %v1101_v17 = vmax.f32 %v1008_v0, %v1100_v10  ;;  %v1009_v18 = vmax.f32 %v977_v11, 0.0  ;;  %v1114_v21 = vrot.slane %v1113_v6, 2 }
 0x10e   : > { %v1119_v22 = vmax.f32 %v1011_v7, %v1118_v14  ;;  %v982_v23 = vadd.f32 %v1832_v41, %v903_v15  ;;  %v1539_v24 = vpop.f32.mrb[20].mxu1  ;;  %v980_v28 = vadd.f32 %v1832_v41, %v895_v19  ;;  %v1099_v31 = vmax.f32 %v1097_v5, %v1098_v13 }
 0x10f   : > { %v1086_v25 = vrot.slane %v1085_v16, 1  ;;  %v1102_v26 = vrot.slane %v1101_v17, 2  ;;  %v1106_v27 = vrot.slane %v1009_v18, 4  ;;  %v1573_v29 = vpop.f32.mrb[20].mxu0  ;;  %v617_v30 = vpop.f32.mrb[21].mxu1  ;;  %v906_v34 = vadd.f32 %v1570_v2, %v1536_v62 }
 0x110   : > { %v1120_v32 = vrot.slane %v1119_v22, 2  ;;  %v1014_v33 = vmax.f32 %v982_v23, 0.0  ;;  %v910_v35 = vpop.f32.mrb[21].mxu0  ;;  %v1540_v36 = vpop.f32.mrb[22].mxu1  ;;  %v1012_v40 = vmax.f32 %v980_v28, 0.0  ;;  %v1115_v44 = vmax.f32 %v1113_v6, %v1114_v21 }
 0x111   : > { %v1087_v37 = vmax.f32 %v1085_v16, %v1086_v25  ;;  %v1103_v38 = vmax.f32 %v1101_v17, %v1102_v26  ;;  %v1107_v39 = vmax.f32 %v1009_v18, %v1106_v27  ;;  %v1574_v42 = vpop.f32.mrb[22].mxu0  ;;  %v620_v43 = vpop.f32.mrb[23].mxu1  ;;  %v983_v47 = vadd.f32 %v1832_v41, %v906_v34 }
 0x112   : > { %v1121_v45 = vmax.f32 %v1119_v22, %v1120_v32  ;;  %v1136_v46 = vrot.slane %v1014_v33, 4  ;;  %v913_v48 = vpop.f32.mrb[23].mxu0  ;;  %v1124_v52 = vrot.slane %v1012_v40, 4  ;;  %v1116_v60 = vrot.slane %v1115_v44, 1 }
 0x113   : > { %v1266_v49 = vsel %vm1252_vm4, %v1087_v37, %v1081_v20  ;;  %v1104_v50 = vrot.slane %v1103_v38, 1  ;;  %v1108_v51 = vrot.slane %v1107_v39, 2  ;;  %v1015_v55 = vmax.f32 %v983_v47, 0.0 }
 0x114   : > { %v1267_v53 = vsel %vm1254_vm5, %v1093_v12, %v1266_v49  ;;  %v1137_v54 = vmax.f32 %v1014_v33, %v1136_v46  ;;  %v1125_v59 = vmax.f32 %v1012_v40, %v1124_v52  ;;  %v898_v63 = vadd.f32 %v897_v8, %v604_v3 }
 0x115   : > { %v1105_v56 = vmax.f32 %v1103_v38, %v1104_v50  ;;  %v1268_v57 = vsel %vm1256_vm6, %v1099_v31, %v1267_v53  ;;  %v1109_v58 = vmax.f32 %v1107_v39, %v1108_v51  ;;  %v1142_v62 = vrot.slane %v1015_v55, 4 }
 0x116   : > { %v1138_v61 = vrot.slane %v1137_v54, 2  ;;  %v1543_v0 = vpop.f32.mrb[24].mxu1  ;;  %v1122_v2 = vrot.slane %v1121_v45, 1  ;;  %v919_v5 = vadd.f32 %v1573_v29, %v1539_v24  ;;  %v1126_v9 = vrot.slane %v1125_v59, 2 }
 0x117   : > { %v1269_v1 = vsel %vm1258_vm7, %v1105_v56, %v1268_v57  ;;  %v1110_v4 = vrot.slane %v1109_v58, 1  ;;  %v1577_v6 = vpop.f32.mrb[24].mxu0  ;;  %v633_v7 = vpop.f32.mrb[25].mxu1  ;;  %v1143_v10 = vmax.f32 %v1015_v55, %v1142_v62  ;;  %v981_v11 = vadd.f32 %v1832_v41, %v898_v63 }
 0x118   : > { %v911_v12 = vadd.f32 %v910_v35, %v617_v30  ;;  %v926_v13 = vpop.f32.mrb[25].mxu0  ;;  %v1544_v14 = vpop.f32.mrb[26].mxu1  ;;  %v1872_v16 = vmax.f32 %v1137_v54, %v1138_v61  ;;  %v986_v3 = vadd.f32 %v1832_v41, %v919_v5  ;;  %v922_v8 = vadd.f32 %v1574_v42, %v1540_v36 }
 0x119   : > { %v1111_v15 = vmax.f32 %v1109_v58, %v1110_v4  ;;  %v1578_v17 = vpop.f32.mrb[26].mxu0  ;;  %v1875_v18 = vpop.f32.mrb[27].mxu1  ;;  %v1117_v19 = vmax.f32 %v1115_v44, %v1116_v60  ;;  %v1144_v20 = vrot.slane %v1143_v10, 2  ;;  %v1013_v21 = vmax.f32 %v981_v11, 0.0 }
 0x11a   : > { %v984_v22 = vadd.f32 %v1832_v41, %v911_v12  ;;  %v1878_v23 = vpop.f32.mrb[27].mxu0  ;;  %v1123_v24 = vmax.f32 %v1121_v45, %v1122_v2  ;;  %v1018_v26 = vmax.f32 %v986_v3, 0.0  ;;  %v987_v27 = vadd.f32 %v1832_v41, %v922_v8 }
 0x11b   : > { %v1270_v25 = vsel %vm1260_vm8, %v1111_v15, %v1269_v1  ;;  %v1127_v29 = vmax.f32 %v1125_v59, %v1126_v9  ;;  %v1130_v30 = vrot.slane %v1013_v21, 4  ;;  %v1140_v32 = vrot.slane %v1872_v16, 1 }
 0x11c   : > { %v1271_v28 = vsel %vm1262_vm9, %v1117_v19, %v1270_v25  ;;  %v1160_v33 = vrot.slane %v1018_v26, 4  ;;  %v1016_v34 = vmax.f32 %v984_v22, 0.0  ;;  %v1145_v35 = vmax.f32 %v1143_v10, %v1144_v20 }
 0x11d   : > { %v1272_v31 = vsel %vm1264_vm10, %v1123_v24, %v1271_v28  ;;  %v1131_v36 = vmax.f32 %v1013_v21, %v1130_v30  ;;  %v1019_v37 = vmax.f32 %v987_v27, 0.0  ;;  %v914_v38 = vadd.f32 %v913_v48, %v620_v43 }
 0x11e   : > { %1292 = vst [vmem:[%s1855_s13 + $0x8] sm:$0xff] %v1272_v31  ;;  %v1547_v39 = vpop.f32.mrb[28].mxu1  ;;  %v1161_v40 = vmax.f32 %v1018_v26, %v1160_v33  ;;  %v1148_v42 = vrot.slane %v1016_v34, 4  ;;  %v935_v44 = vadd.f32 %v1577_v6, %v1543_v0  ;;  %v927_v45 = vadd.f32 %v926_v13, %v633_v7 }
 0x11f   : > { %v1581_v46 = vpop.f32.mrb[28].mxu0  ;;  %v649_v47 = vpop.f32.mrb[29].mxu1  ;;  %v1128_v49 = vrot.slane %v1127_v29, 1  ;;  %v1132_v50 = vrot.slane %v1131_v36, 2  ;;  %v1166_v51 = vrot.slane %v1019_v37, 4  ;;  %v985_v52 = vadd.f32 %v1832_v41, %v914_v38 }
 0x120   : > { %v942_v53 = vpop.f32.mrb[29].mxu0  ;;  %v1548_v54 = vpop.f32.mrb[30].mxu1  ;;  %v1162_v55 = vrot.slane %v1161_v40, 2  ;;  %v1149_v56 = vmax.f32 %v1016_v34, %v1148_v42  ;;  %v990_v57 = vadd.f32 %v1832_v41, %v935_v44  ;;  %v988_v43 = vadd.f32 %v1832_v41, %v927_v45 }
 0x121   : > { %v1582_v48 = vpop.f32.mrb[30].mxu0  ;;  %v652_v58 = vpop.f32.mrb[31].mxu1  ;;  %v1133_v59 = vmax.f32 %v1131_v36, %v1132_v50  ;;  %v1167_v60 = vmax.f32 %v1019_v37, %v1166_v51  ;;  %v1017_v61 = vmax.f32 %v985_v52, 0.0  ;;  %v938_v62 = vadd.f32 %v1578_v17, %v1544_v14 }
 0x122   : > { %v945_v63 = vpop.f32.mrb[31].mxu0  ;;  %v1146_v0 = vrot.slane %v1145_v35, 1  ;;  %v1150_v1 = vrot.slane %v1149_v56, 2  ;;  %v1022_v2 = vmax.f32 %v990_v57, 0.0  ;;  %v1020_v4 = vmax.f32 %v988_v43, 0.0 }
 0x123   : > { %v1134_v5 = vrot.slane %v1133_v59, 1  ;;  %v1168_v6 = vrot.slane %v1167_v60, 2  ;;  %v1154_v7 = vrot.slane %v1017_v61, 4  ;;  %v991_v9 = vadd.f32 %v1832_v41, %v938_v62 }
 0x124   : > { %v1129_v10 = vmax.f32 %v1127_v29, %v1128_v49  ;;  %v1163_v11 = vmax.f32 %v1161_v40, %v1162_v55  ;;  %v1151_v12 = vmax.f32 %v1149_v56, %v1150_v1  ;;  %v1184_v3 = vrot.slane %v1022_v2, 4 }
 0x125   : > { %v1135_v13 = vmax.f32 %v1133_v59, %v1134_v5  ;;  %v1155_v15 = vmax.f32 %v1017_v61, %v1154_v7  ;;  %v1023_v8 = vmax.f32 %v991_v9, 0.0  ;;  %v1141_v19 = vmax.f32 %v1872_v16, %v1140_v32 }
 0x126   : > { %v1152_v14 = vrot.slane %v1151_v12, 1  ;;  %v1169_v17 = vmax.f32 %v1167_v60, %v1168_v6  ;;  %v1172_v20 = vrot.slane %v1020_v4, 4  ;;  %v1147_v21 = vmax.f32 %v1145_v35, %v1146_v0 }
 0x127   : > { %v1273_v22 = vsel %vm1252_vm4, %v1135_v13, %v1129_v10  ;;  %v1156_v24 = vrot.slane %v1155_v15, 2  ;;  %v1190_v25 = vrot.slane %v1023_v8, 4  ;;  %v1164_v27 = vrot.slane %v1163_v11, 1 }
 0x128   : > { %v1274_v26 = vsel %vm1254_vm5, %v1141_v19, %v1273_v22  ;;  %v1153_v28 = vmax.f32 %v1151_v12, %v1152_v14  ;;  %v1185_v31 = vmax.f32 %v1022_v2, %v1184_v3  ;;  %v1170_v34 = vrot.slane %v1169_v17, 1 }
 0x129   : > { %v1275_v29 = vsel %vm1256_vm6, %v1147_v21, %v1274_v26  ;;  %v1157_v30 = vmax.f32 %v1155_v15, %v1156_v24  ;;  %v1173_v16 = vmax.f32 %v1020_v4, %v1172_v20  ;;  %v930_v32 = vadd.f32 %v1878_v23, %v1875_v18 }
 0x12a   : > { %v1276_v33 = vsel %vm1258_vm7, %v1153_v28, %v1275_v29  ;;  %v1191_v36 = vmax.f32 %v1023_v8, %v1190_v25  ;;  %v951_v37 = vadd.f32 %v1581_v46, %v1547_v39  ;;  %v943_v38 = vadd.f32 %v942_v53, %v649_v47 }
 0x12b   : > { %v1158_v35 = vrot.slane %v1157_v30, 1  ;;  %v1165_v40 = vmax.f32 %v1163_v11, %v1164_v27  ;;  %v989_v42 = vadd.f32 %v1832_v41, %v930_v32  ;;  %v954_v44 = vadd.f32 %v1582_v48, %v1548_v54 }
 0x12c   : > { %v1186_v49 = vrot.slane %v1185_v31, 2  ;;  %v994_v50 = vadd.f32 %v1832_v41, %v951_v37  ;;  %v992_v51 = vadd.f32 %v1832_v41, %v943_v38  ;;  %v1171_v52 = vmax.f32 %v1169_v17, %v1170_v34 }
 0x12d   : > { %v1159_v45 = vmax.f32 %v1157_v30, %v1158_v35  ;;  %v1174_v55 = vrot.slane %v1173_v16, 2  ;;  %v1021_v56 = vmax.f32 %v989_v42, 0.0  ;;  %v995_v18 = vadd.f32 %v1832_v41, %v954_v44 }
 0x12e   : > { %v1192_v39 = vrot.slane %v1191_v36, 2  ;;  %v1026_v46 = vmax.f32 %v994_v50, 0.0  ;;  %v1024_v47 = vmax.f32 %v992_v51, 0.0  ;;  %v946_v43 = vadd.f32 %v945_v63, %v652_v58 }
 0x12f   : > { %v1277_v23 = vsel %vm1260_vm8, %v1159_v45, %v1276_v33  ;;  %v1178_v54 = vrot.slane %v1021_v56, 4  ;;  %v1027_v57 = vmax.f32 %v995_v18, 0.0  ;;  %v1175_v61 = vmax.f32 %v1173_v16, %v1174_v55 }
 0x130   : > { %v1278_v53 = vsel %vm1262_vm9, %v1165_v40, %v1277_v23  ;;  %v1208_v59 = vrot.slane %v1026_v46, 4  ;;  %v1196_v60 = vrot.slane %v1024_v47, 4  ;;  %v993_v1 = vadd.f32 %v1832_v41, %v946_v43 }
 0x131   : > { %v1279_v48 = vsel %vm1264_vm10, %v1171_v52, %v1278_v53  ;;  %v1179_v62 = vmax.f32 %v1021_v56, %v1178_v54  ;;  %v1214_v0 = vrot.slane %v1027_v57, 4  ;;  %v1187_v2 = vmax.f32 %v1185_v31, %v1186_v49 }
 0x132   : > { %1293 = vst [vmem:[%s1855_s13 + $0x10] sm:$0xff] %v1279_v48  ;;  %v1209_v4 = vmax.f32 %v1026_v46, %v1208_v59  ;;  %v1197_v5 = vmax.f32 %v1024_v47, %v1196_v60  ;;  %v1193_v6 = vmax.f32 %v1191_v36, %v1192_v39  ;;  %v1025_v10 = vmax.f32 %v993_v1, 0.0 }
 0x133   : > { %v1180_v7 = vrot.slane %v1179_v62, 2  ;;  %v1215_v9 = vmax.f32 %v1027_v57, %v1214_v0  ;;  %v1176_v58 = vrot.slane %v1175_v61, 1  ;;  %v1188_v3 = vrot.slane %v1187_v2, 1 }
 0x134   : > { %v1210_v11 = vrot.slane %v1209_v4, 2  ;;  %v1198_v12 = vrot.slane %v1197_v5, 2  ;;  %v1202_v15 = vrot.slane %v1025_v10, 4  ;;  %v1194_v19 = vrot.slane %v1193_v6, 1 }
 0x135   : > { %v1181_v63 = vmax.f32 %v1179_v62, %v1180_v7  ;;  %v1216_v13 = vrot.slane %v1215_v9, 2  ;;  %v1177_v21 = vmax.f32 %v1175_v61, %v1176_v58  ;;  %v1189_v26 = vmax.f32 %v1187_v2, %v1188_v3 }
 0x136   : > { %v1199_v8 = vmax.f32 %v1197_v5, %v1198_v12  ;;  %v1203_v17 = vmax.f32 %v1025_v10, %v1202_v15  ;;  %v1211_v20 = vmax.f32 %v1209_v4, %v1210_v11  ;;  %v1195_v28 = vmax.f32 %v1193_v6, %v1194_v19 }
 0x137   : > { %v1182_v14 = vrot.slane %v1181_v63, 1  ;;  %v1217_v24 = vmax.f32 %v1215_v9, %v1216_v13 }
 0x138   : > { %v1200_v41 = vrot.slane %v1199_v8, 1  ;;  %v1204_v25 = vrot.slane %v1203_v17, 2  ;;  %v1212_v33 = vrot.slane %v1211_v20, 1 }
 0x139   : > { %v1183_v22 = vmax.f32 %v1181_v63, %v1182_v14  ;;  %v1218_v16 = vrot.slane %v1217_v24, 1 }
 0x13a   : > { %v1201_v27 = vmax.f32 %v1199_v8, %v1200_v41  ;;  %v1205_v30 = vmax.f32 %v1203_v17, %v1204_v25  ;;  %v1213_v37 = vmax.f32 %v1211_v20, %v1212_v33 }
 0x13b   : > { %v1280_v29 = vsel %vm1252_vm4, %v1183_v22, %v1177_v21  ;;  %v1219_v38 = vmax.f32 %v1217_v24, %v1218_v16 }
 0x13c   : > { %v1281_v31 = vsel %vm1254_vm5, %v1189_v26, %v1280_v29  ;;  %v1206_v32 = vrot.slane %v1205_v30, 1 }
 0x13d   : > { %v1282_v34 = vsel %vm1256_vm6, %v1195_v28, %v1281_v31 }
 0x13e   : > { %v1283_v35 = vsel %vm1258_vm7, %v1201_v27, %v1282_v34  ;;  %v1207_v36 = vmax.f32 %v1205_v30, %v1206_v32 }
 0x140   : > { %v1284_v40 = vsel %vm1260_vm8, %v1207_v36, %v1283_v35 }
 0x141   : > { %v1285_v42 = vsel %vm1262_vm9, %v1213_v37, %v1284_v40 }
 0x142   : > { %v1286_v44 = vsel %vm1264_vm10, %v1219_v38, %v1285_v42 }
 0x143   : > { %1294 = vst [vmem:[%s1855_s13 + $0x18] sm:$0xff] %v1286_v44 }
 0x144 PF: > { %s15_s20 = sadd.s32 1, %s1695_s20   ;;  %s1929_s18 = smov %s1691_s19 }
 0x145   : > { %p12_p5 = scmp.ge.s32.totalorder %s15_s20, 4   ;;  %s1930_s19 = smov %s1932_s21 }
 0x147   :  { %14 = sbr.rel (!%p12_p5) target bundleno = 2 (0x2), region = 73 }

// kernel: forward.5
= control target key start
LH: loop header
LB: loop body
LE: loop exit
PB: predicated region body
PF: predicated region fallthrough
CT: control target
= control target key end

     0   :  { %s2946_s0 = inlined_call_operand.vmem [shape: bf16[2,256,3], index: 0, kind: input, shape index: {}]   ;;  %s2947_s1 = inlined_call_operand.vmem [shape: bf16[2,256,128], index: 1, kind: input, shape index: {}]   ;;  %s2948_s2 = inlined_call_operand.vmem [shape: f32[2,32,128], index: 2, kind: input, shape index: {}]   ;;  %s2949_s3 = inlined_call_operand.vmem [shape: bf16[3,128], index: 3, kind: input, shape index: {}]   ;;  %s2950_s4 = inlined_call_operand.vmem [shape: bf16[128,128], index: 4, kind: input, shape index: {}]   ;;  %s2951_s5 = inlined_call_operand.vmem [shape: f32[1,128], index: 5, kind: input, shape index: {}]   ;;  %s2952_s6 = inlined_call_operand.vmem [shape: bf16[128,128], index: 6, kind: input, shape index: {}]   ;;  %s2953_s7 = inlined_call_operand.vmem [shape: f32[1,128], index: 7, kind: input, shape index: {}]   ;;  %s2954_s8 = inlined_call_operand.vmem [shape: bf16[128,128], index: 8, kind: input, shape index: {}]   ;;  %s2955_s9 = inlined_call_operand.vmem [shape: f32[1,128], index: 9, kind: input, shape index: {}]   ;;  %s2956_s10 = inlined_call_operand.hbm [shape: f32[2,32,128], index: 10, kind: output, shape index: {}]  }
   0x1   :  { %2957 = sst [smem:[#allocation5_spill]] %s2946_s0 }
   0x2   :  { %15 = vsyncpa [#allocation3], 0 }
   0x3   :  { %17 = vsyncpa [#allocation3 + $0x1], 0  ;;  %s2502_s13 = smov 0   ;;  %s2504_s14 = smov 0  }
   0x4   :  { %s2506_s15 = smov 0   ;;  %s2508_s16 = smov 0  }
   0x5   :  { %s2510_s17 = smov 0   ;;  %s2512_s18 = smov 0  }
   0x6 LB: > { %s1936_s19 = sadd.s32 4294967295, %s2441_s18   ;;  %s1937_s20 = sadd.s32 4294967294, %s2441_s18   ;;  %s2441_s18 = sphi %s2512_s18, %s23_s18   ;;  %s2437_s17 = sphi %s2510_s17, %s2965_s17   ;;  %s2433_s16 = sphi %s2508_s16, %s2964_s16   ;;  %s2429_s15 = sphi %s2506_s15, %s2963_s15   ;;  %s2425_s14 = sphi %s2504_s14, %s2962_s14   ;;  %s2421_s13 = sphi %s2502_s13, %s2961_s13  }
   0x7   : > { %s35_s21 = sadd.s32 1, %s2437_s17  ;;  %s275_s22 = sadd.s32 1, %s2429_s15 }
   0x8   : > { %p37_p0 = scmp.ge.s32.totalorder %s35_s21, 2  ;;  %p285_p1 = scmp.ne.s32.totalorder %s2429_s15, %s2425_s14 }
   0x9   : > { %p286_p2 = scmp.eq.s32.totalorder %s1936_s19, 1  ;;  %p291_p3 = scmp.ne.s32.totalorder %s2425_s14, %s2421_s13 }
   0xa   : > { %s2967_s21 = smov (%p37_p0, %s35_s21), 0  ;;  %p292_p5 = scmp.eq.s32.totalorder %s1937_s20, 1 }
   0xb   : > { %p2542_p4 = por %p286_p2, %p285_p1  ;;  %s270_s24 = ssub.s32 %s2437_s17, %s2967_s21 }
   0xc   : > { %p1940_p6 = scmp.ge.s32.totalorder %s2441_s18, 1  ;;  %p273_p7 = scmp.eq.s32.totalorder %s270_s24, 0 }
   0xd   : > { %p2549_p8 = por %p292_p5, %p291_p3  ;;  %p370_p9 = scmp.lt.s32.totalorder %s2441_s18, 3 }
   0xe   : > { %s2555_s26 = scalar_select %p273_p7, %s2429_s15, %s275_s22  }
   0xf   : > { %p371_p10 = pnand %p1940_p6, %p370_p9 }
  0x10   : > { %v542_v0 = vld [vmem:[%s2949_s3] sm:$0x3] (!%p371_p10)  ;;  %vm672_vm0 = vcmask (!%p371_p10), 1040384   ;;  %vm673_vm1 = vcmask (!%p371_p10), 1041408   ;;  %p431_p11 = scmp.lt.s32.totalorder (!%p371_p10), %s2433_s16, 1  ;;  %v2443_v1 = vmov (!%p371_p10), 65535  }
  0x11   : > { %374 = sbr.rel (%p371_p10) target bundleno = 839 (0x347), region = 60  ;;  %v674_v2 = vsel (!%p371_p10), %vm672_vm0, 4294967295, %v2443_v1  ;;  %v2308_v4 = vld [vmem:[%s2950_s4] sm:$0xff] (!%p371_p10)   ;;  %s2960_s0 = sld [smem:[#allocation5_spill]] (!%p371_p10)  ;;  %vm623_vm2 = vcmask (!%p371_p10), 23552   ;;  %v2310_v6 = vld [vmem:[%s2950_s4 + $0x8] sm:$0xff] (!%p371_p10)  }
  0x12   : > { %v675_v3 = vsel (!%p371_p10), %vm673_vm1, %v674_v2, 0  ;;  %v2312_v10 = vld [vmem:[%s2950_s4 + $0x10] sm:$0xff] (!%p371_p10)   ;;  %v2314_v13 = vld [vmem:[%s2950_s4 + $0x18] sm:$0xff] (!%p371_p10)   ;;  %v2316_v14 = vld [vmem:[%s2950_s4 + $0x20] sm:$0xff] (!%p371_p10)   ;;  %vm1527_vm3 = vcmask (!%p371_p10), 1041409   ;;  %vm1529_vm4 = vcmask (!%p371_p10), 1042434  }
  0x13   : > { %v677_v5 = vand.u32 (!%p371_p10), %v675_v3, %v542_v0  ;;  %v2318_v17 = vld [vmem:[%s2950_s4 + $0x28] sm:$0xff] (!%p371_p10)   ;;  %v2320_v18 = vld [vmem:[%s2950_s4 + $0x30] sm:$0xff] (!%p371_p10)   ;;  %v2322_v24 = vld [vmem:[%s2950_s4 + $0x38] sm:$0xff] (!%p371_p10)   ;;  %vm1531_vm5 = vcmask (!%p371_p10), 1043459   ;;  %vm1533_vm6 = vcmask (!%p371_p10), 1044484   ;;  %vm1535_vm7 = vcmask (!%p371_p10), 1045509  }
  0x14   : > { %v2347_v45 = vld [vmem:[%s2952_s6] sm:$0xff] (!%p371_p10)   ;;  %v2348_v46 = vld [vmem:[%s2952_s6 + $0x8] sm:$0xff] (!%p371_p10)   ;;  %v2349_v47 = vld [vmem:[%s2952_s6 + $0x10] sm:$0xff] (!%p371_p10)   ;;  %vm1537_vm8 = vcmask (!%p371_p10), 1046534   ;;  %vm1539_vm9 = vcmask (!%p371_p10), 1047559   ;;  %s427_s30 = sand.u32 (!%p371_p10), 1, %s2425_s14  }
  0x15   : > { %2093 = vmatprep.subr.bf16.mxu0 (!%p371_p10), %v677_v5  ;;  %2215 = vmatprep.subr.bf16.mxu1 (!%p371_p10), %v677_v5  ;;  %v2350_v48 = vld [vmem:[%s2952_s6 + $0x18] sm:$0xff] (!%p371_p10)   ;;  %v2351_v49 = vld [vmem:[%s2952_s6 + $0x20] sm:$0xff] (!%p371_p10)   ;;  %v2352_v50 = vld [vmem:[%s2952_s6 + $0x28] sm:$0xff] (!%p371_p10)   ;;  %s1941_s28 = sshll.u32 (!%p371_p10), %s427_s30, 5  ;;  %s2444_s24 = smov (!%p371_p10), [#allocation2]  }
  0x16   : > { %2094 = vmatpush3.bf16.msra.mxu0 (!%p371_p10), %v677_v5  ;;  %2216 = vmatpush3.bf16.msra.mxu1 (!%p371_p10), %v677_v5  ;;  %v2353_v53 = vld [vmem:[%s2952_s6 + $0x30] sm:$0xff] (!%p371_p10)   ;;  %v2354_v56 = vld [vmem:[%s2952_s6 + $0x38] sm:$0xff] (!%p371_p10)   ;;  %v2686_v59 = vld [vmem:[%s2954_s8] sm:$0xff] (!%p371_p10)  }
  0x17   : > { %2127 = vmatprep.subr.bf16.mxu0 (!%p371_p10), %v2308_v4  ;;  %2175 = vmatprep.subr.bf16.mxu1 (!%p371_p10), %v2347_v45  ;;  %v2691_v60 = vld [vmem:[%s2951_s5] ss:$0 sm:$0xff] (!%p371_p10) }
  0x18   : > { %s2562_s29 = scalar_select %p431_p11, %s2433_s16, 1 }
  0x1a   : > { %s2028_s12 = sshll.u32 %s2562_s29, 7 }
  0x1b   : > { %s2571_s22 = scalar_lea.vmem %s2960_s0, %s2028_s12  ;;  %s2593_s27 = scalar_lea.vmem %s2947_s1, %s2028_s12 }
  0x1c   : > { %v2307_v7 = vld [vmem:[%s2571_s22] sm:$0xff]   ;;  %v2309_v8 = vld [vmem:[%s2571_s22 + $0x8] sm:$0xff]   ;;  %v2311_v9 = vld [vmem:[%s2571_s22 + $0x10] sm:$0xff]  }
  0x1d   : > { %2095 = vmatprep.mubr.msk.bf16.mxu0 %vm623_vm2, %v2307_v7  ;;  %v2313_v11 = vld [vmem:[%s2571_s22 + $0x18] sm:$0xff]   ;;  %v2315_v12 = vld [vmem:[%s2571_s22 + $0x20] sm:$0xff]   ;;  %v2317_v15 = vld [vmem:[%s2571_s22 + $0x28] sm:$0xff]  }
  0x1e   : > { %2096 = vmatmul.mubr.msk.bf16.vlgmr.msra.gmra.mrb[0].mxu0 %vm623_vm2, %v2309_v8  ;;  %v2319_v16 = vld [vmem:[%s2571_s22 + $0x30] sm:$0xff]   ;;  %v2331_v19 = vld [vmem:[%s2571_s22 + $0x40] sm:$0xff]   ;;  %v2332_v20 = vld [vmem:[%s2571_s22 + $0x48] sm:$0xff]  }
  0x1f   : > { %2128 = vmatpush3.bf16.msra.mxu0 %v2308_v4  ;;  %2099 = vmatprep.mubr.msk.bf16.mxu0 %vm623_vm2, %v2311_v9  ;;  %v2321_v21 = vld [vmem:[%s2571_s22 + $0x38] sm:$0xff]   ;;  %v2323_v22 = vld [vmem:[%s2593_s27] sm:$0xff]   ;;  %v2335_v23 = vld [vmem:[%s2571_s22 + $0x50] sm:$0xff]  }
  0x20   : > { %2129 = vmatprep.subr.bf16.mxu0 %v2310_v6  ;;  %2111 = vmatprep.mubr.msk.bf16.mxu1 %vm623_vm2, %v2331_v19  ;;  %v2336_v25 = vld [vmem:[%s2571_s22 + $0x58] sm:$0xff]   ;;  %v2339_v26 = vld [vmem:[%s2571_s22 + $0x60] sm:$0xff]   ;;  %v2324_v27 = vld [vmem:[%s2593_s27 + $0x8] sm:$0xff]  }
  0x21   : > { %2112 = vmatmul.mubr.msk.bf16.vlgmr.msra.gmra.mrb[0].mxu1 %vm623_vm2, %v2332_v20  ;;  %v2325_v28 = vld [vmem:[%s2593_s27 + $0x10] sm:$0xff]   ;;  %v2340_v29 = vld [vmem:[%s2571_s22 + $0x68] sm:$0xff]   ;;  %v2326_v31 = vld [vmem:[%s2593_s27 + $0x18] sm:$0xff]  }
  0x22   : > { %2115 = vmatprep.mubr.msk.bf16.mxu1 %vm623_vm2, %v2335_v23  ;;  %v2343_v30 = vld [vmem:[%s2571_s22 + $0x70] sm:$0xff]   ;;  %v2327_v32 = vld [vmem:[%s2593_s27 + $0x20] sm:$0xff]   ;;  %v2344_v33 = vld [vmem:[%s2571_s22 + $0x78] sm:$0xff]   ;;  %2176 = vmatpush3.bf16.msra.mxu1 %v2347_v45  ;;  %s2030_s22 = sshll.u32 %s2562_s29, 5  ;;  %s429_s29 = scalar_lea.vmem [#allocation2], %s1941_s28 }
  0x23   : > { %2130 = vmatpush3.bf16.msra.mxu0 %v2310_v6  ;;  %v2328_v34 = vld [vmem:[%s2593_s27 + $0x28] sm:$0xff]   ;;  %v2329_v35 = vld [vmem:[%s2593_s27 + $0x30] sm:$0xff]   ;;  %v2330_v36 = vld [vmem:[%s2593_s27 + $0x38] sm:$0xff]   ;;  %2177 = vmatprep.subr.bf16.mxu1 %v2348_v46  ;;  %s458_s19 = scalar_lea.vmem %s2948_s2, %s2030_s22  ;;  %s2031_s22 = sshll.u32 %s2433_s16, 9 }
  0x24   : > { %2131 = vmatprep.subr.bf16.mxu0 %v2312_v10  ;;  %v2333_v37 = vld [vmem:[%s2593_s27 + $0x40] sm:$0xff]   ;;  %v2334_v38 = vld [vmem:[%s2593_s27 + $0x48] sm:$0xff]   ;;  %v2337_v39 = vld [vmem:[%s2593_s27 + $0x50] sm:$0xff]   ;;  %s2900_s16 = scalar_lea.sflag [#allocation3], %s427_s30  ;;  %s2367_s28 = sshll.u32 %s2444_s24, 4  ;;  %s2368_s28 = int_to_ptr.vmem [resolvable:$false] %s2367_s28 }
  0x25   : > { %v2338_v40 = vld [vmem:[%s2593_s27 + $0x58] sm:$0xff]   ;;  %v2341_v41 = vld [vmem:[%s2593_s27 + $0x60] sm:$0xff]   ;;  %v2342_v42 = vld [vmem:[%s2593_s27 + $0x68] sm:$0xff]   ;;  %s2369_s0 = scalar_lea.vmem %s2368_s28, 1024 }
  0x26   : > { %2100 = vmatmul.mubr.msk.bf16.gmra.mrb[4].mxu0 %vm623_vm2, %v2313_v11  ;;  %v2345_v43 = vld [vmem:[%s2593_s27 + $0x70] sm:$0xff]   ;;  %v2346_v44 = vld [vmem:[%s2593_s27 + $0x78] sm:$0xff]   ;;  %2178 = vmatpush3.bf16.msra.mxu1 %v2348_v46  ;;  %s1821_s27 = sshll.u32 %s429_s29, 4  ;;  %s2891_s27 = int_to_ptr.vmem [resolvable:$true] %s1821_s27 }
  0x27   : > { %2132 = vmatpush3.bf16.msra.mxu0 %v2312_v10  ;;  %2103 = vmatprep.mubr.msk.bf16.mxu0 %vm623_vm2, %v2315_v12  ;;  %s2363_s20 = scalar_lea.vmem %s2891_s27, 512  ;;  %p2370_p1 = scmp.lt.s32.totalorder %s2891_s27, %s2368_s28 }
  0x28   : > { %2133 = vmatprep.subr.bf16.mxu0 %v2314_v13  ;;  %2179 = vmatprep.subr.bf16.mxu1 %v2349_v47  ;;  %p2364_p12 = scmp.ne.s32.totalorder %s2891_s27, %s2363_s20  ;;  %p2371_p2 = scmp.lt.s32.totalorder %s2369_s0, %s2363_s20 }
  0x29   : > { %2116 = vmatmul.mubr.msk.bf16.gmra.mrb[4].mxu1 %vm623_vm2, %v2336_v25 }
  0x2a   : > { %2119 = vmatprep.mubr.msk.bf16.mxu1 %vm623_vm2, %v2339_v26  ;;  %2180 = vmatpush3.bf16.msra.mxu1 %v2349_v47  ;;  %p2365_p13 = pnand %p2364_p12, %p2542_p4  ;;  %p2372_p3 = por %p2371_p2, %p2370_p1 }
  0x2b   : > { %2134 = vmatpush3.bf16.msra.mxu0 %v2314_v13  ;;  %2181 = vmatprep.subr.bf16.mxu1 %v2350_v48 }
  0x2c   : > { %2135 = vmatprep.subr.bf16.mxu0 %v2316_v14  ;;  %p2366_p0 = pneg %p2365_p13 }
  0x2e   : > { %2104 = vmatmul.mubr.msk.bf16.gmra.mrb[8].mxu0 %vm623_vm2, %v2317_v15  ;;  %2182 = vmatpush3.bf16.msra.mxu1 %v2350_v48  ;;  %p2373_p5 = pnand %p2372_p3, %p2366_p0 }
  0x2f   : > { %2136 = vmatpush3.bf16.msra.mxu0 %v2316_v14  ;;  %2107 = vmatprep.mubr.msk.bf16.mxu0 %vm623_vm2, %v2319_v16 }
  0x30   : > { %2137 = vmatprep.subr.bf16.mxu0 %v2318_v17  ;;  %2183 = vmatprep.subr.bf16.mxu1 %v2351_v49 }
  0x31   : > { %2120 = vmatmul.mubr.msk.bf16.gmra.mrb[8].mxu1 %vm623_vm2, %v2340_v29 }
  0x32   : > { %2123 = vmatprep.mubr.msk.bf16.mxu1 %vm623_vm2, %v2343_v30  ;;  %2184 = vmatpush3.bf16.msra.mxu1 %v2351_v49 }
  0x33   : > { %2138 = vmatpush3.bf16.msra.mxu0 %v2318_v17  ;;  %2185 = vmatprep.subr.bf16.mxu1 %v2352_v50 }
  0x34   : > { %2139 = vmatprep.subr.bf16.mxu0 %v2320_v18 }
  0x36   : > { %2108 = vmatmul.mubr.msk.bf16.gmra.mrb[12].mxu0 %vm623_vm2, %v2321_v21  ;;  %2186 = vmatpush3.bf16.msra.mxu1 %v2352_v50 }
  0x37   : > { %2140 = vmatpush3.bf16.msra.mxu0 %v2320_v18  ;;  %2143 = vmatprep.mubr.bf16.mxu0 %v2323_v22 }
  0x38   : > { %2141 = vmatprep.subr.bf16.mxu0 %v2322_v24  ;;  %2187 = vmatprep.subr.bf16.mxu1 %v2353_v53 }
  0x39   : > { %2124 = vmatmul.mubr.msk.bf16.gmra.mrb[12].mxu1 %vm623_vm2, %v2344_v33 }
  0x3a   : > { %2188 = vmatpush3.bf16.msra.mxu1 %v2353_v53 }
  0x3b   : > { %2142 = vmatpush3.bf16.msra.mxu0 %v2322_v24  ;;  %2189 = vmatprep.subr.bf16.mxu1 %v2354_v56 }
  0x3e   : > { %2144 = vmatmul.mubr.bf16.vlgmr.msra.gmra.mrb[0].mxu0 %v2324_v27  ;;  %2190 = vmatpush3.bf16.msra.mxu1 %v2354_v56 }
  0x3f   : > { %2147 = vmatprep.mubr.bf16.mxu0 %v2325_v28  ;;  %2195 = vmatprep.subr.bf16.mxu1 %v2686_v59 }
  0x46   : > { %2148 = vmatmul.mubr.bf16.gmra.mrb[4].mxu0 %v2326_v31 }
  0x47   : > { %2151 = vmatprep.mubr.bf16.mxu0 %v2327_v32 }
  0x4e   : > { %2152 = vmatmul.mubr.bf16.gmra.mrb[8].mxu0 %v2328_v34 }
  0x4f   : > { %2155 = vmatprep.mubr.bf16.mxu0 %v2329_v35 }
  0x56   : > { %2156 = vmatmul.mubr.bf16.gmra.mrb[12].mxu0 %v2330_v36 }
  0x57   : > { %2159 = vmatprep.mubr.bf16.mxu0 %v2333_v37 }
  0x5e   : > { %2160 = vmatmul.mubr.bf16.gmra.mrb[16].mxu0 %v2334_v38 }
  0x5f   : > { %2163 = vmatprep.mubr.bf16.mxu0 %v2337_v39 }
  0x66   : > { %2164 = vmatmul.mubr.bf16.gmra.mrb[20].mxu0 %v2338_v40 }
  0x67   : > { %2167 = vmatprep.mubr.bf16.mxu0 %v2341_v41 }
  0x6e   : > { %2168 = vmatmul.mubr.bf16.gmra.mrb[24].mxu0 %v2342_v42 }
  0x6f   : > { %2171 = vmatprep.mubr.bf16.mxu0 %v2345_v43 }
  0x76   : > { %2172 = vmatmul.mubr.bf16.gmra.mrb[28].mxu0 %v2346_v44 }
  0xf4   : > { %v2665_v51 = vpop.f32.mrb[0].mxu1 }
  0xf5   : > { %v2667_v52 = vpop.f32.mrb[1].mxu1 }
  0xf6   : > { %v2672_v54 = vpop.f32.mrb[2].mxu1 }
  0xf7   : > { %v2674_v55 = vpop.f32.mrb[3].mxu1 }
  0xfc   : > { %v2679_v57 = vpop.f32.mrb[4].mxu1 }
  0xfd   : > { %v2681_v58 = vpop.f32.mrb[5].mxu1 }
  0xfe   : > { %v2693_v61 = vpop.f32.mrb[6].mxu1 }
  0xff   : > { %v2695_v62 = vpop.f32.mrb[7].mxu1 }
 0x104   : > { %v2702_v9 = vpop.f32.mrb[8].mxu1 }
 0x105   : > { %v2704_v12 = vpop.f32.mrb[9].mxu1 }
 0x106   : > { %v2706_v15 = vpop.f32.mrb[10].mxu1 }
 0x107   : > { %v2708_v18 = vpop.f32.mrb[11].mxu1 }
 0x10c   : > { %v2714_v39 = vpop.f32.mrb[12].mxu1 }
 0x10d   : > { %v2716_v44 = vpop.f32.mrb[13].mxu1 }
 0x10e   : > { %v2718_v49 = vpop.f32.mrb[14].mxu1 }
 0x111   : > { %v2145_v63 = vpop.f32.mrb[0].mxu0 }
 0x112   : > { %v1154_v0 = vadd.f32 %v2145_v63, %v2691_v60  ;;  %v1018_v1 = vpop.f32.mrb[1].mxu0 }
 0x113   : > { %v1152_v2 = vadd.f32 %v2691_v60, %v1018_v1  ;;  %v2146_v3 = vpop.f32.mrb[2].mxu0 }
 0x114   : > { %v1186_v4 = vmax.f32 %v1154_v0, 0.0  ;;  %v1155_v5 = vadd.f32 %v2146_v3, %v2691_v60  ;;  %v1021_v6 = vpop.f32.mrb[3].mxu0  ;;  %v2720_v0 = vpop.f32.mrb[15].mxu1 }
 0x115   : > { %v1184_v7 = vmax.f32 %v1152_v2, 0.0  ;;  %v1153_v8 = vadd.f32 %v2691_v60, %v1021_v6 }
 0x116   : > { %v1228_v10 = vrot.slane %v1186_v4, 4  ;;  %v1187_v11 = vmax.f32 %v1155_v5, 0.0 }
 0x117   : > { %v1216_v13 = vrot.slane %v1184_v7, 4  ;;  %v1185_v14 = vmax.f32 %v1153_v8, 0.0 }
 0x118   : > { %v1229_v16 = vmax.f32 %v1186_v4, %v1228_v10  ;;  %v1234_v17 = vrot.slane %v1187_v11, 4 }
 0x119   : > { %v1217_v19 = vmax.f32 %v1184_v7, %v1216_v13  ;;  %v1222_v20 = vrot.slane %v1185_v14, 4  ;;  %v2149_v21 = vpop.f32.mrb[4].mxu0 }
 0x11a   : > { %v1230_v22 = vrot.slane %v1229_v16, 2  ;;  %v1235_v23 = vmax.f32 %v1187_v11, %v1234_v17  ;;  %v1158_v24 = vadd.f32 %v2149_v21, %v2691_v60  ;;  %v1034_v25 = vpop.f32.mrb[5].mxu0 }
 0x11b   : > { %v1218_v26 = vrot.slane %v1217_v19, 2  ;;  %v1223_v27 = vmax.f32 %v1185_v14, %v1222_v20  ;;  %v1156_v28 = vadd.f32 %v2691_v60, %v1034_v25  ;;  %v2150_v29 = vpop.f32.mrb[6].mxu0 }
 0x11c   : > { %v1231_v30 = vmax.f32 %v1229_v16, %v1230_v22  ;;  %v1236_v31 = vrot.slane %v1235_v23, 2  ;;  %v1190_v32 = vmax.f32 %v1158_v24, 0.0  ;;  %v1159_v33 = vadd.f32 %v2150_v29, %v2691_v60  ;;  %v1037_v34 = vpop.f32.mrb[7].mxu0 }
 0x11d   : > { %v1219_v35 = vmax.f32 %v1217_v19, %v1218_v26  ;;  %v1224_v36 = vrot.slane %v1223_v27, 2  ;;  %v1188_v37 = vmax.f32 %v1156_v28, 0.0  ;;  %v1157_v38 = vadd.f32 %v2691_v60, %v1037_v34 }
 0x11e   : > { %v1232_v40 = vrot.slane %v1231_v30, 1  ;;  %v1237_v41 = vmax.f32 %v1235_v23, %v1236_v31  ;;  %v1252_v42 = vrot.slane %v1190_v32, 4  ;;  %v1191_v43 = vmax.f32 %v1159_v33, 0.0 }
 0x11f   : > { %v1220_v45 = vrot.slane %v1219_v35, 1  ;;  %v1225_v46 = vmax.f32 %v1223_v27, %v1224_v36  ;;  %v1240_v47 = vrot.slane %v1188_v37, 4  ;;  %v1189_v48 = vmax.f32 %v1157_v38, 0.0 }
 0x120   : > { %v1233_v50 = vmax.f32 %v1231_v30, %v1232_v40  ;;  %v1238_v53 = vrot.slane %v1237_v41, 1  ;;  %v1253_v56 = vmax.f32 %v1190_v32, %v1252_v42  ;;  %v1258_v63 = vrot.slane %v1191_v43, 4 }
 0x121   : > { %v1221_v1 = vmax.f32 %v1219_v35, %v1220_v45  ;;  %v1226_v2 = vrot.slane %v1225_v46, 1  ;;  %v1241_v3 = vmax.f32 %v1188_v37, %v1240_v47  ;;  %v1246_v4 = vrot.slane %v1189_v48, 4  ;;  %v2153_v5 = vpop.f32.mrb[8].mxu0 }
 0x122   : > { %v1410_v6 = vpack.c.bf16 %v1233_v50, %v1233_v50  ;;  %v1254_v7 = vrot.slane %v1253_v56, 2  ;;  %v1259_v8 = vmax.f32 %v1191_v43, %v1258_v63  ;;  %v1050_v10 = vpop.f32.mrb[9].mxu0  ;;  %v1239_v19 = vmax.f32 %v1237_v41, %v1238_v53 }
 0x123   : > { %v1408_v11 = vpack.c.bf16 %v1221_v1, %v1221_v1  ;;  %v1227_v13 = vmax.f32 %v1225_v46, %v1226_v2  ;;  %v1242_v14 = vrot.slane %v1241_v3, 2  ;;  %v1247_v16 = vmax.f32 %v1189_v48, %v1246_v4  ;;  %v2154_v17 = vpop.f32.mrb[10].mxu0 }
 0x124   : > { %v1255_v20 = vmax.f32 %v1253_v56, %v1254_v7  ;;  %v1260_v21 = vrot.slane %v1259_v8, 2  ;;  %v1053_v22 = vpop.f32.mrb[11].mxu0  ;;  %v1497_v23 = vunpack.c.l.b16 %v1410_v6  ;;  %v1162_v30 = vadd.f32 %v2153_v5, %v2691_v60 }
 0x125   : > { %v1409_v24 = vpack.c.bf16 %v1227_v13, %v1227_v13  ;;  %v1243_v25 = vmax.f32 %v1241_v3, %v1242_v14  ;;  %v1248_v26 = vrot.slane %v1247_v16, 2  ;;  %v1495_v27 = vunpack.c.l.b16 %v1408_v11 }
 0x126   : > { %v1256_v28 = vrot.slane %v1255_v20, 1  ;;  %v1261_v29 = vmax.f32 %v1259_v8, %v1260_v21  ;;  %v1160_v34 = vadd.f32 %v2691_v60, %v1050_v10  ;;  %v1411_v35 = vpack.c.bf16 %v1239_v19, %v1239_v19 }
 0x127   : > { %v1496_v31 = vunpack.c.l.b16 %v1409_v24  ;;  %v1244_v32 = vrot.slane %v1243_v25, 1  ;;  %v1249_v33 = vmax.f32 %v1247_v16, %v1248_v26  ;;  %v1194_v37 = vmax.f32 %v1162_v30, 0.0 }
 0x128   : > { %v1257_v36 = vmax.f32 %v1255_v20, %v1256_v28  ;;  %v1163_v38 = vadd.f32 %v2154_v17, %v2691_v60  ;;  %v1262_v42 = vrot.slane %v1261_v29, 1  ;;  %v1192_v43 = vmax.f32 %v1160_v34, 0.0 }
 0x129   : > { %v1528_v40 = vsel %vm1527_vm3, %v1496_v31, %v1495_v27  ;;  %v1245_v41 = vmax.f32 %v1243_v25, %v1244_v32  ;;  %v2157_v45 = vpop.f32.mrb[12].mxu0  ;;  %v1250_v47 = vrot.slane %v1249_v33, 1  ;;  %v1276_v48 = vrot.slane %v1194_v37, 4 }
 0x12a   : > { %v2727_v46 = vsel %vm1529_vm4, %v1497_v23, %v1528_v40  ;;  %v1066_v50 = vpop.f32.mrb[13].mxu0  ;;  %v1414_v53 = vpack.c.bf16 %v1257_v36, %v1257_v36  ;;  %v1264_v56 = vrot.slane %v1192_v43, 4  ;;  %v1195_v63 = vmax.f32 %v1163_v38, 0.0 }
 0x12b   : > { %v2158_v1 = vpop.f32.mrb[14].mxu0  ;;  %v2729_v2 = vunpack.c.l.b16 %v1411_v35  ;;  %v1277_v3 = vmax.f32 %v1194_v37, %v1276_v48  ;;  %v1161_v4 = vadd.f32 %v2691_v60, %v1053_v22  ;;  %v1412_v6 = vpack.c.bf16 %v1245_v41, %v1245_v41 }
 0x12c   : > { %v1069_v5 = vpop.f32.mrb[15].mxu0  ;;  %v1263_v7 = vmax.f32 %v1261_v29, %v1262_v42  ;;  %v1265_v8 = vmax.f32 %v1192_v43, %v1264_v56  ;;  %v1282_v10 = vrot.slane %v1195_v63, 4  ;;  %v2732_v11 = vmax.f32 %v1249_v33, %v1250_v47 }
 0x12d   : > { %v1278_v13 = vrot.slane %v1277_v3, 2  ;;  %v1193_v14 = vmax.f32 %v1161_v4, 0.0  ;;  %v1166_v16 = vadd.f32 %v2157_v45, %v2691_v60  ;;  %v2735_v17 = vunpack.c.l.b16 %v1414_v53 }
 0x12e   : > { %v1266_v19 = vrot.slane %v1265_v8, 2  ;;  %v1283_v20 = vmax.f32 %v1195_v63, %v1282_v10  ;;  %v1164_v21 = vadd.f32 %v2691_v60, %v1066_v50  ;;  %v1167_v25 = vadd.f32 %v2158_v1, %v2691_v60 }
 0x12f   : > { %v1279_v23 = vmax.f32 %v1277_v3, %v1278_v13  ;;  %v1270_v24 = vrot.slane %v1193_v14, 4  ;;  %v1198_v22 = vmax.f32 %v1166_v16, 0.0  ;;  %v1165_v29 = vadd.f32 %v2691_v60, %v1069_v5 }
 0x130   : > { %v1267_v26 = vmax.f32 %v1265_v8, %v1266_v19  ;;  %v1284_v27 = vrot.slane %v1283_v20, 2  ;;  %v1196_v28 = vmax.f32 %v1164_v21, 0.0  ;;  %v1199_v34 = vmax.f32 %v1167_v25, 0.0 }
 0x131   : > { %v2161_v30 = vpop.f32.mrb[16].mxu0  ;;  %v1280_v31 = vrot.slane %v1279_v23, 1  ;;  %v1271_v32 = vmax.f32 %v1193_v14, %v1270_v24  ;;  %v1300_v33 = vrot.slane %v1198_v22, 4  ;;  %v1197_v40 = vmax.f32 %v1165_v29, 0.0 }
 0x132   : > { %v1082_v35 = vpop.f32.mrb[17].mxu0  ;;  %v1268_v36 = vrot.slane %v1267_v26, 1  ;;  %v1285_v37 = vmax.f32 %v1283_v20, %v1284_v27  ;;  %v1288_v38 = vrot.slane %v1196_v28, 4  ;;  %v1415_v42 = vpack.c.bf16 %v1263_v7, %v1263_v7 }
 0x133   : > { %v2162_v41 = vpop.f32.mrb[18].mxu0  ;;  %v1272_v43 = vrot.slane %v1271_v32, 2  ;;  %v1301_v45 = vmax.f32 %v1198_v22, %v1300_v33  ;;  %v1306_v47 = vrot.slane %v1199_v34, 4  ;;  %v1294_v63 = vrot.slane %v1197_v40, 4 }
 0x134   : > { %v1085_v48 = vpop.f32.mrb[19].mxu0  ;;  %v1269_v50 = vmax.f32 %v1267_v26, %v1268_v36  ;;  %v1286_v53 = vrot.slane %v1285_v37, 1  ;;  %v1289_v56 = vmax.f32 %v1196_v28, %v1288_v38  ;;  %v2740_v1 = vunpack.c.l.b16 %v1412_v6 }
 0x135   : > { %v1273_v3 = vmax.f32 %v1271_v32, %v1272_v43  ;;  %v1302_v4 = vrot.slane %v1301_v45, 2  ;;  %v1307_v5 = vmax.f32 %v1199_v34, %v1306_v47  ;;  %v1413_v8 = vpack.c.bf16 %v2732_v11, %v2732_v11 }
 0x136   : > { %v1281_v10 = vmax.f32 %v1279_v23, %v1280_v31  ;;  %v1290_v13 = vrot.slane %v1289_v56, 2  ;;  %v1295_v14 = vmax.f32 %v1197_v40, %v1294_v63  ;;  %v1287_v7 = vmax.f32 %v1285_v37, %v1286_v53 }
 0x137   : > { %v1274_v16 = vrot.slane %v1273_v3, 1  ;;  %v1303_v19 = vmax.f32 %v1301_v45, %v1302_v4  ;;  %v1308_v20 = vrot.slane %v1307_v5, 2  ;;  %v2744_v21 = vunpack.c.l.b16 %v1415_v42 }
 0x138   : > { %v1416_v24 = vpack.c.bf16 %v1269_v50, %v1269_v50  ;;  %v1291_v22 = vmax.f32 %v1289_v56, %v1290_v13  ;;  %v1296_v25 = vrot.slane %v1295_v14, 2  ;;  %v1091_v29 = vadd.f32 %v2161_v30, %v2665_v51 }
 0x139   : > { %v2165_v6 = vpop.f32.mrb[20].mxu0  ;;  %v1275_v26 = vmax.f32 %v1273_v3, %v1274_v16  ;;  %v1304_v27 = vrot.slane %v1303_v19, 1  ;;  %v1309_v28 = vmax.f32 %v1307_v5, %v1308_v20  ;;  %v1418_v11 = vpack.c.bf16 %v1281_v10, %v1281_v10 }
 0x13a   : > { %v1098_v32 = vpop.f32.mrb[21].mxu0  ;;  %v1292_v23 = vrot.slane %v1291_v22, 1  ;;  %v1297_v31 = vmax.f32 %v1295_v14, %v1296_v25  ;;  %v1083_v33 = vadd.f32 %v1082_v35, %v2667_v52  ;;  %v1419_v36 = vpack.c.bf16 %v1287_v7, %v1287_v7 }
 0x13b   : > { %v2166_v34 = vpop.f32.mrb[22].mxu0  ;;  %v1417_v37 = vpack.c.bf16 %v1275_v26, %v1275_v26  ;;  %v1305_v38 = vmax.f32 %v1303_v19, %v1304_v27  ;;  %v1170_v40 = vadd.f32 %v2691_v60, %v1091_v29  ;;  %v1310_v45 = vrot.slane %v1309_v28, 1 }
 0x13c   : > { %v1101_v42 = vpop.f32.mrb[23].mxu0  ;;  %v1293_v43 = vmax.f32 %v1291_v22, %v1292_v23  ;;  %v1168_v47 = vadd.f32 %v2691_v60, %v1083_v33  ;;  %v1094_v50 = vadd.f32 %v2162_v41, %v2672_v54  ;;  %v1503_v51 = vunpack.c.l.b16 %v1416_v24 }
 0x13d   : > { %v1504_v30 = vunpack.c.l.b16 %v1417_v37  ;;  %v1298_v53 = vrot.slane %v1297_v31, 1  ;;  %v1202_v56 = vmax.f32 %v1170_v40, 0.0  ;;  %v1505_v63 = vunpack.c.l.b16 %v1418_v11 }
 0x13e   : > { %v1422_v3 = vpack.c.bf16 %v1305_v38, %v1305_v38  ;;  %v1200_v52 = vmax.f32 %v1168_v47, 0.0  ;;  %v1171_v35 = vadd.f32 %v2691_v60, %v1094_v50  ;;  %v2752_v4 = vunpack.c.l.b16 %v1413_v8 }
 0x13f   : > { %v2754_v5 = vunpack.c.l.b16 %v1419_v36  ;;  %v1541_v10 = vsel %vm1527_vm3, %v1504_v30, %v1503_v51  ;;  %v1324_v13 = vrot.slane %v1202_v56, 4  ;;  %v1420_v54 = vpack.c.bf16 %v1293_v43, %v1293_v43 }
 0x140   : > { %v2758_v14 = vsel %vm1529_vm4, %v1505_v63, %v1541_v10  ;;  %v1311_v41 = vmax.f32 %v1309_v28, %v1310_v45  ;;  %v1312_v7 = vrot.slane %v1200_v52, 4  ;;  %v2762_v19 = vmax.f32 %v1297_v31, %v1298_v53 }
 0x141   : > { %v2760_v16 = vpop.f32.mrb[24].mxu0  ;;  %v1325_v20 = vmax.f32 %v1202_v56, %v1324_v13  ;;  %v1203_v24 = vmax.f32 %v1171_v35, 0.0  ;;  %v1086_v8 = vadd.f32 %v1085_v48, %v2674_v55  ;;  %v2767_v25 = vunpack.c.l.b16 %v1422_v3 }
 0x142   : > { %v2765_v22 = vpop.f32.mrb[25].mxu0  ;;  %v1313_v26 = vmax.f32 %v1200_v52, %v1312_v7  ;;  %v1107_v27 = vadd.f32 %v2165_v6, %v2679_v57  ;;  %v1099_v29 = vadd.f32 %v1098_v32, %v2681_v58  ;;  %v1110_v33 = vadd.f32 %v2166_v34, %v2693_v61 }
 0x143   : > { %v2771_v11 = vpop.f32.mrb[26].mxu0  ;;  %v1326_v28 = vrot.slane %v1325_v20, 2  ;;  %v1330_v23 = vrot.slane %v1203_v24, 4  ;;  %v1169_v31 = vadd.f32 %v2691_v60, %v1086_v8  ;;  %v1102_v38 = vadd.f32 %v1101_v42, %v2695_v62 }
 0x144   : > { %v2775_v36 = vpop.f32.mrb[27].mxu0  ;;  %v1314_v55 = vrot.slane %v1313_v26, 2  ;;  %v1174_v48 = vadd.f32 %v2691_v60, %v1107_v27  ;;  %v1172_v37 = vadd.f32 %v2691_v60, %v1099_v29  ;;  %v1175_v32 = vadd.f32 %v2691_v60, %v1110_v33 }
 0x145   : > { %v1327_v57 = vmax.f32 %v1325_v20, %v1326_v28  ;;  %v1331_v6 = vmax.f32 %v1203_v24, %v1330_v23  ;;  %v1201_v58 = vmax.f32 %v1169_v31, 0.0  ;;  %v1173_v47 = vadd.f32 %v2691_v60, %v1102_v38 }
 0x146   : > { %v1315_v40 = vmax.f32 %v1313_v26, %v1314_v55  ;;  %v1206_v43 = vmax.f32 %v1174_v48, 0.0  ;;  %v1204_v45 = vmax.f32 %v1172_v37, 0.0  ;;  %v1207_v51 = vmax.f32 %v1175_v32, 0.0 }
 0x147   : > { %v1328_v61 = vrot.slane %v1327_v57, 1  ;;  %v1332_v34 = vrot.slane %v1331_v6, 2  ;;  %v1318_v50 = vrot.slane %v1201_v58, 4  ;;  %v1423_v30 = vpack.c.bf16 %v1311_v41, %v1311_v41 }
 0x148   : > { %v1348_v53 = vrot.slane %v1206_v43, 4  ;;  %v1336_v56 = vrot.slane %v1204_v45, 4  ;;  %v1205_v63 = vmax.f32 %v1173_v47, 0.0  ;;  %v1316_v62 = vrot.slane %v1315_v40, 1 }
 0x149   : > { %v2782_v3 = vpop.f32.mrb[28].mxu0  ;;  %v1333_v42 = vmax.f32 %v1331_v6, %v1332_v34  ;;  %v1319_v52 = vmax.f32 %v1201_v58, %v1318_v50  ;;  %v1354_v35 = vrot.slane %v1207_v51, 4  ;;  %v2786_v13 = vunpack.c.l.b16 %v1420_v54 }
 0x14a   : > { %v2784_v10 = vpop.f32.mrb[29].mxu0  ;;  %v1349_v7 = vmax.f32 %v1206_v43, %v1348_v53  ;;  %v1337_v20 = vmax.f32 %v1204_v45, %v1336_v56  ;;  %v1342_v24 = vrot.slane %v1205_v63, 4  ;;  %v1329_v26 = vmax.f32 %v1327_v57, %v1328_v61 }
 0x14b   : > { %v2788_v8 = vpop.f32.mrb[30].mxu0  ;;  %v1334_v41 = vrot.slane %v1333_v42, 1  ;;  %v1320_v27 = vrot.slane %v1319_v52, 2  ;;  %v1355_v29 = vmax.f32 %v1207_v51, %v1354_v35  ;;  %v1421_v23 = vpack.c.bf16 %v2762_v19, %v2762_v19 }
 0x14c   : > { %v2790_v28 = vpop.f32.mrb[31].mxu0  ;;  %v1350_v31 = vrot.slane %v1349_v7, 2  ;;  %v1338_v33 = vrot.slane %v1337_v20, 2  ;;  %v1343_v55 = vmax.f32 %v1205_v63, %v1342_v24  ;;  %v2794_v48 = vunpack.c.l.b16 %v1423_v30 }
 0x14d   : > { %v1317_v54 = vmax.f32 %v1315_v40, %v1316_v62  ;;  %v1321_v37 = vmax.f32 %v1319_v52, %v1320_v27  ;;  %v1356_v38 = vrot.slane %v1355_v29, 2  ;;  %v1335_v6 = vmax.f32 %v1333_v42, %v1334_v41 }
 0x14e   : > { %v1351_v58 = vmax.f32 %v1349_v7, %v1350_v31  ;;  %v1339_v32 = vmax.f32 %v1337_v20, %v1338_v33  ;;  %v1344_v57 = vrot.slane %v1343_v55, 2  ;;  %v1426_v43 = vpack.c.bf16 %v1329_v26, %v1329_v26 }
 0x14f   : > { %v1322_v45 = vrot.slane %v1321_v37, 1  ;;  %v1357_v47 = vmax.f32 %v1355_v29, %v1356_v38  ;;  %v1123_v19 = vadd.f32 %v2760_v16, %v2702_v9  ;;  %v1115_v40 = vadd.f32 %v2765_v22, %v2704_v12 }
 0x150   : > { %v1352_v61 = vrot.slane %v1351_v58, 1  ;;  %v1340_v34 = vrot.slane %v1339_v32, 1  ;;  %v1345_v50 = vmax.f32 %v1343_v55, %v1344_v57  ;;  %v1508_v51 = vunpack.c.l.b16 %v1421_v23 }
 0x151   : > { %v1424_v30 = vpack.c.bf16 %v1317_v54, %v1317_v54  ;;  %v1323_v53 = vmax.f32 %v1321_v37, %v1322_v45  ;;  %v1178_v56 = vadd.f32 %v2691_v60, %v1123_v19  ;;  %v1427_v63 = vpack.c.bf16 %v1335_v6, %v1335_v6 }
 0x152   : > { %v1341_v62 = vmax.f32 %v1339_v32, %v1340_v34  ;;  %v1358_v42 = vrot.slane %v1357_v47, 1  ;;  %v1176_v52 = vadd.f32 %v2691_v60, %v1115_v40  ;;  %v1353_v16 = vmax.f32 %v1351_v58, %v1352_v61 }
 0x153   : > { %v1425_v9 = vpack.c.bf16 %v1323_v53, %v1323_v53  ;;  %v1210_v35 = vmax.f32 %v1178_v56, 0.0  ;;  %v1126_v7 = vadd.f32 %v2771_v11, %v2706_v15  ;;  %v1513_v12 = vunpack.c.l.b16 %v1426_v43 }
 0x154   : > { %v1428_v22 = vpack.c.bf16 %v1341_v62, %v1341_v62  ;;  %v1346_v20 = vrot.slane %v1345_v50, 1  ;;  %v1208_v24 = vmax.f32 %v1176_v52, 0.0  ;;  %v1511_v26 = vunpack.c.l.b16 %v1424_v30 }
 0x155   : > { %v1512_v41 = vunpack.c.l.b16 %v1425_v9  ;;  %v1372_v27 = vrot.slane %v1210_v35, 4  ;;  %v1179_v29 = vadd.f32 %v2691_v60, %v1126_v7  ;;  %v1514_v23 = vunpack.c.l.b16 %v1427_v63 }
 0x156   : > { %v1515_v31 = vunpack.c.l.b16 %v1428_v22  ;;  %v1359_v33 = vmax.f32 %v1357_v47, %v1358_v42  ;;  %v1360_v55 = vrot.slane %v1208_v24, 4  ;;  %v1430_v37 = vpack.c.bf16 %v1353_v16, %v1353_v16 }
 0x157   : > { %v1548_v54 = vsel %vm1527_vm3, %v1512_v41, %v1511_v26  ;;  %v1373_v38 = vmax.f32 %v1210_v35, %v1372_v27  ;;  %v1211_v6 = vmax.f32 %v1179_v29, 0.0  ;;  %v1347_v11 = vmax.f32 %v1345_v50, %v1346_v20 }
 0x158   : > { %v1549_v15 = vsel %vm1529_vm4, %v1513_v12, %v1548_v54  ;;  %v1361_v58 = vmax.f32 %v1208_v24, %v1360_v55  ;;  %v1118_v32 = vadd.f32 %v2775_v36, %v2708_v18  ;;  %v1532_v47 = vsel %vm1531_vm5, %v2729_v2, %v2727_v46 }
 0x159   : > { %v1550_v57 = vsel %vm1531_vm5, %v1514_v23, %v1549_v15  ;;  %v1374_v43 = vrot.slane %v1373_v38, 2  ;;  %v1378_v45 = vrot.slane %v1211_v6, 4  ;;  %v1534_v50 = vsel %vm1533_vm6, %v2740_v1, %v1532_v47 }
 0x15a   : > { %v1551_v19 = vsel %vm1533_vm6, %v1515_v31, %v1550_v57  ;;  %v1362_v61 = vrot.slane %v1361_v58, 2  ;;  %v1177_v34 = vadd.f32 %v2691_v60, %v1118_v32  ;;  %v1536_v18 = vsel %vm1535_vm7, %v2752_v4, %v1534_v50 }
 0x15b   : > { %v1375_v40 = vmax.f32 %v1373_v38, %v1374_v43  ;;  %v1379_v30 = vmax.f32 %v1211_v6, %v1378_v45  ;;  %v1543_v36 = vsel %vm1531_vm5, %v2754_v5, %v2758_v14  ;;  %v1538_v46 = vsel %vm1537_vm8, %v2735_v17, %v1536_v18 }
 0x15c   : > { %v1363_v53 = vmax.f32 %v1361_v58, %v1362_v61  ;;  %v1209_v56 = vmax.f32 %v1177_v34, 0.0  ;;  %v1544_v2 = vsel %vm1533_vm6, %v2786_v13, %v1543_v36  ;;  %v1429_v63 = vpack.c.bf16 %v1347_v11, %v1347_v11 }
 0x15d   : > { %v1380_v62 = vrot.slane %v1379_v30, 2  ;;  %v1540_v1 = vsel %vm1539_vm9, %v2744_v21, %v1538_v46  ;;  %v1545_v42 = vsel %vm1535_vm7, %v1508_v51, %v1544_v2  ;;  %v1431_v4 = vpack.c.bf16 %v1359_v33, %v1359_v33 }
 0x15e   : > { %v1366_v52 = vrot.slane %v1209_v56, 4  ;;  %v1546_v5 = vsel %vm1537_vm8, %v2767_v25, %v1545_v42  ;;  %v1139_v14 = vadd.f32 %v2782_v3, %v2714_v39  ;;  %v1376_v9 = vrot.slane %v1375_v40, 1 }
 0x15f   : > { %v1381_v17 = vmax.f32 %v1379_v30, %v1380_v62  ;;  %v1547_v13 = vsel %vm1539_vm9, %v2794_v48, %v1546_v5  ;;  %v1131_v16 = vadd.f32 %v2784_v10, %v2716_v44  ;;  %v1364_v35 = vrot.slane %v1363_v53, 1 }
 0x160   : > { %v1367_v21 = vmax.f32 %v1209_v56, %v1366_v52  ;;  %v1562_v7 = vpack.c.b16 %v1547_v13, %v1540_v1  ;;  %v1182_v51 = vadd.f32 %v2691_v60, %v1139_v14  ;;  %v1516_v12 = vunpack.c.l.b16 %v1429_v63 }
 0x161   : > { %v1382_v22 = vrot.slane %v1381_v17, 1  ;;  %v1180_v25 = vadd.f32 %v2691_v60, %v1131_v16  ;;  %v1142_v39 = vadd.f32 %v2788_v8, %v2718_v49  ;;  %v1517_v3 = vunpack.c.l.b16 %v1430_v37 }
 0x162   : > { %v1368_v20 = vrot.slane %v1367_v21, 2  ;;  %2191 = vmatprep.mubr.bf16.mxu1 %v1562_v7  ;;  %v1214_v24 = vmax.f32 %v1182_v51, 0.0  ;;  %v1134_v48 = vadd.f32 %v2790_v28, %v2720_v0  ;;  %v1518_v44 = vunpack.c.l.b16 %v1431_v4 }
 0x163   : > { %v1377_v10 = vmax.f32 %v1375_v40, %v1376_v9  ;;  %v1212_v26 = vmax.f32 %v1180_v25, 0.0  ;;  %v1183_v41 = vadd.f32 %v2691_v60, %v1142_v39  ;;  %v1365_v27 = vmax.f32 %v1363_v53, %v1364_v35 }
 0x164   : > { %v1369_v29 = vmax.f32 %v1367_v21, %v1368_v20  ;;  %v1396_v23 = vrot.slane %v1214_v24, 4  ;;  %v1181_v31 = vadd.f32 %v2691_v60, %v1134_v48  ;;  %v1383_v33 = vmax.f32 %v1381_v17, %v1382_v22 }
 0x165   : > { %v1384_v55 = vrot.slane %v1212_v26, 4  ;;  %v1215_v49 = vmax.f32 %v1183_v41, 0.0  ;;  %v1552_v8 = vsel %vm1535_vm7, %v1516_v12, %v1551_v19  ;;  %v1432_v11 = vpack.c.bf16 %v1365_v27, %v1365_v27  ;;  %v2359_v41 = vld [vmem:[%s2954_s8 + $0x20] sm:$0xff]   ;;  %v2361_v27 = vld [vmem:[%s2954_s8 + $0x30] sm:$0xff]  }
 0x166   : > { %v1370_v54 = vrot.slane %v1369_v29, 1  ;;  %v1397_v37 = vmax.f32 %v1214_v24, %v1396_v23  ;;  %v1213_v38 = vmax.f32 %v1181_v31, 0.0  ;;  %v1553_v0 = vsel %vm1537_vm8, %v1517_v3, %v1552_v8  ;;  %v2005_v23 = vld [vmem:[%s2953_s7] ss:$0 sm:$0xff] }
 0x167   : > { %v1385_v28 = vmax.f32 %v1212_v26, %v1384_v55  ;;  %v1402_v6 = vrot.slane %v1215_v49, 4  ;;  %v1554_v15 = vsel %vm1539_vm9, %v1518_v44, %v1553_v0  ;;  %v1434_v43 = vpack.c.bf16 %v1377_v10, %v1377_v10  ;;  %v2356_v44 = vld [vmem:[%s2954_s8 + $0x8] sm:$0xff]   ;;  %v2357_v10 = vld [vmem:[%s2954_s8 + $0x10] sm:$0xff]   ;;  %v2358_v26 = vld [vmem:[%s2954_s8 + $0x18] sm:$0xff]  }
 0x168   : > { %v1371_v58 = vmax.f32 %v1369_v29, %v1370_v54  ;;  %v1398_v32 = vrot.slane %v1397_v37, 2  ;;  %v1390_v57 = vrot.slane %v1213_v38, 4  ;;  %v1435_v47 = vpack.c.bf16 %v1383_v33, %v1383_v33  ;;  %v2362_v29 = vld [vmem:[%s2954_s8 + $0x38] sm:$0xff]  }
 0x169   : > { %v1386_v60 = vrot.slane %v1385_v28, 2  ;;  %v1403_v45 = vmax.f32 %v1215_v49, %v1402_v6  ;;  %v1519_v30 = vunpack.c.l.b16 %v1432_v11  ;;  %v1521_v56 = vunpack.c.l.b16 %v1434_v43  ;;  %v1791_v43 = vld [vmem:[%s458_s19 + $0x10] sm:$0xff] }
 0x16a   : > { %v1433_v61 = vpack.c.bf16 %v1371_v58, %v1371_v58  ;;  %v1399_v34 = vmax.f32 %v1397_v37, %v1398_v32  ;;  %v1391_v19 = vmax.f32 %v1213_v38, %v1390_v57  ;;  %v1522_v63 = vunpack.c.l.b16 %v1435_v47  ;;  %v2014_v32 = vld [vmem:[%s2955_s9] ss:$0 sm:$0xff] }
 0x16b   : > { %v1387_v50 = vmax.f32 %v1385_v28, %v1386_v60  ;;  %v1404_v40 = vrot.slane %v1403_v45, 2  ;;  %v1789_v47 = vld [vmem:[%s458_s19] sm:$0xff] }
 0x16c   : > { %v1520_v18 = vunpack.c.l.b16 %v1433_v61  ;;  %v1400_v36 = vrot.slane %v1399_v34, 1  ;;  %v1392_v53 = vrot.slane %v1391_v19, 2 }
 0x16d   : > { %v1388_v46 = vrot.slane %v1387_v50, 1  ;;  %v1405_v2 = vmax.f32 %v1403_v45, %v1404_v40 }
 0x16e   : > { %v1555_v62 = vsel %vm1527_vm3, %v1520_v18, %v1519_v30  ;;  %v1393_v1 = vmax.f32 %v1391_v19, %v1392_v53  ;;  %v1401_v4 = vmax.f32 %v1399_v34, %v1400_v36  ;;  %v1792_v19 = vld [vmem:[%s458_s19 + $0x18] sm:$0xff]  ;;  %v1790_v18 = vld [vmem:[%s458_s19 + $0x8] sm:$0xff]  ;;  %s2896_s19 = scalar_lea.hbm %s2956_s10, %s2031_s22 }
 0x16f   : > { %v1556_v42 = vsel %vm1529_vm4, %v1521_v56, %v1555_v62  ;;  %v1389_v52 = vmax.f32 %v1387_v50, %v1388_v46  ;;  %v1406_v5 = vrot.slane %v1405_v2, 1 }
 0x170   : > { %v1557_v14 = vsel %vm1531_vm5, %v1522_v63, %v1556_v42  ;;  %v1394_v9 = vrot.slane %v1393_v1, 1  ;;  %v1438_v35 = vpack.c.bf16 %v1401_v4, %v1401_v4 }
 0x171   : > { %v1436_v17 = vpack.c.bf16 %v1389_v52, %v1389_v52  ;;  %v1407_v13 = vmax.f32 %v1405_v2, %v1406_v5 }
 0x172   : > { %v1395_v16 = vmax.f32 %v1393_v1, %v1394_v9  ;;  %v1525_v25 = vunpack.c.l.b16 %v1438_v35 }
 0x173   : > { %v1523_v21 = vunpack.c.l.b16 %v1436_v17  ;;  %v1439_v7 = vpack.c.bf16 %v1407_v13, %v1407_v13 }
 0x174   : > { %v1437_v51 = vpack.c.bf16 %v1395_v16, %v1395_v16 }
 0x175   : > { %v1558_v12 = vsel %vm1533_vm6, %v1523_v21, %v1557_v14  ;;  %v1526_v39 = vunpack.c.l.b16 %v1439_v7 }
 0x176   : > { %v1524_v22 = vunpack.c.l.b16 %v1437_v51 }
 0x178   : > { %v1559_v3 = vsel %vm1535_vm7, %v1524_v22, %v1558_v12 }
 0x179   : > { %v1560_v20 = vsel %vm1537_vm8, %v1525_v25, %v1559_v3 }
 0x17a   : > { %v1561_v24 = vsel %vm1539_vm9, %v1526_v39, %v1560_v20 }
 0x17b   : > { %v1563_v48 = vpack.c.b16 %v1561_v24, %v1554_v15 }
 0x17d   : > { %2192 = vmatmul.mubr.bf16.vlgmr.msra.gmra.mrb[16].mxu1 %v1563_v48 }
 0x17e   : > { %2196 = vmatpush3.bf16.msra.mxu1 %v2686_v59  ;;  %v2360_v59 = vld [vmem:[%s2954_s8 + $0x28] sm:$0xff]  }
 0x17f   : > { %2197 = vmatprep.subr.bf16.mxu1 %v2356_v44 }
 0x182   : > { %2198 = vmatpush3.bf16.msra.mxu1 %v2356_v44 }
 0x183   : > { %2199 = vmatprep.subr.bf16.mxu1 %v2357_v10 }
 0x186   : > { %2200 = vmatpush3.bf16.msra.mxu1 %v2357_v10 }
 0x187   : > { %2201 = vmatprep.subr.bf16.mxu1 %v2358_v26 }
 0x18a   : > { %2202 = vmatpush3.bf16.msra.mxu1 %v2358_v26 }
 0x18b   : > { %2203 = vmatprep.subr.bf16.mxu1 %v2359_v41 }
 0x18e   : > { %2204 = vmatpush3.bf16.msra.mxu1 %v2359_v41 }
 0x18f   : > { %2205 = vmatprep.subr.bf16.mxu1 %v2360_v59 }
 0x192   : > { %2206 = vmatpush3.bf16.msra.mxu1 %v2360_v59 }
 0x193   : > { %2207 = vmatprep.subr.bf16.mxu1 %v2361_v27 }
 0x196   : > { %2208 = vmatpush3.bf16.msra.mxu1 %v2361_v27 }
 0x197   : > { %2209 = vmatprep.subr.bf16.mxu1 %v2362_v29 }
 0x19a   : > { %2210 = vmatpush3.bf16.msra.mxu1 %v2362_v29 }
 0x250   : > { %v2193_v31 = vpop.f32.mrb[16].mxu1 }
 0x251   : > { %v1657_v33 = vadd.f32 %v2193_v31, %v2005_v23  ;;  %v1648_v55 = vpop.f32.mrb[17].mxu1 }
 0x252   : > { %v1649_v49 = vadd.f32 %v2005_v23, %v1648_v55  ;;  %v2194_v8 = vpop.f32.mrb[18].mxu1 }
 0x253   : > { %v1660_v54 = vadd.f32 %v2194_v8, %v2005_v23  ;;  %v1651_v37 = vpop.f32.mrb[19].mxu1  ;;  %v1665_v0 = vmax.f32 %v1657_v33, 0.0 }
 0x254   : > { %v1652_v38 = vadd.f32 %v2005_v23, %v1651_v37  ;;  %v1663_v6 = vmax.f32 %v1649_v49, 0.0 }
 0x255   : > { %v1666_v28 = vmax.f32 %v1660_v54, 0.0 }
 0x256   : > { %v1664_v15 = vmax.f32 %v1652_v38, 0.0 }
 0x257   : > { %v1668_v11 = vpack.c.bf16 %v1666_v28, %v1665_v0 }
 0x258   : > { %v1667_v58 = vpack.c.bf16 %v1664_v15, %v1663_v6 }
 0x25a   : > { %2211 = vmatprep.mubr.bf16.mxu1 %v1667_v58 }
 0x25b   : > { %2212 = vmatmul.mubr.bf16.vlgmr.msra.gmra.mrb[20].mxu1 %v1668_v11 }
 0x32e   : > { %v2213_v57 = vpop.f32.mrb[20].mxu1 }
 0x32f   : > { %v1783_v60 = vadd.f32 %v2213_v57, %v2014_v32  ;;  %v1774_v45 = vpop.f32.mrb[21].mxu1 }
 0x330   : > { %v1775_v61 = vadd.f32 %v2014_v32, %v1774_v45  ;;  %v2214_v34 = vpop.f32.mrb[22].mxu1 }
 0x331   : > { %v1795_v50 = vadd.f32 %v1791_v43, %v1783_v60  ;;  %v1786_v40 = vadd.f32 %v2214_v34, %v2014_v32  ;;  %v1777_v30 = vpop.f32.mrb[23].mxu1 }
 0x332   : > { %v1793_v36 = vadd.f32 %v1789_v47, %v1775_v61  ;;  %v1778_v53 = vadd.f32 %v2014_v32, %v1777_v30 }
 0x333   : > { %v1799_v56 = vmax.f32 %v1795_v50, 0.0  ;;  %v1796_v46 = vadd.f32 %v1792_v19, %v1786_v40 }
 0x334   : > { %v1797_v2 = vmax.f32 %v1793_v36, 0.0  ;;  %v1794_v63 = vadd.f32 %v1790_v18, %v1778_v53 }
 0x335   : > { %1803 = vst [vmem:[%s429_s29 + $0x10] sm:$0xff] %v1799_v56  ;;  %v1800_v62 = vmax.f32 %v1796_v46, 0.0 }
 0x336   : > { %1801 = vst [vmem:[%s429_s29] sm:$0xff] %v1797_v2  ;;  %v1798_v1 = vmax.f32 %v1794_v63, 0.0 }
 0x337   : > { %1804 = vst [vmem:[%s429_s29 + $0x18] sm:$0xff] %v1800_v62 }
 0x338   : > { %1802 = vst [vmem:[%s429_s29 + $0x8] sm:$0xff] %v1798_v1 }
 0x339   : > { %2376 = shalt.err (!%p2373_p5)
}
 0x33a   : > { %s2377_s30 = scalar_lea.hbm %s2896_s19, 512  ;;  %s2381_s12 = scalar_lea.hbm %s2956_s10, 1024 }
 0x33b   : > { %p2378_p6 = scmp.ne.s32.totalorder %s2896_s19, %s2377_s30  ;;  %p2382_p10 = scmp.lt.u32.totalorder %s2896_s19, %s2956_s10 }
 0x33c   : > { %p2383_p11 = scmp.lt.u32.totalorder %s2381_s12, %s2377_s30  ;;  %p2385_p13 = scmp.lt.u32.totalorder %s2377_s30, %s2896_s19 }
 0x33d   : > { %p2379_p7 = pnand %p2378_p6, %p2542_p4 }
 0x33e   : > { %p2384_p12 = por %p2383_p11, %p2382_p10 }
 0x33f   : > { %p2380_p9 = pneg %p2379_p7 }
 0x340   : > { %p2386_p0 = por %p2385_p13, %p2384_p12 }
 0x342   : > { %p2387_p1 = pnand %p2386_p0, %p2380_p9 }
 0x344   : > { %2390 = shalt.err (!%p2387_p1)
}
 0x345   : > { %s2445_s0 = smov 128   ;;  %s2446_s20 = smov 8  }
 0x346   : > { %2249 = dma.vmem_to_hbm [thread:$0]  (%p2542_p4), %s2891_s27, 512, %s2896_s19, %s2900_s16, %s2445_s0, %s2445_s0, %s2446_s20  }
 0x347 PF: > { %p2255_p2 = scmp.ge.s32.totalorder %s2441_s18, 2  ;;  %s1836_s28 = sand.u32 1, %s2421_s13  }
 0x348   : > { %s1837_s30 = scalar_lea.sflag [#allocation3], %s1836_s28 }
 0x349   : > { %p2252_p3 = pnand %p2255_p2, %p2549_p8 }
 0x34b   : > { %2416 = dma.done.wait (!%p2252_p3), %s1837_s30, 512  }
 0x34c   : > { %2418 = vsyncadd (!%p2252_p3), %s1837_s30, 4294966784  ;;  %s23_s18 = sadd.s32 1, %s2441_s18   ;;  %s2961_s13 = smov %s2425_s14 }
 0x34d   : > { %p20_p5 = scmp.ge.s32.totalorder %s23_s18, 4   ;;  %s2962_s14 = smov %s2429_s15 }
 0x34e   : > { %s2963_s15 = smov %s2555_s26  ;;  %s2964_s16 = smov %s2437_s17 }
 0x34f   : > { %s2965_s17 = smov %s2967_s21  ;;  %22 = sbr.rel (!%p20_p5) target bundleno = 6 (0x6), region = 101 }
 0x356   :  { %1842 = vsyncpa [#allocation3], 1 }
 0x357   :  { %1844 = vsyncpa [#allocation3 + $0x1], 1 }

// kernel: forward.4
= control target key start
LH: loop header
LB: loop body
LE: loop exit
PB: predicated region body
PF: predicated region fallthrough
CT: control target
= control target key end

     0   :  { %s2410_s13 = smov 0   ;;  %s2412_s14 = smov 0   ;;  %s2768_s0 = inlined_call_operand.vmem [shape: bf16[2,256,3], index: 0, kind: input, shape index: {}]   ;;  %s2769_s1 = inlined_call_operand.vmem [shape: bf16[2,256,128], index: 1, kind: input, shape index: {}]   ;;  %s2770_s2 = inlined_call_operand.vmem [shape: f32[2,32,128], index: 2, kind: input, shape index: {}]   ;;  %s2771_s3 = inlined_call_operand.vmem [shape: bf16[3,128], index: 3, kind: input, shape index: {}]   ;;  %s2772_s4 = inlined_call_operand.vmem [shape: bf16[128,128], index: 4, kind: input, shape index: {}]   ;;  %s2773_s5 = inlined_call_operand.vmem [shape: f32[1,128], index: 5, kind: input, shape index: {}]   ;;  %s2774_s6 = inlined_call_operand.vmem [shape: bf16[128,128], index: 6, kind: input, shape index: {}]   ;;  %s2775_s7 = inlined_call_operand.vmem [shape: f32[1,128], index: 7, kind: input, shape index: {}]   ;;  %s2776_s8 = inlined_call_operand.vmem [shape: bf16[128,128], index: 8, kind: input, shape index: {}]   ;;  %s2777_s9 = inlined_call_operand.vmem [shape: f32[1,128], index: 9, kind: input, shape index: {}]   ;;  %s2778_s10 = inlined_call_operand.vmem [shape: f32[2,32,128], index: 10, kind: output, shape index: {}]  }
   0x1   :  { %s2414_s15 = smov 0  }
   0x2 LB: > { %s32_s16 = sadd.s32 1, %s2348_s14  ;;  %p1942_p0 = scmp.ge.s32.totalorder %s2352_s15, 1  ;;  %s2352_s15 = sphi %s2414_s15, %s20_s15   ;;  %s2348_s14 = sphi %s2412_s14, %s2780_s14   ;;  %s2344_s13 = sphi %s2410_s13, %s2779_s13  }
   0x3   : > { %p34_p1 = scmp.ge.s32.totalorder %s32_s16, 2  ;;  %p367_p2 = scmp.lt.s32.totalorder %s2352_s15, 3 }
   0x5   : > { %s2782_s16 = smov (%p34_p1, %s32_s16), 0  ;;  %p368_p3 = pnand %p1942_p0, %p367_p2 }
   0x6   : > { %v552_v0 = vld [vmem:[%s2771_s3] sm:$0x3] (!%p368_p3)  ;;  %vm682_vm0 = vcmask (!%p368_p3), 1040384   ;;  %vm683_vm1 = vcmask (!%p368_p3), 1041408   ;;  %p432_p4 = scmp.lt.s32.totalorder (!%p368_p3), %s2344_s13, 1  ;;  %v2354_v1 = vmov (!%p368_p3), 65535  }
   0x7   : > { %371 = sbr.rel (%p368_p3) target bundleno = 814 (0x32e), region = 60  ;;  %v684_v2 = vsel (!%p368_p3), %vm682_vm0, 4294967295, %v2354_v1  ;;  %v2275_v4 = vld [vmem:[%s2772_s4] sm:$0xff] (!%p368_p3)   ;;  %vm633_vm2 = vcmask (!%p368_p3), 23552   ;;  %v2277_v6 = vld [vmem:[%s2772_s4 + $0x8] sm:$0xff] (!%p368_p3)   ;;  %v2279_v10 = vld [vmem:[%s2772_s4 + $0x10] sm:$0xff] (!%p368_p3)  }
   0x8   : > { %v685_v3 = vsel (!%p368_p3), %vm683_vm1, %v684_v2, 0  ;;  %v2281_v13 = vld [vmem:[%s2772_s4 + $0x18] sm:$0xff] (!%p368_p3)   ;;  %v2283_v14 = vld [vmem:[%s2772_s4 + $0x20] sm:$0xff] (!%p368_p3)   ;;  %v2285_v17 = vld [vmem:[%s2772_s4 + $0x28] sm:$0xff] (!%p368_p3)   ;;  %vm1537_vm3 = vcmask (!%p368_p3), 1041409   ;;  %vm1539_vm4 = vcmask (!%p368_p3), 1042434  }
   0x9   : > { %v687_v5 = vand.u32 (!%p368_p3), %v685_v3, %v552_v0  ;;  %v2287_v18 = vld [vmem:[%s2772_s4 + $0x30] sm:$0xff] (!%p368_p3)   ;;  %v2289_v24 = vld [vmem:[%s2772_s4 + $0x38] sm:$0xff] (!%p368_p3)   ;;  %v2314_v45 = vld [vmem:[%s2774_s6] sm:$0xff] (!%p368_p3)   ;;  %vm1541_vm5 = vcmask (!%p368_p3), 1043459   ;;  %vm1543_vm6 = vcmask (!%p368_p3), 1044484   ;;  %vm1545_vm7 = vcmask (!%p368_p3), 1045509  }
   0xa   : > { %v2315_v46 = vld [vmem:[%s2774_s6 + $0x8] sm:$0xff] (!%p368_p3)   ;;  %v2316_v47 = vld [vmem:[%s2774_s6 + $0x10] sm:$0xff] (!%p368_p3)   ;;  %v2317_v48 = vld [vmem:[%s2774_s6 + $0x18] sm:$0xff] (!%p368_p3)   ;;  %vm1547_vm8 = vcmask (!%p368_p3), 1046534   ;;  %vm1549_vm9 = vcmask (!%p368_p3), 1047559  }
   0xb   : > { %2093 = vmatprep.subr.bf16.mxu0 (!%p368_p3), %v687_v5  ;;  %2215 = vmatprep.subr.bf16.mxu1 (!%p368_p3), %v687_v5  ;;  %v2318_v49 = vld [vmem:[%s2774_s6 + $0x20] sm:$0xff] (!%p368_p3)   ;;  %v2319_v50 = vld [vmem:[%s2774_s6 + $0x28] sm:$0xff] (!%p368_p3)   ;;  %v2320_v53 = vld [vmem:[%s2774_s6 + $0x30] sm:$0xff] (!%p368_p3)  }
   0xc   : > { %2094 = vmatpush3.bf16.msra.mxu0 (!%p368_p3), %v687_v5  ;;  %2216 = vmatpush3.bf16.msra.mxu1 (!%p368_p3), %v687_v5  ;;  %v2321_v56 = vld [vmem:[%s2774_s6 + $0x38] sm:$0xff] (!%p368_p3)   ;;  %v2555_v59 = vld [vmem:[%s2776_s8] sm:$0xff] (!%p368_p3)  }
   0xd   : > { %2127 = vmatprep.subr.bf16.mxu0 (!%p368_p3), %v2275_v4  ;;  %2175 = vmatprep.subr.bf16.mxu1 (!%p368_p3), %v2314_v45  ;;  %v2560_v60 = vld [vmem:[%s2773_s5] ss:$0 sm:$0xff] (!%p368_p3) }
   0xe   : > { %s2784_s13 = smov (!%p432_p4, %s2344_s13), 1 }
   0xf   : > { %s2028_s21 = sshll.u32 %s2784_s13, 7  ;;  %s2030_s30 = sshll.u32 %s2784_s13, 5 }
  0x10   : > { %s2440_s24 = scalar_lea.vmem %s2768_s0, %s2028_s21  ;;  %s2462_s17 = scalar_lea.vmem %s2769_s1, %s2028_s21 }
  0x11   : > { %v2274_v7 = vld [vmem:[%s2440_s24] sm:$0xff]   ;;  %v2276_v8 = vld [vmem:[%s2440_s24 + $0x8] sm:$0xff]   ;;  %v2278_v9 = vld [vmem:[%s2440_s24 + $0x10] sm:$0xff]   ;;  %s459_s18 = scalar_lea.vmem %s2770_s2, %s2030_s30  ;;  %s469_s21 = scalar_lea.vmem %s2778_s10, %s2030_s30 }
  0x12   : > { %2095 = vmatprep.mubr.msk.bf16.mxu0 %vm633_vm2, %v2274_v7  ;;  %v2280_v11 = vld [vmem:[%s2440_s24 + $0x18] sm:$0xff]   ;;  %v2282_v12 = vld [vmem:[%s2440_s24 + $0x20] sm:$0xff]   ;;  %v2284_v15 = vld [vmem:[%s2440_s24 + $0x28] sm:$0xff]  }
  0x13   : > { %2096 = vmatmul.mubr.msk.bf16.vlgmr.msra.gmra.mrb[0].mxu0 %vm633_vm2, %v2276_v8  ;;  %v2286_v16 = vld [vmem:[%s2440_s24 + $0x30] sm:$0xff]   ;;  %v2298_v19 = vld [vmem:[%s2440_s24 + $0x40] sm:$0xff]   ;;  %v2299_v20 = vld [vmem:[%s2440_s24 + $0x48] sm:$0xff]  }
  0x14   : > { %2128 = vmatpush3.bf16.msra.mxu0 %v2275_v4  ;;  %2099 = vmatprep.mubr.msk.bf16.mxu0 %vm633_vm2, %v2278_v9  ;;  %v2288_v21 = vld [vmem:[%s2440_s24 + $0x38] sm:$0xff]   ;;  %v2290_v22 = vld [vmem:[%s2462_s17] sm:$0xff]   ;;  %v2302_v23 = vld [vmem:[%s2440_s24 + $0x50] sm:$0xff]  }
  0x15   : > { %2129 = vmatprep.subr.bf16.mxu0 %v2277_v6  ;;  %2111 = vmatprep.mubr.msk.bf16.mxu1 %vm633_vm2, %v2298_v19  ;;  %v2303_v25 = vld [vmem:[%s2440_s24 + $0x58] sm:$0xff]   ;;  %v2306_v26 = vld [vmem:[%s2440_s24 + $0x60] sm:$0xff]   ;;  %v2291_v27 = vld [vmem:[%s2462_s17 + $0x8] sm:$0xff]  }
  0x16   : > { %2112 = vmatmul.mubr.msk.bf16.vlgmr.msra.gmra.mrb[0].mxu1 %vm633_vm2, %v2299_v20  ;;  %v2292_v28 = vld [vmem:[%s2462_s17 + $0x10] sm:$0xff]   ;;  %v2307_v29 = vld [vmem:[%s2440_s24 + $0x68] sm:$0xff]   ;;  %v2293_v31 = vld [vmem:[%s2462_s17 + $0x18] sm:$0xff]  }
  0x17   : > { %2115 = vmatprep.mubr.msk.bf16.mxu1 %vm633_vm2, %v2302_v23  ;;  %v2310_v30 = vld [vmem:[%s2440_s24 + $0x70] sm:$0xff]   ;;  %v2294_v32 = vld [vmem:[%s2462_s17 + $0x20] sm:$0xff]   ;;  %v2311_v33 = vld [vmem:[%s2440_s24 + $0x78] sm:$0xff]   ;;  %2176 = vmatpush3.bf16.msra.mxu1 %v2314_v45 }
  0x18   : > { %2130 = vmatpush3.bf16.msra.mxu0 %v2277_v6  ;;  %v2295_v34 = vld [vmem:[%s2462_s17 + $0x28] sm:$0xff]   ;;  %v2296_v35 = vld [vmem:[%s2462_s17 + $0x30] sm:$0xff]   ;;  %v2297_v36 = vld [vmem:[%s2462_s17 + $0x38] sm:$0xff]   ;;  %2177 = vmatprep.subr.bf16.mxu1 %v2315_v46 }
  0x19   : > { %2131 = vmatprep.subr.bf16.mxu0 %v2279_v10  ;;  %v2300_v37 = vld [vmem:[%s2462_s17 + $0x40] sm:$0xff]   ;;  %v2301_v38 = vld [vmem:[%s2462_s17 + $0x48] sm:$0xff]   ;;  %v2304_v39 = vld [vmem:[%s2462_s17 + $0x50] sm:$0xff]  }
  0x1a   : > { %v2305_v40 = vld [vmem:[%s2462_s17 + $0x58] sm:$0xff]   ;;  %v2308_v41 = vld [vmem:[%s2462_s17 + $0x60] sm:$0xff]   ;;  %v2309_v42 = vld [vmem:[%s2462_s17 + $0x68] sm:$0xff]  }
  0x1b   : > { %2100 = vmatmul.mubr.msk.bf16.gmra.mrb[4].mxu0 %vm633_vm2, %v2280_v11  ;;  %v2312_v43 = vld [vmem:[%s2462_s17 + $0x70] sm:$0xff]   ;;  %v2313_v44 = vld [vmem:[%s2462_s17 + $0x78] sm:$0xff]   ;;  %2178 = vmatpush3.bf16.msra.mxu1 %v2315_v46 }
  0x1c   : > { %2132 = vmatpush3.bf16.msra.mxu0 %v2279_v10  ;;  %2103 = vmatprep.mubr.msk.bf16.mxu0 %vm633_vm2, %v2282_v12 }
  0x1d   : > { %2133 = vmatprep.subr.bf16.mxu0 %v2281_v13  ;;  %2179 = vmatprep.subr.bf16.mxu1 %v2316_v47 }
  0x1e   : > { %2116 = vmatmul.mubr.msk.bf16.gmra.mrb[4].mxu1 %vm633_vm2, %v2303_v25 }
  0x1f   : > { %2119 = vmatprep.mubr.msk.bf16.mxu1 %vm633_vm2, %v2306_v26  ;;  %2180 = vmatpush3.bf16.msra.mxu1 %v2316_v47 }
  0x20   : > { %2134 = vmatpush3.bf16.msra.mxu0 %v2281_v13  ;;  %2181 = vmatprep.subr.bf16.mxu1 %v2317_v48 }
  0x21   : > { %2135 = vmatprep.subr.bf16.mxu0 %v2283_v14 }
  0x23   : > { %2104 = vmatmul.mubr.msk.bf16.gmra.mrb[8].mxu0 %vm633_vm2, %v2284_v15  ;;  %2182 = vmatpush3.bf16.msra.mxu1 %v2317_v48 }
  0x24   : > { %2136 = vmatpush3.bf16.msra.mxu0 %v2283_v14  ;;  %2107 = vmatprep.mubr.msk.bf16.mxu0 %vm633_vm2, %v2286_v16 }
  0x25   : > { %2137 = vmatprep.subr.bf16.mxu0 %v2285_v17  ;;  %2183 = vmatprep.subr.bf16.mxu1 %v2318_v49 }
  0x26   : > { %2120 = vmatmul.mubr.msk.bf16.gmra.mrb[8].mxu1 %vm633_vm2, %v2307_v29 }
  0x27   : > { %2123 = vmatprep.mubr.msk.bf16.mxu1 %vm633_vm2, %v2310_v30  ;;  %2184 = vmatpush3.bf16.msra.mxu1 %v2318_v49 }
  0x28   : > { %2138 = vmatpush3.bf16.msra.mxu0 %v2285_v17  ;;  %2185 = vmatprep.subr.bf16.mxu1 %v2319_v50 }
  0x29   : > { %2139 = vmatprep.subr.bf16.mxu0 %v2287_v18 }
  0x2b   : > { %2108 = vmatmul.mubr.msk.bf16.gmra.mrb[12].mxu0 %vm633_vm2, %v2288_v21  ;;  %2186 = vmatpush3.bf16.msra.mxu1 %v2319_v50 }
  0x2c   : > { %2140 = vmatpush3.bf16.msra.mxu0 %v2287_v18  ;;  %2143 = vmatprep.mubr.bf16.mxu0 %v2290_v22 }
  0x2d   : > { %2141 = vmatprep.subr.bf16.mxu0 %v2289_v24  ;;  %2187 = vmatprep.subr.bf16.mxu1 %v2320_v53 }
  0x2e   : > { %2124 = vmatmul.mubr.msk.bf16.gmra.mrb[12].mxu1 %vm633_vm2, %v2311_v33 }
  0x2f   : > { %2188 = vmatpush3.bf16.msra.mxu1 %v2320_v53 }
  0x30   : > { %2142 = vmatpush3.bf16.msra.mxu0 %v2289_v24  ;;  %2189 = vmatprep.subr.bf16.mxu1 %v2321_v56 }
  0x33   : > { %2144 = vmatmul.mubr.bf16.vlgmr.msra.gmra.mrb[0].mxu0 %v2291_v27  ;;  %2190 = vmatpush3.bf16.msra.mxu1 %v2321_v56 }
  0x34   : > { %2147 = vmatprep.mubr.bf16.mxu0 %v2292_v28  ;;  %2195 = vmatprep.subr.bf16.mxu1 %v2555_v59 }
  0x3b   : > { %2148 = vmatmul.mubr.bf16.gmra.mrb[4].mxu0 %v2293_v31 }
  0x3c   : > { %2151 = vmatprep.mubr.bf16.mxu0 %v2294_v32 }
  0x43   : > { %2152 = vmatmul.mubr.bf16.gmra.mrb[8].mxu0 %v2295_v34 }
  0x44   : > { %2155 = vmatprep.mubr.bf16.mxu0 %v2296_v35 }
  0x4b   : > { %2156 = vmatmul.mubr.bf16.gmra.mrb[12].mxu0 %v2297_v36 }
  0x4c   : > { %2159 = vmatprep.mubr.bf16.mxu0 %v2300_v37 }
  0x53   : > { %2160 = vmatmul.mubr.bf16.gmra.mrb[16].mxu0 %v2301_v38 }
  0x54   : > { %2163 = vmatprep.mubr.bf16.mxu0 %v2304_v39 }
  0x5b   : > { %2164 = vmatmul.mubr.bf16.gmra.mrb[20].mxu0 %v2305_v40 }
  0x5c   : > { %2167 = vmatprep.mubr.bf16.mxu0 %v2308_v41 }
  0x63   : > { %2168 = vmatmul.mubr.bf16.gmra.mrb[24].mxu0 %v2309_v42 }
  0x64   : > { %2171 = vmatprep.mubr.bf16.mxu0 %v2312_v43 }
  0x6b   : > { %2172 = vmatmul.mubr.bf16.gmra.mrb[28].mxu0 %v2313_v44 }
  0xe9   : > { %v2534_v51 = vpop.f32.mrb[0].mxu1 }
  0xea   : > { %v2536_v52 = vpop.f32.mrb[1].mxu1 }
  0xeb   : > { %v2541_v54 = vpop.f32.mrb[2].mxu1 }
  0xec   : > { %v2543_v55 = vpop.f32.mrb[3].mxu1 }
  0xf1   : > { %v2548_v57 = vpop.f32.mrb[4].mxu1 }
  0xf2   : > { %v2550_v58 = vpop.f32.mrb[5].mxu1 }
  0xf3   : > { %v2562_v61 = vpop.f32.mrb[6].mxu1 }
  0xf4   : > { %v2564_v62 = vpop.f32.mrb[7].mxu1 }
  0xf9   : > { %v2571_v9 = vpop.f32.mrb[8].mxu1 }
  0xfa   : > { %v2573_v12 = vpop.f32.mrb[9].mxu1 }
  0xfb   : > { %v2575_v15 = vpop.f32.mrb[10].mxu1 }
  0xfc   : > { %v2577_v18 = vpop.f32.mrb[11].mxu1 }
 0x101   : > { %v2583_v39 = vpop.f32.mrb[12].mxu1 }
 0x102   : > { %v2585_v44 = vpop.f32.mrb[13].mxu1 }
 0x103   : > { %v2587_v49 = vpop.f32.mrb[14].mxu1 }
 0x106   : > { %v2145_v63 = vpop.f32.mrb[0].mxu0 }
 0x107   : > { %v1164_v0 = vadd.f32 %v2145_v63, %v2560_v60  ;;  %v1028_v1 = vpop.f32.mrb[1].mxu0 }
 0x108   : > { %v1162_v2 = vadd.f32 %v2560_v60, %v1028_v1  ;;  %v2146_v3 = vpop.f32.mrb[2].mxu0 }
 0x109   : > { %v1196_v4 = vmax.f32 %v1164_v0, 0.0  ;;  %v1165_v5 = vadd.f32 %v2146_v3, %v2560_v60  ;;  %v1031_v6 = vpop.f32.mrb[3].mxu0  ;;  %v2589_v0 = vpop.f32.mrb[15].mxu1 }
 0x10a   : > { %v1194_v7 = vmax.f32 %v1162_v2, 0.0  ;;  %v1163_v8 = vadd.f32 %v2560_v60, %v1031_v6 }
 0x10b   : > { %v1238_v10 = vrot.slane %v1196_v4, 4  ;;  %v1197_v11 = vmax.f32 %v1165_v5, 0.0 }
 0x10c   : > { %v1226_v13 = vrot.slane %v1194_v7, 4  ;;  %v1195_v14 = vmax.f32 %v1163_v8, 0.0 }
 0x10d   : > { %v1239_v16 = vmax.f32 %v1196_v4, %v1238_v10  ;;  %v1244_v17 = vrot.slane %v1197_v11, 4 }
 0x10e   : > { %v1227_v19 = vmax.f32 %v1194_v7, %v1226_v13  ;;  %v1232_v20 = vrot.slane %v1195_v14, 4  ;;  %v2149_v21 = vpop.f32.mrb[4].mxu0 }
 0x10f   : > { %v1240_v22 = vrot.slane %v1239_v16, 2  ;;  %v1245_v23 = vmax.f32 %v1197_v11, %v1244_v17  ;;  %v1168_v24 = vadd.f32 %v2149_v21, %v2560_v60  ;;  %v1044_v25 = vpop.f32.mrb[5].mxu0 }
 0x110   : > { %v1228_v26 = vrot.slane %v1227_v19, 2  ;;  %v1233_v27 = vmax.f32 %v1195_v14, %v1232_v20  ;;  %v1166_v28 = vadd.f32 %v2560_v60, %v1044_v25  ;;  %v2150_v29 = vpop.f32.mrb[6].mxu0 }
 0x111   : > { %v1241_v30 = vmax.f32 %v1239_v16, %v1240_v22  ;;  %v1246_v31 = vrot.slane %v1245_v23, 2  ;;  %v1200_v32 = vmax.f32 %v1168_v24, 0.0  ;;  %v1169_v33 = vadd.f32 %v2150_v29, %v2560_v60  ;;  %v1047_v34 = vpop.f32.mrb[7].mxu0 }
 0x112   : > { %v1229_v35 = vmax.f32 %v1227_v19, %v1228_v26  ;;  %v1234_v36 = vrot.slane %v1233_v27, 2  ;;  %v1198_v37 = vmax.f32 %v1166_v28, 0.0  ;;  %v1167_v38 = vadd.f32 %v2560_v60, %v1047_v34 }
 0x113   : > { %v1242_v40 = vrot.slane %v1241_v30, 1  ;;  %v1247_v41 = vmax.f32 %v1245_v23, %v1246_v31  ;;  %v1262_v42 = vrot.slane %v1200_v32, 4  ;;  %v1201_v43 = vmax.f32 %v1169_v33, 0.0 }
 0x114   : > { %v1230_v45 = vrot.slane %v1229_v35, 1  ;;  %v1235_v46 = vmax.f32 %v1233_v27, %v1234_v36  ;;  %v1250_v47 = vrot.slane %v1198_v37, 4  ;;  %v1199_v48 = vmax.f32 %v1167_v38, 0.0 }
 0x115   : > { %v1243_v50 = vmax.f32 %v1241_v30, %v1242_v40  ;;  %v1248_v53 = vrot.slane %v1247_v41, 1  ;;  %v1263_v56 = vmax.f32 %v1200_v32, %v1262_v42  ;;  %v1268_v63 = vrot.slane %v1201_v43, 4 }
 0x116   : > { %v1231_v1 = vmax.f32 %v1229_v35, %v1230_v45  ;;  %v1236_v2 = vrot.slane %v1235_v46, 1  ;;  %v1251_v3 = vmax.f32 %v1198_v37, %v1250_v47  ;;  %v1256_v4 = vrot.slane %v1199_v48, 4  ;;  %v2153_v5 = vpop.f32.mrb[8].mxu0 }
 0x117   : > { %v1420_v6 = vpack.c.bf16 %v1243_v50, %v1243_v50  ;;  %v1264_v7 = vrot.slane %v1263_v56, 2  ;;  %v1269_v8 = vmax.f32 %v1201_v43, %v1268_v63  ;;  %v1060_v10 = vpop.f32.mrb[9].mxu0  ;;  %v1249_v19 = vmax.f32 %v1247_v41, %v1248_v53 }
 0x118   : > { %v1418_v11 = vpack.c.bf16 %v1231_v1, %v1231_v1  ;;  %v1237_v13 = vmax.f32 %v1235_v46, %v1236_v2  ;;  %v1252_v14 = vrot.slane %v1251_v3, 2  ;;  %v1257_v16 = vmax.f32 %v1199_v48, %v1256_v4  ;;  %v2154_v17 = vpop.f32.mrb[10].mxu0 }
 0x119   : > { %v1265_v20 = vmax.f32 %v1263_v56, %v1264_v7  ;;  %v1270_v21 = vrot.slane %v1269_v8, 2  ;;  %v1063_v22 = vpop.f32.mrb[11].mxu0  ;;  %v1507_v23 = vunpack.c.l.b16 %v1420_v6  ;;  %v1172_v30 = vadd.f32 %v2153_v5, %v2560_v60 }
 0x11a   : > { %v1419_v24 = vpack.c.bf16 %v1237_v13, %v1237_v13  ;;  %v1253_v25 = vmax.f32 %v1251_v3, %v1252_v14  ;;  %v1258_v26 = vrot.slane %v1257_v16, 2  ;;  %v1505_v27 = vunpack.c.l.b16 %v1418_v11 }
 0x11b   : > { %v1266_v28 = vrot.slane %v1265_v20, 1  ;;  %v1271_v29 = vmax.f32 %v1269_v8, %v1270_v21  ;;  %v1170_v34 = vadd.f32 %v2560_v60, %v1060_v10  ;;  %v1421_v35 = vpack.c.bf16 %v1249_v19, %v1249_v19 }
 0x11c   : > { %v1506_v31 = vunpack.c.l.b16 %v1419_v24  ;;  %v1254_v32 = vrot.slane %v1253_v25, 1  ;;  %v1259_v33 = vmax.f32 %v1257_v16, %v1258_v26  ;;  %v1204_v37 = vmax.f32 %v1172_v30, 0.0 }
 0x11d   : > { %v1267_v36 = vmax.f32 %v1265_v20, %v1266_v28  ;;  %v1173_v38 = vadd.f32 %v2154_v17, %v2560_v60  ;;  %v1272_v42 = vrot.slane %v1271_v29, 1  ;;  %v1202_v43 = vmax.f32 %v1170_v34, 0.0 }
 0x11e   : > { %v1538_v40 = vsel %vm1537_vm3, %v1506_v31, %v1505_v27  ;;  %v1255_v41 = vmax.f32 %v1253_v25, %v1254_v32  ;;  %v2157_v45 = vpop.f32.mrb[12].mxu0  ;;  %v1260_v47 = vrot.slane %v1259_v33, 1  ;;  %v1286_v48 = vrot.slane %v1204_v37, 4 }
 0x11f   : > { %v2596_v46 = vsel %vm1539_vm4, %v1507_v23, %v1538_v40  ;;  %v1076_v50 = vpop.f32.mrb[13].mxu0  ;;  %v1424_v53 = vpack.c.bf16 %v1267_v36, %v1267_v36  ;;  %v1274_v56 = vrot.slane %v1202_v43, 4  ;;  %v1205_v63 = vmax.f32 %v1173_v38, 0.0 }
 0x120   : > { %v2158_v1 = vpop.f32.mrb[14].mxu0  ;;  %v2598_v2 = vunpack.c.l.b16 %v1421_v35  ;;  %v1287_v3 = vmax.f32 %v1204_v37, %v1286_v48  ;;  %v1171_v4 = vadd.f32 %v2560_v60, %v1063_v22  ;;  %v1422_v6 = vpack.c.bf16 %v1255_v41, %v1255_v41 }
 0x121   : > { %v1079_v5 = vpop.f32.mrb[15].mxu0  ;;  %v1273_v7 = vmax.f32 %v1271_v29, %v1272_v42  ;;  %v1275_v8 = vmax.f32 %v1202_v43, %v1274_v56  ;;  %v1292_v10 = vrot.slane %v1205_v63, 4  ;;  %v2601_v11 = vmax.f32 %v1259_v33, %v1260_v47 }
 0x122   : > { %v1288_v13 = vrot.slane %v1287_v3, 2  ;;  %v1203_v14 = vmax.f32 %v1171_v4, 0.0  ;;  %v1176_v16 = vadd.f32 %v2157_v45, %v2560_v60  ;;  %v2604_v17 = vunpack.c.l.b16 %v1424_v53 }
 0x123   : > { %v1276_v19 = vrot.slane %v1275_v8, 2  ;;  %v1293_v20 = vmax.f32 %v1205_v63, %v1292_v10  ;;  %v1174_v21 = vadd.f32 %v2560_v60, %v1076_v50  ;;  %v1177_v25 = vadd.f32 %v2158_v1, %v2560_v60 }
 0x124   : > { %v1289_v23 = vmax.f32 %v1287_v3, %v1288_v13  ;;  %v1280_v24 = vrot.slane %v1203_v14, 4  ;;  %v1208_v22 = vmax.f32 %v1176_v16, 0.0  ;;  %v1175_v29 = vadd.f32 %v2560_v60, %v1079_v5 }
 0x125   : > { %v1277_v26 = vmax.f32 %v1275_v8, %v1276_v19  ;;  %v1294_v27 = vrot.slane %v1293_v20, 2  ;;  %v1206_v28 = vmax.f32 %v1174_v21, 0.0  ;;  %v1209_v34 = vmax.f32 %v1177_v25, 0.0 }
 0x126   : > { %v2161_v30 = vpop.f32.mrb[16].mxu0  ;;  %v1290_v31 = vrot.slane %v1289_v23, 1  ;;  %v1281_v32 = vmax.f32 %v1203_v14, %v1280_v24  ;;  %v1310_v33 = vrot.slane %v1208_v22, 4  ;;  %v1207_v40 = vmax.f32 %v1175_v29, 0.0 }
 0x127   : > { %v1092_v35 = vpop.f32.mrb[17].mxu0  ;;  %v1278_v36 = vrot.slane %v1277_v26, 1  ;;  %v1295_v37 = vmax.f32 %v1293_v20, %v1294_v27  ;;  %v1298_v38 = vrot.slane %v1206_v28, 4  ;;  %v1425_v42 = vpack.c.bf16 %v1273_v7, %v1273_v7 }
 0x128   : > { %v2162_v41 = vpop.f32.mrb[18].mxu0  ;;  %v1282_v43 = vrot.slane %v1281_v32, 2  ;;  %v1311_v45 = vmax.f32 %v1208_v22, %v1310_v33  ;;  %v1316_v47 = vrot.slane %v1209_v34, 4  ;;  %v1304_v63 = vrot.slane %v1207_v40, 4 }
 0x129   : > { %v1095_v48 = vpop.f32.mrb[19].mxu0  ;;  %v1279_v50 = vmax.f32 %v1277_v26, %v1278_v36  ;;  %v1296_v53 = vrot.slane %v1295_v37, 1  ;;  %v1299_v56 = vmax.f32 %v1206_v28, %v1298_v38  ;;  %v2609_v1 = vunpack.c.l.b16 %v1422_v6 }
 0x12a   : > { %v1283_v3 = vmax.f32 %v1281_v32, %v1282_v43  ;;  %v1312_v4 = vrot.slane %v1311_v45, 2  ;;  %v1317_v5 = vmax.f32 %v1209_v34, %v1316_v47  ;;  %v1423_v8 = vpack.c.bf16 %v2601_v11, %v2601_v11 }
 0x12b   : > { %v1291_v10 = vmax.f32 %v1289_v23, %v1290_v31  ;;  %v1300_v13 = vrot.slane %v1299_v56, 2  ;;  %v1305_v14 = vmax.f32 %v1207_v40, %v1304_v63  ;;  %v1297_v7 = vmax.f32 %v1295_v37, %v1296_v53 }
 0x12c   : > { %v1284_v16 = vrot.slane %v1283_v3, 1  ;;  %v1313_v19 = vmax.f32 %v1311_v45, %v1312_v4  ;;  %v1318_v20 = vrot.slane %v1317_v5, 2  ;;  %v2613_v21 = vunpack.c.l.b16 %v1425_v42 }
 0x12d   : > { %v1426_v24 = vpack.c.bf16 %v1279_v50, %v1279_v50  ;;  %v1301_v22 = vmax.f32 %v1299_v56, %v1300_v13  ;;  %v1306_v25 = vrot.slane %v1305_v14, 2  ;;  %v1101_v29 = vadd.f32 %v2161_v30, %v2534_v51 }
 0x12e   : > { %v2165_v6 = vpop.f32.mrb[20].mxu0  ;;  %v1285_v26 = vmax.f32 %v1283_v3, %v1284_v16  ;;  %v1314_v27 = vrot.slane %v1313_v19, 1  ;;  %v1319_v28 = vmax.f32 %v1317_v5, %v1318_v20  ;;  %v1428_v11 = vpack.c.bf16 %v1291_v10, %v1291_v10 }
 0x12f   : > { %v1108_v32 = vpop.f32.mrb[21].mxu0  ;;  %v1302_v23 = vrot.slane %v1301_v22, 1  ;;  %v1307_v31 = vmax.f32 %v1305_v14, %v1306_v25  ;;  %v1093_v33 = vadd.f32 %v1092_v35, %v2536_v52  ;;  %v1429_v36 = vpack.c.bf16 %v1297_v7, %v1297_v7 }
 0x130   : > { %v2166_v34 = vpop.f32.mrb[22].mxu0  ;;  %v1427_v37 = vpack.c.bf16 %v1285_v26, %v1285_v26  ;;  %v1315_v38 = vmax.f32 %v1313_v19, %v1314_v27  ;;  %v1180_v40 = vadd.f32 %v2560_v60, %v1101_v29  ;;  %v1320_v45 = vrot.slane %v1319_v28, 1 }
 0x131   : > { %v1111_v42 = vpop.f32.mrb[23].mxu0  ;;  %v1303_v43 = vmax.f32 %v1301_v22, %v1302_v23  ;;  %v1178_v47 = vadd.f32 %v2560_v60, %v1093_v33  ;;  %v1104_v50 = vadd.f32 %v2162_v41, %v2541_v54  ;;  %v1513_v51 = vunpack.c.l.b16 %v1426_v24 }
 0x132   : > { %v1514_v30 = vunpack.c.l.b16 %v1427_v37  ;;  %v1308_v53 = vrot.slane %v1307_v31, 1  ;;  %v1212_v56 = vmax.f32 %v1180_v40, 0.0  ;;  %v1515_v63 = vunpack.c.l.b16 %v1428_v11 }
 0x133   : > { %v1432_v3 = vpack.c.bf16 %v1315_v38, %v1315_v38  ;;  %v1210_v52 = vmax.f32 %v1178_v47, 0.0  ;;  %v1181_v35 = vadd.f32 %v2560_v60, %v1104_v50  ;;  %v2621_v4 = vunpack.c.l.b16 %v1423_v8 }
 0x134   : > { %v2623_v5 = vunpack.c.l.b16 %v1429_v36  ;;  %v1551_v10 = vsel %vm1537_vm3, %v1514_v30, %v1513_v51  ;;  %v1334_v13 = vrot.slane %v1212_v56, 4  ;;  %v1430_v54 = vpack.c.bf16 %v1303_v43, %v1303_v43 }
 0x135   : > { %v2627_v14 = vsel %vm1539_vm4, %v1515_v63, %v1551_v10  ;;  %v1321_v41 = vmax.f32 %v1319_v28, %v1320_v45  ;;  %v1322_v7 = vrot.slane %v1210_v52, 4  ;;  %v2631_v19 = vmax.f32 %v1307_v31, %v1308_v53 }
 0x136   : > { %v2629_v16 = vpop.f32.mrb[24].mxu0  ;;  %v1335_v20 = vmax.f32 %v1212_v56, %v1334_v13  ;;  %v1213_v24 = vmax.f32 %v1181_v35, 0.0  ;;  %v1096_v8 = vadd.f32 %v1095_v48, %v2543_v55  ;;  %v2636_v25 = vunpack.c.l.b16 %v1432_v3 }
 0x137   : > { %v2634_v22 = vpop.f32.mrb[25].mxu0  ;;  %v1323_v26 = vmax.f32 %v1210_v52, %v1322_v7  ;;  %v1117_v27 = vadd.f32 %v2165_v6, %v2548_v57  ;;  %v1109_v29 = vadd.f32 %v1108_v32, %v2550_v58  ;;  %v1120_v33 = vadd.f32 %v2166_v34, %v2562_v61 }
 0x138   : > { %v2640_v11 = vpop.f32.mrb[26].mxu0  ;;  %v1336_v28 = vrot.slane %v1335_v20, 2  ;;  %v1340_v23 = vrot.slane %v1213_v24, 4  ;;  %v1179_v31 = vadd.f32 %v2560_v60, %v1096_v8  ;;  %v1112_v38 = vadd.f32 %v1111_v42, %v2564_v62 }
 0x139   : > { %v2644_v36 = vpop.f32.mrb[27].mxu0  ;;  %v1324_v55 = vrot.slane %v1323_v26, 2  ;;  %v1184_v48 = vadd.f32 %v2560_v60, %v1117_v27  ;;  %v1182_v37 = vadd.f32 %v2560_v60, %v1109_v29  ;;  %v1185_v32 = vadd.f32 %v2560_v60, %v1120_v33 }
 0x13a   : > { %v1337_v57 = vmax.f32 %v1335_v20, %v1336_v28  ;;  %v1341_v6 = vmax.f32 %v1213_v24, %v1340_v23  ;;  %v1211_v58 = vmax.f32 %v1179_v31, 0.0  ;;  %v1183_v47 = vadd.f32 %v2560_v60, %v1112_v38 }
 0x13b   : > { %v1325_v40 = vmax.f32 %v1323_v26, %v1324_v55  ;;  %v1216_v43 = vmax.f32 %v1184_v48, 0.0  ;;  %v1214_v45 = vmax.f32 %v1182_v37, 0.0  ;;  %v1217_v51 = vmax.f32 %v1185_v32, 0.0 }
 0x13c   : > { %v1338_v61 = vrot.slane %v1337_v57, 1  ;;  %v1342_v34 = vrot.slane %v1341_v6, 2  ;;  %v1328_v50 = vrot.slane %v1211_v58, 4  ;;  %v1433_v30 = vpack.c.bf16 %v1321_v41, %v1321_v41 }
 0x13d   : > { %v1358_v53 = vrot.slane %v1216_v43, 4  ;;  %v1346_v56 = vrot.slane %v1214_v45, 4  ;;  %v1215_v63 = vmax.f32 %v1183_v47, 0.0  ;;  %v1326_v62 = vrot.slane %v1325_v40, 1 }
 0x13e   : > { %v2651_v3 = vpop.f32.mrb[28].mxu0  ;;  %v1343_v42 = vmax.f32 %v1341_v6, %v1342_v34  ;;  %v1329_v52 = vmax.f32 %v1211_v58, %v1328_v50  ;;  %v1364_v35 = vrot.slane %v1217_v51, 4  ;;  %v2655_v13 = vunpack.c.l.b16 %v1430_v54 }
 0x13f   : > { %v2653_v10 = vpop.f32.mrb[29].mxu0  ;;  %v1359_v7 = vmax.f32 %v1216_v43, %v1358_v53  ;;  %v1347_v20 = vmax.f32 %v1214_v45, %v1346_v56  ;;  %v1352_v24 = vrot.slane %v1215_v63, 4  ;;  %v1339_v26 = vmax.f32 %v1337_v57, %v1338_v61 }
 0x140   : > { %v2657_v8 = vpop.f32.mrb[30].mxu0  ;;  %v1344_v41 = vrot.slane %v1343_v42, 1  ;;  %v1330_v27 = vrot.slane %v1329_v52, 2  ;;  %v1365_v29 = vmax.f32 %v1217_v51, %v1364_v35  ;;  %v1431_v23 = vpack.c.bf16 %v2631_v19, %v2631_v19 }
 0x141   : > { %v2659_v28 = vpop.f32.mrb[31].mxu0  ;;  %v1360_v31 = vrot.slane %v1359_v7, 2  ;;  %v1348_v33 = vrot.slane %v1347_v20, 2  ;;  %v1353_v55 = vmax.f32 %v1215_v63, %v1352_v24  ;;  %v2663_v48 = vunpack.c.l.b16 %v1433_v30 }
 0x142   : > { %v1327_v54 = vmax.f32 %v1325_v40, %v1326_v62  ;;  %v1331_v37 = vmax.f32 %v1329_v52, %v1330_v27  ;;  %v1366_v38 = vrot.slane %v1365_v29, 2  ;;  %v1345_v6 = vmax.f32 %v1343_v42, %v1344_v41 }
 0x143   : > { %v1361_v58 = vmax.f32 %v1359_v7, %v1360_v31  ;;  %v1349_v32 = vmax.f32 %v1347_v20, %v1348_v33  ;;  %v1354_v57 = vrot.slane %v1353_v55, 2  ;;  %v1436_v43 = vpack.c.bf16 %v1339_v26, %v1339_v26 }
 0x144   : > { %v1332_v45 = vrot.slane %v1331_v37, 1  ;;  %v1367_v47 = vmax.f32 %v1365_v29, %v1366_v38  ;;  %v1133_v19 = vadd.f32 %v2629_v16, %v2571_v9  ;;  %v1125_v40 = vadd.f32 %v2634_v22, %v2573_v12 }
 0x145   : > { %v1362_v61 = vrot.slane %v1361_v58, 1  ;;  %v1350_v34 = vrot.slane %v1349_v32, 1  ;;  %v1355_v50 = vmax.f32 %v1353_v55, %v1354_v57  ;;  %v1518_v51 = vunpack.c.l.b16 %v1431_v23 }
 0x146   : > { %v1434_v30 = vpack.c.bf16 %v1327_v54, %v1327_v54  ;;  %v1333_v53 = vmax.f32 %v1331_v37, %v1332_v45  ;;  %v1188_v56 = vadd.f32 %v2560_v60, %v1133_v19  ;;  %v1437_v63 = vpack.c.bf16 %v1345_v6, %v1345_v6 }
 0x147   : > { %v1351_v62 = vmax.f32 %v1349_v32, %v1350_v34  ;;  %v1368_v42 = vrot.slane %v1367_v47, 1  ;;  %v1186_v52 = vadd.f32 %v2560_v60, %v1125_v40  ;;  %v1363_v16 = vmax.f32 %v1361_v58, %v1362_v61 }
 0x148   : > { %v1435_v9 = vpack.c.bf16 %v1333_v53, %v1333_v53  ;;  %v1220_v35 = vmax.f32 %v1188_v56, 0.0  ;;  %v1136_v7 = vadd.f32 %v2640_v11, %v2575_v15  ;;  %v1523_v12 = vunpack.c.l.b16 %v1436_v43 }
 0x149   : > { %v1438_v22 = vpack.c.bf16 %v1351_v62, %v1351_v62  ;;  %v1356_v20 = vrot.slane %v1355_v50, 1  ;;  %v1218_v24 = vmax.f32 %v1186_v52, 0.0  ;;  %v1521_v26 = vunpack.c.l.b16 %v1434_v30 }
 0x14a   : > { %v1522_v41 = vunpack.c.l.b16 %v1435_v9  ;;  %v1382_v27 = vrot.slane %v1220_v35, 4  ;;  %v1189_v29 = vadd.f32 %v2560_v60, %v1136_v7  ;;  %v1524_v23 = vunpack.c.l.b16 %v1437_v63 }
 0x14b   : > { %v1525_v31 = vunpack.c.l.b16 %v1438_v22  ;;  %v1369_v33 = vmax.f32 %v1367_v47, %v1368_v42  ;;  %v1370_v55 = vrot.slane %v1218_v24, 4  ;;  %v1440_v37 = vpack.c.bf16 %v1363_v16, %v1363_v16 }
 0x14c   : > { %v1558_v54 = vsel %vm1537_vm3, %v1522_v41, %v1521_v26  ;;  %v1383_v38 = vmax.f32 %v1220_v35, %v1382_v27  ;;  %v1221_v6 = vmax.f32 %v1189_v29, 0.0  ;;  %v1357_v11 = vmax.f32 %v1355_v50, %v1356_v20 }
 0x14d   : > { %v1559_v15 = vsel %vm1539_vm4, %v1523_v12, %v1558_v54  ;;  %v1371_v58 = vmax.f32 %v1218_v24, %v1370_v55  ;;  %v1128_v32 = vadd.f32 %v2644_v36, %v2577_v18  ;;  %v1542_v47 = vsel %vm1541_vm5, %v2598_v2, %v2596_v46 }
 0x14e   : > { %v1560_v57 = vsel %vm1541_vm5, %v1524_v23, %v1559_v15  ;;  %v1384_v43 = vrot.slane %v1383_v38, 2  ;;  %v1388_v45 = vrot.slane %v1221_v6, 4  ;;  %v1544_v50 = vsel %vm1543_vm6, %v2609_v1, %v1542_v47 }
 0x14f   : > { %v1561_v19 = vsel %vm1543_vm6, %v1525_v31, %v1560_v57  ;;  %v1372_v61 = vrot.slane %v1371_v58, 2  ;;  %v1187_v34 = vadd.f32 %v2560_v60, %v1128_v32  ;;  %v1546_v18 = vsel %vm1545_vm7, %v2621_v4, %v1544_v50 }
 0x150   : > { %v1385_v40 = vmax.f32 %v1383_v38, %v1384_v43  ;;  %v1389_v30 = vmax.f32 %v1221_v6, %v1388_v45  ;;  %v1553_v36 = vsel %vm1541_vm5, %v2623_v5, %v2627_v14  ;;  %v1548_v46 = vsel %vm1547_vm8, %v2604_v17, %v1546_v18 }
 0x151   : > { %v1373_v53 = vmax.f32 %v1371_v58, %v1372_v61  ;;  %v1219_v56 = vmax.f32 %v1187_v34, 0.0  ;;  %v1554_v2 = vsel %vm1543_vm6, %v2655_v13, %v1553_v36  ;;  %v1439_v63 = vpack.c.bf16 %v1357_v11, %v1357_v11 }
 0x152   : > { %v1390_v62 = vrot.slane %v1389_v30, 2  ;;  %v1550_v1 = vsel %vm1549_vm9, %v2613_v21, %v1548_v46  ;;  %v1555_v42 = vsel %vm1545_vm7, %v1518_v51, %v1554_v2  ;;  %v1441_v4 = vpack.c.bf16 %v1369_v33, %v1369_v33 }
 0x153   : > { %v1376_v52 = vrot.slane %v1219_v56, 4  ;;  %v1556_v5 = vsel %vm1547_vm8, %v2636_v25, %v1555_v42  ;;  %v1149_v14 = vadd.f32 %v2651_v3, %v2583_v39  ;;  %v1386_v9 = vrot.slane %v1385_v40, 1 }
 0x154   : > { %v1391_v17 = vmax.f32 %v1389_v30, %v1390_v62  ;;  %v1557_v13 = vsel %vm1549_vm9, %v2663_v48, %v1556_v5  ;;  %v1141_v16 = vadd.f32 %v2653_v10, %v2585_v44  ;;  %v1374_v35 = vrot.slane %v1373_v53, 1 }
 0x155   : > { %v1377_v21 = vmax.f32 %v1219_v56, %v1376_v52  ;;  %v1572_v7 = vpack.c.b16 %v1557_v13, %v1550_v1  ;;  %v1192_v51 = vadd.f32 %v2560_v60, %v1149_v14  ;;  %v1526_v12 = vunpack.c.l.b16 %v1439_v63 }
 0x156   : > { %v1392_v22 = vrot.slane %v1391_v17, 1  ;;  %v1190_v25 = vadd.f32 %v2560_v60, %v1141_v16  ;;  %v1152_v39 = vadd.f32 %v2657_v8, %v2587_v49  ;;  %v1527_v3 = vunpack.c.l.b16 %v1440_v37 }
 0x157   : > { %v1378_v20 = vrot.slane %v1377_v21, 2  ;;  %2191 = vmatprep.mubr.bf16.mxu1 %v1572_v7  ;;  %v1224_v24 = vmax.f32 %v1192_v51, 0.0  ;;  %v1144_v48 = vadd.f32 %v2659_v28, %v2589_v0  ;;  %v1528_v44 = vunpack.c.l.b16 %v1441_v4 }
 0x158   : > { %v1387_v10 = vmax.f32 %v1385_v40, %v1386_v9  ;;  %v1222_v26 = vmax.f32 %v1190_v25, 0.0  ;;  %v1193_v41 = vadd.f32 %v2560_v60, %v1152_v39  ;;  %v1375_v27 = vmax.f32 %v1373_v53, %v1374_v35 }
 0x159   : > { %v1379_v29 = vmax.f32 %v1377_v21, %v1378_v20  ;;  %v1406_v23 = vrot.slane %v1224_v24, 4  ;;  %v1191_v31 = vadd.f32 %v2560_v60, %v1144_v48  ;;  %v1393_v33 = vmax.f32 %v1391_v17, %v1392_v22 }
 0x15a   : > { %v1394_v55 = vrot.slane %v1222_v26, 4  ;;  %v1225_v49 = vmax.f32 %v1193_v41, 0.0  ;;  %v1562_v8 = vsel %vm1545_vm7, %v1526_v12, %v1561_v19  ;;  %v1442_v11 = vpack.c.bf16 %v1375_v27, %v1375_v27  ;;  %v2326_v41 = vld [vmem:[%s2776_s8 + $0x20] sm:$0xff]   ;;  %v2328_v27 = vld [vmem:[%s2776_s8 + $0x30] sm:$0xff]  }
 0x15b   : > { %v1380_v54 = vrot.slane %v1379_v29, 1  ;;  %v1407_v37 = vmax.f32 %v1224_v24, %v1406_v23  ;;  %v1223_v38 = vmax.f32 %v1191_v31, 0.0  ;;  %v1563_v0 = vsel %vm1547_vm8, %v1527_v3, %v1562_v8  ;;  %v2008_v23 = vld [vmem:[%s2775_s7] ss:$0 sm:$0xff] }
 0x15c   : > { %v1395_v28 = vmax.f32 %v1222_v26, %v1394_v55  ;;  %v1412_v6 = vrot.slane %v1225_v49, 4  ;;  %v1564_v15 = vsel %vm1549_vm9, %v1528_v44, %v1563_v0  ;;  %v1444_v43 = vpack.c.bf16 %v1387_v10, %v1387_v10  ;;  %v2323_v44 = vld [vmem:[%s2776_s8 + $0x8] sm:$0xff]   ;;  %v2324_v10 = vld [vmem:[%s2776_s8 + $0x10] sm:$0xff]   ;;  %v2325_v26 = vld [vmem:[%s2776_s8 + $0x18] sm:$0xff]  }
 0x15d   : > { %v1381_v58 = vmax.f32 %v1379_v29, %v1380_v54  ;;  %v1408_v32 = vrot.slane %v1407_v37, 2  ;;  %v1400_v57 = vrot.slane %v1223_v38, 4  ;;  %v1445_v47 = vpack.c.bf16 %v1393_v33, %v1393_v33  ;;  %v2329_v29 = vld [vmem:[%s2776_s8 + $0x38] sm:$0xff]  }
 0x15e   : > { %v1396_v60 = vrot.slane %v1395_v28, 2  ;;  %v1413_v45 = vmax.f32 %v1225_v49, %v1412_v6  ;;  %v1529_v30 = vunpack.c.l.b16 %v1442_v11  ;;  %v1531_v56 = vunpack.c.l.b16 %v1444_v43  ;;  %v1801_v43 = vld [vmem:[%s459_s18 + $0x10] sm:$0xff] }
 0x15f   : > { %v1443_v61 = vpack.c.bf16 %v1381_v58, %v1381_v58  ;;  %v1409_v34 = vmax.f32 %v1407_v37, %v1408_v32  ;;  %v1401_v19 = vmax.f32 %v1223_v38, %v1400_v57  ;;  %v1532_v63 = vunpack.c.l.b16 %v1445_v47  ;;  %v2017_v32 = vld [vmem:[%s2777_s9] ss:$0 sm:$0xff] }
 0x160   : > { %v1397_v50 = vmax.f32 %v1395_v28, %v1396_v60  ;;  %v1414_v40 = vrot.slane %v1413_v45, 2  ;;  %v1799_v47 = vld [vmem:[%s459_s18] sm:$0xff] }
 0x161   : > { %v1530_v18 = vunpack.c.l.b16 %v1443_v61  ;;  %v1410_v36 = vrot.slane %v1409_v34, 1  ;;  %v1402_v53 = vrot.slane %v1401_v19, 2 }
 0x162   : > { %v1398_v46 = vrot.slane %v1397_v50, 1  ;;  %v1415_v2 = vmax.f32 %v1413_v45, %v1414_v40 }
 0x163   : > { %v1565_v62 = vsel %vm1537_vm3, %v1530_v18, %v1529_v30  ;;  %v1403_v1 = vmax.f32 %v1401_v19, %v1402_v53  ;;  %v1411_v4 = vmax.f32 %v1409_v34, %v1410_v36  ;;  %v1802_v19 = vld [vmem:[%s459_s18 + $0x18] sm:$0xff]  ;;  %v1800_v18 = vld [vmem:[%s459_s18 + $0x8] sm:$0xff] }
 0x164   : > { %v1566_v42 = vsel %vm1539_vm4, %v1531_v56, %v1565_v62  ;;  %v1399_v52 = vmax.f32 %v1397_v50, %v1398_v46  ;;  %v1416_v5 = vrot.slane %v1415_v2, 1 }
 0x165   : > { %v1567_v14 = vsel %vm1541_vm5, %v1532_v63, %v1566_v42  ;;  %v1404_v9 = vrot.slane %v1403_v1, 1  ;;  %v1448_v35 = vpack.c.bf16 %v1411_v4, %v1411_v4 }
 0x166   : > { %v1446_v17 = vpack.c.bf16 %v1399_v52, %v1399_v52  ;;  %v1417_v13 = vmax.f32 %v1415_v2, %v1416_v5 }
 0x167   : > { %v1405_v16 = vmax.f32 %v1403_v1, %v1404_v9  ;;  %v1535_v25 = vunpack.c.l.b16 %v1448_v35 }
 0x168   : > { %v1533_v21 = vunpack.c.l.b16 %v1446_v17  ;;  %v1449_v7 = vpack.c.bf16 %v1417_v13, %v1417_v13 }
 0x169   : > { %v1447_v51 = vpack.c.bf16 %v1405_v16, %v1405_v16 }
 0x16a   : > { %v1568_v12 = vsel %vm1543_vm6, %v1533_v21, %v1567_v14  ;;  %v1536_v39 = vunpack.c.l.b16 %v1449_v7 }
 0x16b   : > { %v1534_v22 = vunpack.c.l.b16 %v1447_v51 }
 0x16d   : > { %v1569_v3 = vsel %vm1545_vm7, %v1534_v22, %v1568_v12 }
 0x16e   : > { %v1570_v20 = vsel %vm1547_vm8, %v1535_v25, %v1569_v3 }
 0x16f   : > { %v1571_v24 = vsel %vm1549_vm9, %v1536_v39, %v1570_v20 }
 0x170   : > { %v1573_v48 = vpack.c.b16 %v1571_v24, %v1564_v15 }
 0x172   : > { %2192 = vmatmul.mubr.bf16.vlgmr.msra.gmra.mrb[16].mxu1 %v1573_v48 }
 0x173   : > { %2196 = vmatpush3.bf16.msra.mxu1 %v2555_v59  ;;  %v2327_v59 = vld [vmem:[%s2776_s8 + $0x28] sm:$0xff]  }
 0x174   : > { %2197 = vmatprep.subr.bf16.mxu1 %v2323_v44 }
 0x177   : > { %2198 = vmatpush3.bf16.msra.mxu1 %v2323_v44 }
 0x178   : > { %2199 = vmatprep.subr.bf16.mxu1 %v2324_v10 }
 0x17b   : > { %2200 = vmatpush3.bf16.msra.mxu1 %v2324_v10 }
 0x17c   : > { %2201 = vmatprep.subr.bf16.mxu1 %v2325_v26 }
 0x17f   : > { %2202 = vmatpush3.bf16.msra.mxu1 %v2325_v26 }
 0x180   : > { %2203 = vmatprep.subr.bf16.mxu1 %v2326_v41 }
 0x183   : > { %2204 = vmatpush3.bf16.msra.mxu1 %v2326_v41 }
 0x184   : > { %2205 = vmatprep.subr.bf16.mxu1 %v2327_v59 }
 0x187   : > { %2206 = vmatpush3.bf16.msra.mxu1 %v2327_v59 }
 0x188   : > { %2207 = vmatprep.subr.bf16.mxu1 %v2328_v27 }
 0x18b   : > { %2208 = vmatpush3.bf16.msra.mxu1 %v2328_v27 }
 0x18c   : > { %2209 = vmatprep.subr.bf16.mxu1 %v2329_v29 }
 0x18f   : > { %2210 = vmatpush3.bf16.msra.mxu1 %v2329_v29 }
 0x245   : > { %v2193_v31 = vpop.f32.mrb[16].mxu1 }
 0x246   : > { %v1667_v33 = vadd.f32 %v2193_v31, %v2008_v23  ;;  %v1658_v55 = vpop.f32.mrb[17].mxu1 }
 0x247   : > { %v1659_v49 = vadd.f32 %v2008_v23, %v1658_v55  ;;  %v2194_v8 = vpop.f32.mrb[18].mxu1 }
 0x248   : > { %v1670_v54 = vadd.f32 %v2194_v8, %v2008_v23  ;;  %v1661_v37 = vpop.f32.mrb[19].mxu1  ;;  %v1675_v0 = vmax.f32 %v1667_v33, 0.0 }
 0x249   : > { %v1662_v38 = vadd.f32 %v2008_v23, %v1661_v37  ;;  %v1673_v6 = vmax.f32 %v1659_v49, 0.0 }
 0x24a   : > { %v1676_v28 = vmax.f32 %v1670_v54, 0.0 }
 0x24b   : > { %v1674_v15 = vmax.f32 %v1662_v38, 0.0 }
 0x24c   : > { %v1678_v11 = vpack.c.bf16 %v1676_v28, %v1675_v0 }
 0x24d   : > { %v1677_v58 = vpack.c.bf16 %v1674_v15, %v1673_v6 }
 0x24f   : > { %2211 = vmatprep.mubr.bf16.mxu1 %v1677_v58 }
 0x250   : > { %2212 = vmatmul.mubr.bf16.vlgmr.msra.gmra.mrb[20].mxu1 %v1678_v11 }
 0x323   : > { %v2213_v57 = vpop.f32.mrb[20].mxu1 }
 0x324   : > { %v1793_v60 = vadd.f32 %v2213_v57, %v2017_v32  ;;  %v1784_v45 = vpop.f32.mrb[21].mxu1 }
 0x325   : > { %v1785_v61 = vadd.f32 %v2017_v32, %v1784_v45  ;;  %v2214_v34 = vpop.f32.mrb[22].mxu1 }
 0x326   : > { %v1805_v50 = vadd.f32 %v1801_v43, %v1793_v60  ;;  %v1796_v40 = vadd.f32 %v2214_v34, %v2017_v32  ;;  %v1787_v30 = vpop.f32.mrb[23].mxu1 }
 0x327   : > { %v1803_v36 = vadd.f32 %v1799_v47, %v1785_v61  ;;  %v1788_v53 = vadd.f32 %v2017_v32, %v1787_v30 }
 0x328   : > { %v1809_v56 = vmax.f32 %v1805_v50, 0.0  ;;  %v1806_v46 = vadd.f32 %v1802_v19, %v1796_v40 }
 0x329   : > { %v1807_v2 = vmax.f32 %v1803_v36, 0.0  ;;  %v1804_v63 = vadd.f32 %v1800_v18, %v1788_v53 }
 0x32a   : > { %1813 = vst [vmem:[%s469_s21 + $0x10] sm:$0xff] %v1809_v56  ;;  %v1810_v62 = vmax.f32 %v1806_v46, 0.0 }
 0x32b   : > { %1811 = vst [vmem:[%s469_s21] sm:$0xff] %v1807_v2  ;;  %v1808_v1 = vmax.f32 %v1804_v63, 0.0 }
 0x32c   : > { %1814 = vst [vmem:[%s469_s21 + $0x18] sm:$0xff] %v1810_v62 }
 0x32d   : > { %1812 = vst [vmem:[%s469_s21 + $0x8] sm:$0xff] %v1808_v1 }
 0x32e PF: > { %s20_s15 = sadd.s32 1, %s2352_s15   ;;  %s2779_s13 = smov %s2348_s14 }
 0x32f   : > { %p17_p5 = scmp.ge.s32.totalorder %s20_s15, 4   ;;  %s2780_s14 = smov %s2782_s16 }
 0x331   :  { %19 = sbr.rel (!%p17_p5) target bundleno = 2 (0x2), region = 96 }

</bundles_post_ra>
